<compile_context>
chip_gen: v7x
topology: tpu7x:2x2x1
jax: 0.10.0
libtpu: 0.0.40
codegen_flags: <defaults>
</compile_context>

<pallas_src>
import math

import jax
import jax.numpy as jnp
from jax.experimental import pallas as pl
from jax.experimental.pallas import tpu as pltpu

RELU_TH = 0.01      # nn.Threshold(threshold=0.01, value=0)
N_LSTM_STEPS = 8    # MESC_SD.forward applies sd_lstm 8 times


# ---------------------------------------------------------------------------
# Fused kernel: whole MESC_SD forward for the whole batch in one invocation.
# Batch samples are column-stacked: x/c carries are (H1, B*H1).
# ---------------------------------------------------------------------------
def mesc_fused_kernel(ycat_ref,
                      w1y_ref, b1y_ref, w2y_ref, b2y_ref,    # stacked (cy, fy, gy)
                      w1x_ref, b1x_ref, w2x_ref, b2x_ref,    # stacked (cx, fx, gx)
                      f1w1_ref, f1b1_ref, f1w2_ref, f1b2_ref,
                      f2w1_ref, f2b1_ref, f2w2_ref, f2b2_ref,
                      f3w1_ref, f3b1_ref, f3w2_ref, f3b2_ref,
                      out_ref):
    f32 = jnp.float32
    H1 = w1x_ref.shape[1]          # n_hidden_1
    BH1 = w2x_ref.shape[2]         # batch * n_hidden_1

    # ----- loop-invariant y-side gates: computed once, reused for all 8 steps -----
    hy = jnp.dot(w1y_ref[...], ycat_ref[...],
                 preferred_element_type=f32) + b1y_ref[...]           # (3*H1, B*C)
    cy = jnp.dot(hy[0 * H1:1 * H1], w2y_ref[0],
                 preferred_element_type=f32) + b2y_ref[0]             # (H1, B*H1)
    fy = jnp.dot(hy[1 * H1:2 * H1], w2y_ref[1],
                 preferred_element_type=f32) + b2y_ref[1]
    gy = jnp.dot(hy[2 * H1:3 * H1], w2y_ref[2],
                 preferred_element_type=f32) + b2y_ref[2]

    # Hoist x-side weight loads out of the recurrence.
    w1x = w1x_ref[...]              # (3*H1, H1)
    b1x = b1x_ref[...]              # (3*H1, 1)
    w2x_c = w2x_ref[0]              # (B*H1, B*H1) block-diagonal W2.T
    w2x_f = w2x_ref[1]
    w2x_g = w2x_ref[2]
    b2x_c = b2x_ref[0]              # (1, B*H1)
    b2x_f = b2x_ref[1]
    b2x_g = b2x_ref[2]

    # ----- 8-step recurrence; x/c stay resident on-chip the whole time -----
    def step(_, carry):
        x, c = carry                                                  # (H1, B*H1)
        hx = jnp.dot(w1x, x, preferred_element_type=f32) + b1x        # (3*H1, B*H1)
        cx = jnp.dot(hx[0 * H1:1 * H1], w2x_c, preferred_element_type=f32) + b2x_c
        fx = jnp.dot(hx[1 * H1:2 * H1], w2x_f, preferred_element_type=f32) + b2x_f
        gx = jnp.dot(hx[2 * H1:3 * H1], w2x_g, preferred_element_type=f32) + b2x_g
        c_gate = cy - cx + x
        f_gate = jax.nn.sigmoid(fy + fx)
        g_gate = jax.nn.sigmoid(gy + gx)
        c_new = f_gate * c + g_gate * c_gate
        x_new = jnp.where(c_new > RELU_TH, c_new, 0.0)
        return x_new, c_new

    x0 = jnp.zeros((H1, BH1), f32)
    c0 = jnp.zeros((H1, BH1), f32)
    x, _ = jax.lax.fori_loop(0, N_LSTM_STEPS, step, (x0, c0), unroll=True)

    # ----- FC head (each layer: stage-1 shared-left matmul, stage-2 block-diag) -----
    def lin2d(a, w1, b1, w2bd, b2):
        h = jnp.dot(w1, a, preferred_element_type=f32) + b1
        return jnp.dot(h, w2bd, preferred_element_type=f32) + b2

    o = jnp.maximum(lin2d(x, f1w1_ref[...], f1b1_ref[...],
                          f1w2_ref[...], f1b2_ref[...]), 0.0)         # (H2, B*H2)
    o = jnp.maximum(lin2d(o, f2w1_ref[...], f2b1_ref[...],
                          f2w2_ref[...], f2b2_ref[...]), 0.0)         # (H2, B*H2)
    o = jnp.maximum(lin2d(o, f3w1_ref[...], f3b1_ref[...],
                          f3w2_ref[...], f3b2_ref[...]), 0.0)         # (1, B*n_out)

    out_ref[...] = o


# ---------------------------------------------------------------------------
# Host-side parameter repacking:
#   * stack the (c, f, g) gate W1/b1 along rows (one stage-1 matmul per side)
#   * pre-transpose W2 and replicate it into a (B*in2, B*out2) block-diagonal
#     so stage-2 is one matmul for the whole column-stacked batch
#   * tile b2 across the batch, reshape b1 to (out1, 1)
# ---------------------------------------------------------------------------
def pack_params(lstm_params, fc1, fc2, fc3, batch_size):
    cy, cx, fy, fx, gy, gx = lstm_params
    B = batch_size

    def block_diag_t(w2):
        # w2: (out2, in2)  ->  block-diag of B copies of w2.T: (B*in2, B*out2)
        out2, in2 = w2.shape
        m = jnp.zeros((B * in2, B * out2), jnp.float32)
        for b in range(B):
            m = m.at[b * in2:(b + 1) * in2, b * out2:(b + 1) * out2].set(w2.T)
        return m

    def tile_b2(b2):
        return jnp.tile(b2.reshape(1, -1), (1, B))        # (1, B*out2)

    def stack3(ps):
        w1 = jnp.concatenate([p[0] for p in ps], axis=0)                   # (3*out1, in1)
        b1 = jnp.concatenate([p[1].reshape(-1, 1) for p in ps], axis=0)    # (3*out1, 1)
        w2bd = jnp.stack([block_diag_t(p[2]) for p in ps], axis=0)         # (3, B*in2, B*out2)
        b2 = jnp.stack([tile_b2(p[3]) for p in ps], axis=0)                # (3, 1, B*out2)
        return (w1, b1, w2bd, b2)

    def prep_fc(p):
        w1, b1, w2, b2 = p
        return (w1, b1.reshape(-1, 1), block_diag_t(w2), tile_b2(b2))

    return (stack3((cy, fy, gy)) + stack3((cx, fx, gx))
            + prep_fc(fc1) + prep_fc(fc2) + prep_fc(fc3))


# ---------------------------------------------------------------------------
# Forward wrapper: one pallas_call, everything resident in VMEM.
# ---------------------------------------------------------------------------
@jax.jit
def mesc_sd_forward(y, packed_params):
    B, V, C = y.shape
    n_out_total = packed_params[-1].shape[-1]          # fc3 b2 tiled: (1, B*n_out)
    n_out = n_out_total // B

    # column-stack the batch: (B, V, C) -> (V, B*C)
    y_cat = jnp.transpose(y, (1, 0, 2)).reshape(V, B * C)

    vmem_spec = pl.BlockSpec(memory_space=pltpu.MemorySpace.VMEM)
    out_flat = pl.pallas_call(
        mesc_fused_kernel,
        out_shape=jax.ShapeDtypeStruct((1, n_out_total), jnp.float32),
        in_specs=[vmem_spec] * (1 + len(packed_params)),
        out_specs=vmem_spec,
    )(y_cat, *packed_params)

    return out_flat.reshape(B, 1, n_out)


# ---------------------------------------------------------------------------
# Parameter construction (PyTorch nn.Linear-style uniform init, deterministic)
# ---------------------------------------------------------------------------
def _init_linear(key, out_f, in_f):
    k1, k2 = jax.random.split(key)
    bound = 1.0 / math.sqrt(in_f)
    w = jax.random.uniform(k1, (out_f, in_f), jnp.float32, -bound, bound)
    b = jax.random.uniform(k2, (1, out_f), jnp.float32, -bound, bound)
    return w, b


def _init_linear2d(key, in2, in1, out2, out1):
    k1, k2 = jax.random.split(key)
    w1, b1 = _init_linear(k1, out1, in1)
    w2, b2 = _init_linear(k2, out2, in2)
    return (w1, b1, w2, b2)


def init_mesc_sd_params(key, n_channels, n_voxels, n_out, h1, h2):
    keys = jax.random.split(key, 9)
    lstm_params = (
        _init_linear2d(keys[0], n_channels, n_voxels, h1, h1),    # cy
        _init_linear2d(keys[1], h1, h1, h1, h1),                  # cx
        _init_linear2d(keys[2], n_channels, n_voxels, h1, h1),    # fy
        _init_linear2d(keys[3], h1, h1, h1, h1),                  # fx
        _init_linear2d(keys[4], n_channels, n_voxels, h1, h1),    # gy
        _init_linear2d(keys[5], h1, h1, h1, h1),                  # gx
    )
    fc1 = _init_linear2d(keys[6], h1, h1, h2, h2)
    fc2 = _init_linear2d(keys[7], h2, h2, h2, h2)
    fc3 = _init_linear2d(keys[8], h2, h2, n_out, 1)
    return lstm_params, fc1, fc2, fc3


# ---------------------------------------------------------------------------
# Pure-JAX reference (for correctness check, uses the original unpacked params)
# ---------------------------------------------------------------------------
def _lin2d_ref(a, p):
    w1, b1, w2, b2 = p
    h = jnp.einsum('oi,bij->boj', w1, a) + b1.reshape(1, -1, 1)
    return jnp.einsum('boj,pj->bop', h, w2) + b2.reshape(1, 1, -1)


def mesc_sd_ref(y, lstm_params, fc1, fc2, fc3):
    B = y.shape[0]
    H1 = lstm_params[1][0].shape[0]
    x = jnp.zeros((B, H1, H1), jnp.float32)
    c = jnp.zeros((B, H1, H1), jnp.float32)
    cy_p, cx_p, fy_p, fx_p, gy_p, gx_p = lstm_params
    for _ in range(N_LSTM_STEPS):
        c_gate = _lin2d_ref(y, cy_p) - _lin2d_ref(x, cx_p) + x
        f_gate = jax.nn.sigmoid(_lin2d_ref(y, fy_p) + _lin2d_ref(x, fx_p))
        g_gate = jax.nn.sigmoid(_lin2d_ref(y, gy_p) + _lin2d_ref(x, gx_p))
        c = f_gate * c + g_gate * c_gate
        x = jnp.where(c > RELU_TH, c, 0.0)
    out = jnp.maximum(_lin2d_ref(x, fc1), 0.0)
    out = jnp.maximum(_lin2d_ref(out, fc2), 0.0)
    out = jnp.maximum(_lin2d_ref(out, fc3), 0.0)
    return out


if __name__ == "__main__":
    # Small shapes consistent with the module's forward.
    B = 2
    n_channels = 8     # number of input DWIs
    n_voxels = 27      # 3x3x3 patch
    n_out = 11
    n_hidden_1 = 32
    n_hidden_2 = 16

    key = jax.random.PRNGKey(0)
    k_par, k_in = jax.random.split(key)
    lstm_params, fc1, fc2, fc3 = init_mesc_sd_params(
        k_par, n_channels, n_voxels, n_out, n_hidden_1, n_hidden_2)

    packed = pack_params(lstm_params, fc1, fc2, fc3, batch_size=B)

    # input y: (B, n_voxels, n_channels)
    y = jax.random.normal(k_in, (B, n_voxels, n_channels), jnp.float32)

    out = mesc_sd_forward(y, packed)
    out = jax.block_until_ready(out)

    assert out.shape == (B, 1, n_out), out.shape
    ref = mesc_sd_ref(y, lstm_params, fc1, fc2, fc3)
    assert jnp.all(jnp.isfinite(out))
    assert jnp.allclose(out, ref, rtol=2e-2, atol=2e-2), (
        "mismatch vs reference", float(jnp.max(jnp.abs(out - ref))))

    print("KERNEL_OK")
</pallas_src>

<mosaic_0001>
module attributes {stable_mosaic.version = 11 : i64} {
  func.func @mesc_fused_kernel(%arg0: memref<27x16xf32, #tpu.memory_space<vmem>>, %arg1: memref<96x27xf32, #tpu.memory_space<vmem>>, %arg2: memref<96x1xf32, #tpu.memory_space<vmem>>, %arg3: memref<3x16x64xf32, #tpu.memory_space<vmem>>, %arg4: memref<3x1x64xf32, #tpu.memory_space<vmem>>, %arg5: memref<96x32xf32, #tpu.memory_space<vmem>>, %arg6: memref<96x1xf32, #tpu.memory_space<vmem>>, %arg7: memref<3x64x64xf32, #tpu.memory_space<vmem>>, %arg8: memref<3x1x64xf32, #tpu.memory_space<vmem>>, %arg9: memref<16x32xf32, #tpu.memory_space<vmem>>, %arg10: memref<16x1xf32, #tpu.memory_space<vmem>>, %arg11: memref<64x32xf32, #tpu.memory_space<vmem>>, %arg12: memref<1x32xf32, #tpu.memory_space<vmem>>, %arg13: memref<16x16xf32, #tpu.memory_space<vmem>>, %arg14: memref<16x1xf32, #tpu.memory_space<vmem>>, %arg15: memref<32x32xf32, #tpu.memory_space<vmem>>, %arg16: memref<1x32xf32, #tpu.memory_space<vmem>>, %arg17: memref<1x16xf32, #tpu.memory_space<vmem>>, %arg18: memref<1x1xf32, #tpu.memory_space<vmem>>, %arg19: memref<32x22xf32, #tpu.memory_space<vmem>>, %arg20: memref<1x22xf32, #tpu.memory_space<vmem>>, %arg21: memref<1x22xf32, #tpu.memory_space<vmem>>) attributes {dimension_semantics = [], scalar_prefetch = 0 : i64, scratch_operands = 0 : i64, tpu.core_type = #tpu.core_type<tc>} {
    %c0 = arith.constant 0 : index
    %c0_0 = arith.constant 0 : index
    %0 = vector.load %arg1[%c0, %c0_0] : memref<96x27xf32, #tpu.memory_space<vmem>>, vector<96x27xf32>
    %c0_1 = arith.constant 0 : index
    %c0_2 = arith.constant 0 : index
    %1 = vector.load %arg0[%c0_1, %c0_2] : memref<27x16xf32, #tpu.memory_space<vmem>>, vector<27x16xf32>
    %cst = arith.constant dense<0.000000e+00> : vector<96x16xf32>
    %2 = tpu.matmul %0, %1, %cst {dimension_numbers = #tpu.dot_dimension_numbers<[1], [0], [0], [1], [0, 0, 1, 1], [], []>} : vector<96x27xf32>, vector<27x16xf32>, vector<96x16xf32> -> vector<96x16xf32>
    %c0_3 = arith.constant 0 : index
    %c0_4 = arith.constant 0 : index
    %3 = vector.load %arg2[%c0_3, %c0_4] : memref<96x1xf32, #tpu.memory_space<vmem>>, vector<96x1xf32>
    %4 = vector.broadcast %3 : vector<96x1xf32> to vector<96x16xf32>
    %5 = arith.addf %2, %4 : vector<96x16xf32>
    %6 = vector.extract_strided_slice %5 {offsets = [0, 0], sizes = [32, 16], strides = [1, 1]} : vector<96x16xf32> to vector<32x16xf32>
    %c0_5 = arith.constant 0 : index
    %c0_6 = arith.constant 0 : index
    %c0_7 = arith.constant 0 : index
    %7 = vector.load %arg3[%c0_5, %c0_6, %c0_7] : memref<3x16x64xf32, #tpu.memory_space<vmem>>, vector<1x16x64xf32>
    %8 = vector.shape_cast %7 : vector<1x16x64xf32> to vector<16x64xf32>
    %cst_8 = arith.constant dense<0.000000e+00> : vector<32x64xf32>
    %9 = tpu.matmul %6, %8, %cst_8 {dimension_numbers = #tpu.dot_dimension_numbers<[1], [0], [0], [1], [0, 0, 1, 1], [], []>} : vector<32x16xf32>, vector<16x64xf32>, vector<32x64xf32> -> vector<32x64xf32>
    %c0_9 = arith.constant 0 : index
    %c0_10 = arith.constant 0 : index
    %c0_11 = arith.constant 0 : index
    %10 = vector.load %arg4[%c0_9, %c0_10, %c0_11] : memref<3x1x64xf32, #tpu.memory_space<vmem>>, vector<1x1x64xf32>
    %11 = vector.shape_cast %10 : vector<1x1x64xf32> to vector<1x64xf32>
    %12 = vector.broadcast %11 : vector<1x64xf32> to vector<32x64xf32>
    %13 = arith.addf %9, %12 : vector<32x64xf32>
    %14 = vector.extract_strided_slice %5 {offsets = [32, 0], sizes = [32, 16], strides = [1, 1]} : vector<96x16xf32> to vector<32x16xf32>
    %c1 = arith.constant 1 : index
    %c0_12 = arith.constant 0 : index
    %c0_13 = arith.constant 0 : index
    %15 = vector.load %arg3[%c1, %c0_12, %c0_13] : memref<3x16x64xf32, #tpu.memory_space<vmem>>, vector<1x16x64xf32>
    %16 = vector.shape_cast %15 : vector<1x16x64xf32> to vector<16x64xf32>
    %cst_14 = arith.constant dense<0.000000e+00> : vector<32x64xf32>
    %17 = tpu.matmul %14, %16, %cst_14 {dimension_numbers = #tpu.dot_dimension_numbers<[1], [0], [0], [1], [0, 0, 1, 1], [], []>} : vector<32x16xf32>, vector<16x64xf32>, vector<32x64xf32> -> vector<32x64xf32>
    %c1_15 = arith.constant 1 : index
    %c0_16 = arith.constant 0 : index
    %c0_17 = arith.constant 0 : index
    %18 = vector.load %arg4[%c1_15, %c0_16, %c0_17] : memref<3x1x64xf32, #tpu.memory_space<vmem>>, vector<1x1x64xf32>
    %19 = vector.shape_cast %18 : vector<1x1x64xf32> to vector<1x64xf32>
    %20 = vector.broadcast %19 : vector<1x64xf32> to vector<32x64xf32>
    %21 = arith.addf %17, %20 : vector<32x64xf32>
    %22 = vector.extract_strided_slice %5 {offsets = [64, 0], sizes = [32, 16], strides = [1, 1]} : vector<96x16xf32> to vector<32x16xf32>
    %c2 = arith.constant 2 : index
    %c0_18 = arith.constant 0 : index
    %c0_19 = arith.constant 0 : index
    %23 = vector.load %arg3[%c2, %c0_18, %c0_19] : memref<3x16x64xf32, #tpu.memory_space<vmem>>, vector<1x16x64xf32>
    %24 = vector.shape_cast %23 : vector<1x16x64xf32> to vector<16x64xf32>
    %cst_20 = arith.constant dense<0.000000e+00> : vector<32x64xf32>
    %25 = tpu.matmul %22, %24, %cst_20 {dimension_numbers = #tpu.dot_dimension_numbers<[1], [0], [0], [1], [0, 0, 1, 1], [], []>} : vector<32x16xf32>, vector<16x64xf32>, vector<32x64xf32> -> vector<32x64xf32>
    %c2_21 = arith.constant 2 : index
    %c0_22 = arith.constant 0 : index
    %c0_23 = arith.constant 0 : index
    %26 = vector.load %arg4[%c2_21, %c0_22, %c0_23] : memref<3x1x64xf32, #tpu.memory_space<vmem>>, vector<1x1x64xf32>
    %27 = vector.shape_cast %26 : vector<1x1x64xf32> to vector<1x64xf32>
    %28 = vector.broadcast %27 : vector<1x64xf32> to vector<32x64xf32>
    %29 = arith.addf %25, %28 : vector<32x64xf32>
    %c0_24 = arith.constant 0 : index
    %c0_25 = arith.constant 0 : index
    %30 = vector.load %arg5[%c0_24, %c0_25] : memref<96x32xf32, #tpu.memory_space<vmem>>, vector<96x32xf32>
    %c0_26 = arith.constant 0 : index
    %c0_27 = arith.constant 0 : index
    %31 = vector.load %arg6[%c0_26, %c0_27] : memref<96x1xf32, #tpu.memory_space<vmem>>, vector<96x1xf32>
    %c0_28 = arith.constant 0 : index
    %c0_29 = arith.constant 0 : index
    %c0_30 = arith.constant 0 : index
    %32 = vector.load %arg7[%c0_28, %c0_29, %c0_30] : memref<3x64x64xf32, #tpu.memory_space<vmem>>, vector<1x64x64xf32>
    %33 = vector.shape_cast %32 : vector<1x64x64xf32> to vector<64x64xf32>
    %c1_31 = arith.constant 1 : index
    %c0_32 = arith.constant 0 : index
    %c0_33 = arith.constant 0 : index
    %34 = vector.load %arg7[%c1_31, %c0_32, %c0_33] : memref<3x64x64xf32, #tpu.memory_space<vmem>>, vector<1x64x64xf32>
    %35 = vector.shape_cast %34 : vector<1x64x64xf32> to vector<64x64xf32>
    %c2_34 = arith.constant 2 : index
    %c0_35 = arith.constant 0 : index
    %c0_36 = arith.constant 0 : index
    %36 = vector.load %arg7[%c2_34, %c0_35, %c0_36] : memref<3x64x64xf32, #tpu.memory_space<vmem>>, vector<1x64x64xf32>
    %37 = vector.shape_cast %36 : vector<1x64x64xf32> to vector<64x64xf32>
    %c0_37 = arith.constant 0 : index
    %c0_38 = arith.constant 0 : index
    %c0_39 = arith.constant 0 : index
    %38 = vector.load %arg8[%c0_37, %c0_38, %c0_39] : memref<3x1x64xf32, #tpu.memory_space<vmem>>, vector<1x1x64xf32>
    %39 = vector.shape_cast %38 : vector<1x1x64xf32> to vector<1x64xf32>
    %c1_40 = arith.constant 1 : index
    %c0_41 = arith.constant 0 : index
    %c0_42 = arith.constant 0 : index
    %40 = vector.load %arg8[%c1_40, %c0_41, %c0_42] : memref<3x1x64xf32, #tpu.memory_space<vmem>>, vector<1x1x64xf32>
    %41 = vector.shape_cast %40 : vector<1x1x64xf32> to vector<1x64xf32>
    %c2_43 = arith.constant 2 : index
    %c0_44 = arith.constant 0 : index
    %c0_45 = arith.constant 0 : index
    %42 = vector.load %arg8[%c2_43, %c0_44, %c0_45] : memref<3x1x64xf32, #tpu.memory_space<vmem>>, vector<1x1x64xf32>
    %43 = vector.shape_cast %42 : vector<1x1x64xf32> to vector<1x64xf32>
    %cst_46 = arith.constant 0.000000e+00 : f32
    %44 = vector.broadcast %cst_46 : f32 to vector<32x64xf32>
    %cst_47 = arith.constant 0.000000e+00 : f32
    %45 = vector.broadcast %cst_47 : f32 to vector<32x64xf32>
    %c0_i32 = arith.constant 0 : i32
    %cst_48 = arith.constant dense<0.000000e+00> : vector<96x64xf32>
    %46 = tpu.matmul %30, %44, %cst_48 {dimension_numbers = #tpu.dot_dimension_numbers<[1], [0], [0], [1], [0, 0, 1, 1], [], []>} : vector<96x32xf32>, vector<32x64xf32>, vector<96x64xf32> -> vector<96x64xf32>
    %47 = vector.broadcast %31 : vector<96x1xf32> to vector<96x64xf32>
    %48 = arith.addf %46, %47 : vector<96x64xf32>
    %49 = vector.extract_strided_slice %48 {offsets = [0, 0], sizes = [32, 64], strides = [1, 1]} : vector<96x64xf32> to vector<32x64xf32>
    %cst_49 = arith.constant dense<0.000000e+00> : vector<32x64xf32>
    %50 = tpu.matmul %49, %33, %cst_49 {dimension_numbers = #tpu.dot_dimension_numbers<[1], [0], [0], [1], [0, 0, 1, 1], [], []>} : vector<32x64xf32>, vector<64x64xf32>, vector<32x64xf32> -> vector<32x64xf32>
    %51 = vector.broadcast %39 : vector<1x64xf32> to vector<32x64xf32>
    %52 = arith.addf %50, %51 : vector<32x64xf32>
    %53 = vector.extract_strided_slice %48 {offsets = [32, 0], sizes = [32, 64], strides = [1, 1]} : vector<96x64xf32> to vector<32x64xf32>
    %cst_50 = arith.constant dense<0.000000e+00> : vector<32x64xf32>
    %54 = tpu.matmul %53, %35, %cst_50 {dimension_numbers = #tpu.dot_dimension_numbers<[1], [0], [0], [1], [0, 0, 1, 1], [], []>} : vector<32x64xf32>, vector<64x64xf32>, vector<32x64xf32> -> vector<32x64xf32>
    %55 = vector.broadcast %41 : vector<1x64xf32> to vector<32x64xf32>
    %56 = arith.addf %54, %55 : vector<32x64xf32>
    %57 = vector.extract_strided_slice %48 {offsets = [64, 0], sizes = [32, 64], strides = [1, 1]} : vector<96x64xf32> to vector<32x64xf32>
    %cst_51 = arith.constant dense<0.000000e+00> : vector<32x64xf32>
    %58 = tpu.matmul %57, %37, %cst_51 {dimension_numbers = #tpu.dot_dimension_numbers<[1], [0], [0], [1], [0, 0, 1, 1], [], []>} : vector<32x64xf32>, vector<64x64xf32>, vector<32x64xf32> -> vector<32x64xf32>
    %59 = vector.broadcast %43 : vector<1x64xf32> to vector<32x64xf32>
    %60 = arith.addf %58, %59 : vector<32x64xf32>
    %61 = arith.subf %13, %52 : vector<32x64xf32>
    %62 = arith.addf %61, %44 : vector<32x64xf32>
    %63 = arith.addf %21, %56 : vector<32x64xf32>
    %64 = arith.negf %63 : vector<32x64xf32>
    %65 = math.exp %64 : vector<32x64xf32>
    %cst_52 = arith.constant 1.000000e+00 : f32
    %66 = vector.broadcast %cst_52 : f32 to vector<32x64xf32>
    %67 = arith.addf %66, %65 : vector<32x64xf32>
    %68 = arith.divf %66, %67 : vector<32x64xf32>
    %69 = arith.addf %29, %60 : vector<32x64xf32>
    %70 = arith.negf %69 : vector<32x64xf32>
    %71 = math.exp %70 : vector<32x64xf32>
    %cst_53 = arith.constant 1.000000e+00 : f32
    %72 = vector.broadcast %cst_53 : f32 to vector<32x64xf32>
    %73 = arith.addf %72, %71 : vector<32x64xf32>
    %74 = arith.divf %72, %73 : vector<32x64xf32>
    %75 = arith.mulf %68, %45 : vector<32x64xf32>
    %76 = arith.mulf %74, %62 : vector<32x64xf32>
    %77 = arith.addf %75, %76 : vector<32x64xf32>
    %cst_54 = arith.constant 0.00999999977 : f32
    %78 = vector.broadcast %cst_54 : f32 to vector<32x64xf32>
    %79 = arith.cmpf ogt, %77, %78 : vector<32x64xf32>
    %cst_55 = arith.constant 0.000000e+00 : f32
    %80 = vector.broadcast %cst_55 : f32 to vector<32x64xf32>
    %81 = arith.select %79, %77, %80 : vector<32x64xi1>, vector<32x64xf32>
    %c1_i32 = arith.constant 1 : i32
    %cst_56 = arith.constant dense<0.000000e+00> : vector<96x64xf32>
    %82 = tpu.matmul %30, %81, %cst_56 {dimension_numbers = #tpu.dot_dimension_numbers<[1], [0], [0], [1], [0, 0, 1, 1], [], []>} : vector<96x32xf32>, vector<32x64xf32>, vector<96x64xf32> -> vector<96x64xf32>
    %83 = vector.broadcast %31 : vector<96x1xf32> to vector<96x64xf32>
    %84 = arith.addf %82, %83 : vector<96x64xf32>
    %85 = vector.extract_strided_slice %84 {offsets = [0, 0], sizes = [32, 64], strides = [1, 1]} : vector<96x64xf32> to vector<32x64xf32>
    %cst_57 = arith.constant dense<0.000000e+00> : vector<32x64xf32>
    %86 = tpu.matmul %85, %33, %cst_57 {dimension_numbers = #tpu.dot_dimension_numbers<[1], [0], [0], [1], [0, 0, 1, 1], [], []>} : vector<32x64xf32>, vector<64x64xf32>, vector<32x64xf32> -> vector<32x64xf32>
    %87 = vector.broadcast %39 : vector<1x64xf32> to vector<32x64xf32>
    %88 = arith.addf %86, %87 : vector<32x64xf32>
    %89 = vector.extract_strided_slice %84 {offsets = [32, 0], sizes = [32, 64], strides = [1, 1]} : vector<96x64xf32> to vector<32x64xf32>
    %cst_58 = arith.constant dense<0.000000e+00> : vector<32x64xf32>
    %90 = tpu.matmul %89, %35, %cst_58 {dimension_numbers = #tpu.dot_dimension_numbers<[1], [0], [0], [1], [0, 0, 1, 1], [], []>} : vector<32x64xf32>, vector<64x64xf32>, vector<32x64xf32> -> vector<32x64xf32>
    %91 = vector.broadcast %41 : vector<1x64xf32> to vector<32x64xf32>
    %92 = arith.addf %90, %91 : vector<32x64xf32>
    %93 = vector.extract_strided_slice %84 {offsets = [64, 0], sizes = [32, 64], strides = [1, 1]} : vector<96x64xf32> to vector<32x64xf32>
    %cst_59 = arith.constant dense<0.000000e+00> : vector<32x64xf32>
    %94 = tpu.matmul %93, %37, %cst_59 {dimension_numbers = #tpu.dot_dimension_numbers<[1], [0], [0], [1], [0, 0, 1, 1], [], []>} : vector<32x64xf32>, vector<64x64xf32>, vector<32x64xf32> -> vector<32x64xf32>
    %95 = vector.broadcast %43 : vector<1x64xf32> to vector<32x64xf32>
    %96 = arith.addf %94, %95 : vector<32x64xf32>
    %97 = arith.subf %13, %88 : vector<32x64xf32>
    %98 = arith.addf %97, %81 : vector<32x64xf32>
    %99 = arith.addf %21, %92 : vector<32x64xf32>
    %100 = arith.negf %99 : vector<32x64xf32>
    %101 = math.exp %100 : vector<32x64xf32>
    %cst_60 = arith.constant 1.000000e+00 : f32
    %102 = vector.broadcast %cst_60 : f32 to vector<32x64xf32>
    %103 = arith.addf %102, %101 : vector<32x64xf32>
    %104 = arith.divf %102, %103 : vector<32x64xf32>
    %105 = arith.addf %29, %96 : vector<32x64xf32>
    %106 = arith.negf %105 : vector<32x64xf32>
    %107 = math.exp %106 : vector<32x64xf32>
    %cst_61 = arith.constant 1.000000e+00 : f32
    %108 = vector.broadcast %cst_61 : f32 to vector<32x64xf32>
    %109 = arith.addf %108, %107 : vector<32x64xf32>
    %110 = arith.divf %108, %109 : vector<32x64xf32>
    %111 = arith.mulf %104, %77 : vector<32x64xf32>
    %112 = arith.mulf %110, %98 : vector<32x64xf32>
    %113 = arith.addf %111, %112 : vector<32x64xf32>
    %cst_62 = arith.constant 0.00999999977 : f32
    %114 = vector.broadcast %cst_62 : f32 to vector<32x64xf32>
    %115 = arith.cmpf ogt, %113, %114 : vector<32x64xf32>
    %cst_63 = arith.constant 0.000000e+00 : f32
    %116 = vector.broadcast %cst_63 : f32 to vector<32x64xf32>
    %117 = arith.select %115, %113, %116 : vector<32x64xi1>, vector<32x64xf32>
    %c2_i32 = arith.constant 2 : i32
    %cst_64 = arith.constant dense<0.000000e+00> : vector<96x64xf32>
    %118 = tpu.matmul %30, %117, %cst_64 {dimension_numbers = #tpu.dot_dimension_numbers<[1], [0], [0], [1], [0, 0, 1, 1], [], []>} : vector<96x32xf32>, vector<32x64xf32>, vector<96x64xf32> -> vector<96x64xf32>
    %119 = vector.broadcast %31 : vector<96x1xf32> to vector<96x64xf32>
    %120 = arith.addf %118, %119 : vector<96x64xf32>
    %121 = vector.extract_strided_slice %120 {offsets = [0, 0], sizes = [32, 64], strides = [1, 1]} : vector<96x64xf32> to vector<32x64xf32>
    %cst_65 = arith.constant dense<0.000000e+00> : vector<32x64xf32>
    %122 = tpu.matmul %121, %33, %cst_65 {dimension_numbers = #tpu.dot_dimension_numbers<[1], [0], [0], [1], [0, 0, 1, 1], [], []>} : vector<32x64xf32>, vector<64x64xf32>, vector<32x64xf32> -> vector<32x64xf32>
    %123 = vector.broadcast %39 : vector<1x64xf32> to vector<32x64xf32>
    %124 = arith.addf %122, %123 : vector<32x64xf32>
    %125 = vector.extract_strided_slice %120 {offsets = [32, 0], sizes = [32, 64], strides = [1, 1]} : vector<96x64xf32> to vector<32x64xf32>
    %cst_66 = arith.constant dense<0.000000e+00> : vector<32x64xf32>
    %126 = tpu.matmul %125, %35, %cst_66 {dimension_numbers = #tpu.dot_dimension_numbers<[1], [0], [0], [1], [0, 0, 1, 1], [], []>} : vector<32x64xf32>, vector<64x64xf32>, vector<32x64xf32> -> vector<32x64xf32>
    %127 = vector.broadcast %41 : vector<1x64xf32> to vector<32x64xf32>
    %128 = arith.addf %126, %127 : vector<32x64xf32>
    %129 = vector.extract_strided_slice %120 {offsets = [64, 0], sizes = [32, 64], strides = [1, 1]} : vector<96x64xf32> to vector<32x64xf32>
    %cst_67 = arith.constant dense<0.000000e+00> : vector<32x64xf32>
    %130 = tpu.matmul %129, %37, %cst_67 {dimension_numbers = #tpu.dot_dimension_numbers<[1], [0], [0], [1], [0, 0, 1, 1], [], []>} : vector<32x64xf32>, vector<64x64xf32>, vector<32x64xf32> -> vector<32x64xf32>
    %131 = vector.broadcast %43 : vector<1x64xf32> to vector<32x64xf32>
    %132 = arith.addf %130, %131 : vector<32x64xf32>
    %133 = arith.subf %13, %124 : vector<32x64xf32>
    %134 = arith.addf %133, %117 : vector<32x64xf32>
    %135 = arith.addf %21, %128 : vector<32x64xf32>
    %136 = arith.negf %135 : vector<32x64xf32>
    %137 = math.exp %136 : vector<32x64xf32>
    %cst_68 = arith.constant 1.000000e+00 : f32
    %138 = vector.broadcast %cst_68 : f32 to vector<32x64xf32>
    %139 = arith.addf %138, %137 : vector<32x64xf32>
    %140 = arith.divf %138, %139 : vector<32x64xf32>
    %141 = arith.addf %29, %132 : vector<32x64xf32>
    %142 = arith.negf %141 : vector<32x64xf32>
    %143 = math.exp %142 : vector<32x64xf32>
    %cst_69 = arith.constant 1.000000e+00 : f32
    %144 = vector.broadcast %cst_69 : f32 to vector<32x64xf32>
    %145 = arith.addf %144, %143 : vector<32x64xf32>
    %146 = arith.divf %144, %145 : vector<32x64xf32>
    %147 = arith.mulf %140, %113 : vector<32x64xf32>
    %148 = arith.mulf %146, %134 : vector<32x64xf32>
    %149 = arith.addf %147, %148 : vector<32x64xf32>
    %cst_70 = arith.constant 0.00999999977 : f32
    %150 = vector.broadcast %cst_70 : f32 to vector<32x64xf32>
    %151 = arith.cmpf ogt, %149, %150 : vector<32x64xf32>
    %cst_71 = arith.constant 0.000000e+00 : f32
    %152 = vector.broadcast %cst_71 : f32 to vector<32x64xf32>
    %153 = arith.select %151, %149, %152 : vector<32x64xi1>, vector<32x64xf32>
    %c3_i32 = arith.constant 3 : i32
    %cst_72 = arith.constant dense<0.000000e+00> : vector<96x64xf32>
    %154 = tpu.matmul %30, %153, %cst_72 {dimension_numbers = #tpu.dot_dimension_numbers<[1], [0], [0], [1], [0, 0, 1, 1], [], []>} : vector<96x32xf32>, vector<32x64xf32>, vector<96x64xf32> -> vector<96x64xf32>
    %155 = vector.broadcast %31 : vector<96x1xf32> to vector<96x64xf32>
    %156 = arith.addf %154, %155 : vector<96x64xf32>
    %157 = vector.extract_strided_slice %156 {offsets = [0, 0], sizes = [32, 64], strides = [1, 1]} : vector<96x64xf32> to vector<32x64xf32>
    %cst_73 = arith.constant dense<0.000000e+00> : vector<32x64xf32>
    %158 = tpu.matmul %157, %33, %cst_73 {dimension_numbers = #tpu.dot_dimension_numbers<[1], [0], [0], [1], [0, 0, 1, 1], [], []>} : vector<32x64xf32>, vector<64x64xf32>, vector<32x64xf32> -> vector<32x64xf32>
    %159 = vector.broadcast %39 : vector<1x64xf32> to vector<32x64xf32>
    %160 = arith.addf %158, %159 : vector<32x64xf32>
    %161 = vector.extract_strided_slice %156 {offsets = [32, 0], sizes = [32, 64], strides = [1, 1]} : vector<96x64xf32> to vector<32x64xf32>
    %cst_74 = arith.constant dense<0.000000e+00> : vector<32x64xf32>
    %162 = tpu.matmul %161, %35, %cst_74 {dimension_numbers = #tpu.dot_dimension_numbers<[1], [0], [0], [1], [0, 0, 1, 1], [], []>} : vector<32x64xf32>, vector<64x64xf32>, vector<32x64xf32> -> vector<32x64xf32>
    %163 = vector.broadcast %41 : vector<1x64xf32> to vector<32x64xf32>
    %164 = arith.addf %162, %163 : vector<32x64xf32>
    %165 = vector.extract_strided_slice %156 {offsets = [64, 0], sizes = [32, 64], strides = [1, 1]} : vector<96x64xf32> to vector<32x64xf32>
    %cst_75 = arith.constant dense<0.000000e+00> : vector<32x64xf32>
    %166 = tpu.matmul %165, %37, %cst_75 {dimension_numbers = #tpu.dot_dimension_numbers<[1], [0], [0], [1], [0, 0, 1, 1], [], []>} : vector<32x64xf32>, vector<64x64xf32>, vector<32x64xf32> -> vector<32x64xf32>
    %167 = vector.broadcast %43 : vector<1x64xf32> to vector<32x64xf32>
    %168 = arith.addf %166, %167 : vector<32x64xf32>
    %169 = arith.subf %13, %160 : vector<32x64xf32>
    %170 = arith.addf %169, %153 : vector<32x64xf32>
    %171 = arith.addf %21, %164 : vector<32x64xf32>
    %172 = arith.negf %171 : vector<32x64xf32>
    %173 = math.exp %172 : vector<32x64xf32>
    %cst_76 = arith.constant 1.000000e+00 : f32
    %174 = vector.broadcast %cst_76 : f32 to vector<32x64xf32>
    %175 = arith.addf %174, %173 : vector<32x64xf32>
    %176 = arith.divf %174, %175 : vector<32x64xf32>
    %177 = arith.addf %29, %168 : vector<32x64xf32>
    %178 = arith.negf %177 : vector<32x64xf32>
    %179 = math.exp %178 : vector<32x64xf32>
    %cst_77 = arith.constant 1.000000e+00 : f32
    %180 = vector.broadcast %cst_77 : f32 to vector<32x64xf32>
    %181 = arith.addf %180, %179 : vector<32x64xf32>
    %182 = arith.divf %180, %181 : vector<32x64xf32>
    %183 = arith.mulf %176, %149 : vector<32x64xf32>
    %184 = arith.mulf %182, %170 : vector<32x64xf32>
    %185 = arith.addf %183, %184 : vector<32x64xf32>
    %cst_78 = arith.constant 0.00999999977 : f32
    %186 = vector.broadcast %cst_78 : f32 to vector<32x64xf32>
    %187 = arith.cmpf ogt, %185, %186 : vector<32x64xf32>
    %cst_79 = arith.constant 0.000000e+00 : f32
    %188 = vector.broadcast %cst_79 : f32 to vector<32x64xf32>
    %189 = arith.select %187, %185, %188 : vector<32x64xi1>, vector<32x64xf32>
    %c4_i32 = arith.constant 4 : i32
    %cst_80 = arith.constant dense<0.000000e+00> : vector<96x64xf32>
    %190 = tpu.matmul %30, %189, %cst_80 {dimension_numbers = #tpu.dot_dimension_numbers<[1], [0], [0], [1], [0, 0, 1, 1], [], []>} : vector<96x32xf32>, vector<32x64xf32>, vector<96x64xf32> -> vector<96x64xf32>
    %191 = vector.broadcast %31 : vector<96x1xf32> to vector<96x64xf32>
    %192 = arith.addf %190, %191 : vector<96x64xf32>
    %193 = vector.extract_strided_slice %192 {offsets = [0, 0], sizes = [32, 64], strides = [1, 1]} : vector<96x64xf32> to vector<32x64xf32>
    %cst_81 = arith.constant dense<0.000000e+00> : vector<32x64xf32>
    %194 = tpu.matmul %193, %33, %cst_81 {dimension_numbers = #tpu.dot_dimension_numbers<[1], [0], [0], [1], [0, 0, 1, 1], [], []>} : vector<32x64xf32>, vector<64x64xf32>, vector<32x64xf32> -> vector<32x64xf32>
    %195 = vector.broadcast %39 : vector<1x64xf32> to vector<32x64xf32>
    %196 = arith.addf %194, %195 : vector<32x64xf32>
    %197 = vector.extract_strided_slice %192 {offsets = [32, 0], sizes = [32, 64], strides = [1, 1]} : vector<96x64xf32> to vector<32x64xf32>
    %cst_82 = arith.constant dense<0.000000e+00> : vector<32x64xf32>
    %198 = tpu.matmul %197, %35, %cst_82 {dimension_numbers = #tpu.dot_dimension_numbers<[1], [0], [0], [1], [0, 0, 1, 1], [], []>} : vector<32x64xf32>, vector<64x64xf32>, vector<32x64xf32> -> vector<32x64xf32>
    %199 = vector.broadcast %41 : vector<1x64xf32> to vector<32x64xf32>
    %200 = arith.addf %198, %199 : vector<32x64xf32>
    %201 = vector.extract_strided_slice %192 {offsets = [64, 0], sizes = [32, 64], strides = [1, 1]} : vector<96x64xf32> to vector<32x64xf32>
    %cst_83 = arith.constant dense<0.000000e+00> : vector<32x64xf32>
    %202 = tpu.matmul %201, %37, %cst_83 {dimension_numbers = #tpu.dot_dimension_numbers<[1], [0], [0], [1], [0, 0, 1, 1], [], []>} : vector<32x64xf32>, vector<64x64xf32>, vector<32x64xf32> -> vector<32x64xf32>
    %203 = vector.broadcast %43 : vector<1x64xf32> to vector<32x64xf32>
    %204 = arith.addf %202, %203 : vector<32x64xf32>
    %205 = arith.subf %13, %196 : vector<32x64xf32>
    %206 = arith.addf %205, %189 : vector<32x64xf32>
    %207 = arith.addf %21, %200 : vector<32x64xf32>
    %208 = arith.negf %207 : vector<32x64xf32>
    %209 = math.exp %208 : vector<32x64xf32>
    %cst_84 = arith.constant 1.000000e+00 : f32
    %210 = vector.broadcast %cst_84 : f32 to vector<32x64xf32>
    %211 = arith.addf %210, %209 : vector<32x64xf32>
    %212 = arith.divf %210, %211 : vector<32x64xf32>
    %213 = arith.addf %29, %204 : vector<32x64xf32>
    %214 = arith.negf %213 : vector<32x64xf32>
    %215 = math.exp %214 : vector<32x64xf32>
    %cst_85 = arith.constant 1.000000e+00 : f32
    %216 = vector.broadcast %cst_85 : f32 to vector<32x64xf32>
    %217 = arith.addf %216, %215 : vector<32x64xf32>
    %218 = arith.divf %216, %217 : vector<32x64xf32>
    %219 = arith.mulf %212, %185 : vector<32x64xf32>
    %220 = arith.mulf %218, %206 : vector<32x64xf32>
    %221 = arith.addf %219, %220 : vector<32x64xf32>
    %cst_86 = arith.constant 0.00999999977 : f32
    %222 = vector.broadcast %cst_86 : f32 to vector<32x64xf32>
    %223 = arith.cmpf ogt, %221, %222 : vector<32x64xf32>
    %cst_87 = arith.constant 0.000000e+00 : f32
    %224 = vector.broadcast %cst_87 : f32 to vector<32x64xf32>
    %225 = arith.select %223, %221, %224 : vector<32x64xi1>, vector<32x64xf32>
    %c5_i32 = arith.constant 5 : i32
    %cst_88 = arith.constant dense<0.000000e+00> : vector<96x64xf32>
    %226 = tpu.matmul %30, %225, %cst_88 {dimension_numbers = #tpu.dot_dimension_numbers<[1], [0], [0], [1], [0, 0, 1, 1], [], []>} : vector<96x32xf32>, vector<32x64xf32>, vector<96x64xf32> -> vector<96x64xf32>
    %227 = vector.broadcast %31 : vector<96x1xf32> to vector<96x64xf32>
    %228 = arith.addf %226, %227 : vector<96x64xf32>
    %229 = vector.extract_strided_slice %228 {offsets = [0, 0], sizes = [32, 64], strides = [1, 1]} : vector<96x64xf32> to vector<32x64xf32>
    %cst_89 = arith.constant dense<0.000000e+00> : vector<32x64xf32>
    %230 = tpu.matmul %229, %33, %cst_89 {dimension_numbers = #tpu.dot_dimension_numbers<[1], [0], [0], [1], [0, 0, 1, 1], [], []>} : vector<32x64xf32>, vector<64x64xf32>, vector<32x64xf32> -> vector<32x64xf32>
    %231 = vector.broadcast %39 : vector<1x64xf32> to vector<32x64xf32>
    %232 = arith.addf %230, %231 : vector<32x64xf32>
    %233 = vector.extract_strided_slice %228 {offsets = [32, 0], sizes = [32, 64], strides = [1, 1]} : vector<96x64xf32> to vector<32x64xf32>
    %cst_90 = arith.constant dense<0.000000e+00> : vector<32x64xf32>
    %234 = tpu.matmul %233, %35, %cst_90 {dimension_numbers = #tpu.dot_dimension_numbers<[1], [0], [0], [1], [0, 0, 1, 1], [], []>} : vector<32x64xf32>, vector<64x64xf32>, vector<32x64xf32> -> vector<32x64xf32>
    %235 = vector.broadcast %41 : vector<1x64xf32> to vector<32x64xf32>
    %236 = arith.addf %234, %235 : vector<32x64xf32>
    %237 = vector.extract_strided_slice %228 {offsets = [64, 0], sizes = [32, 64], strides = [1, 1]} : vector<96x64xf32> to vector<32x64xf32>
    %cst_91 = arith.constant dense<0.000000e+00> : vector<32x64xf32>
    %238 = tpu.matmul %237, %37, %cst_91 {dimension_numbers = #tpu.dot_dimension_numbers<[1], [0], [0], [1], [0, 0, 1, 1], [], []>} : vector<32x64xf32>, vector<64x64xf32>, vector<32x64xf32> -> vector<32x64xf32>
    %239 = vector.broadcast %43 : vector<1x64xf32> to vector<32x64xf32>
    %240 = arith.addf %238, %239 : vector<32x64xf32>
    %241 = arith.subf %13, %232 : vector<32x64xf32>
    %242 = arith.addf %241, %225 : vector<32x64xf32>
    %243 = arith.addf %21, %236 : vector<32x64xf32>
    %244 = arith.negf %243 : vector<32x64xf32>
    %245 = math.exp %244 : vector<32x64xf32>
    %cst_92 = arith.constant 1.000000e+00 : f32
    %246 = vector.broadcast %cst_92 : f32 to vector<32x64xf32>
    %247 = arith.addf %246, %245 : vector<32x64xf32>
    %248 = arith.divf %246, %247 : vector<32x64xf32>
    %249 = arith.addf %29, %240 : vector<32x64xf32>
    %250 = arith.negf %249 : vector<32x64xf32>
    %251 = math.exp %250 : vector<32x64xf32>
    %cst_93 = arith.constant 1.000000e+00 : f32
    %252 = vector.broadcast %cst_93 : f32 to vector<32x64xf32>
    %253 = arith.addf %252, %251 : vector<32x64xf32>
    %254 = arith.divf %252, %253 : vector<32x64xf32>
    %255 = arith.mulf %248, %221 : vector<32x64xf32>
    %256 = arith.mulf %254, %242 : vector<32x64xf32>
    %257 = arith.addf %255, %256 : vector<32x64xf32>
    %cst_94 = arith.constant 0.00999999977 : f32
    %258 = vector.broadcast %cst_94 : f32 to vector<32x64xf32>
    %259 = arith.cmpf ogt, %257, %258 : vector<32x64xf32>
    %cst_95 = arith.constant 0.000000e+00 : f32
    %260 = vector.broadcast %cst_95 : f32 to vector<32x64xf32>
    %261 = arith.select %259, %257, %260 : vector<32x64xi1>, vector<32x64xf32>
    %c6_i32 = arith.constant 6 : i32
    %cst_96 = arith.constant dense<0.000000e+00> : vector<96x64xf32>
    %262 = tpu.matmul %30, %261, %cst_96 {dimension_numbers = #tpu.dot_dimension_numbers<[1], [0], [0], [1], [0, 0, 1, 1], [], []>} : vector<96x32xf32>, vector<32x64xf32>, vector<96x64xf32> -> vector<96x64xf32>
    %263 = vector.broadcast %31 : vector<96x1xf32> to vector<96x64xf32>
    %264 = arith.addf %262, %263 : vector<96x64xf32>
    %265 = vector.extract_strided_slice %264 {offsets = [0, 0], sizes = [32, 64], strides = [1, 1]} : vector<96x64xf32> to vector<32x64xf32>
    %cst_97 = arith.constant dense<0.000000e+00> : vector<32x64xf32>
    %266 = tpu.matmul %265, %33, %cst_97 {dimension_numbers = #tpu.dot_dimension_numbers<[1], [0], [0], [1], [0, 0, 1, 1], [], []>} : vector<32x64xf32>, vector<64x64xf32>, vector<32x64xf32> -> vector<32x64xf32>
    %267 = vector.broadcast %39 : vector<1x64xf32> to vector<32x64xf32>
    %268 = arith.addf %266, %267 : vector<32x64xf32>
    %269 = vector.extract_strided_slice %264 {offsets = [32, 0], sizes = [32, 64], strides = [1, 1]} : vector<96x64xf32> to vector<32x64xf32>
    %cst_98 = arith.constant dense<0.000000e+00> : vector<32x64xf32>
    %270 = tpu.matmul %269, %35, %cst_98 {dimension_numbers = #tpu.dot_dimension_numbers<[1], [0], [0], [1], [0, 0, 1, 1], [], []>} : vector<32x64xf32>, vector<64x64xf32>, vector<32x64xf32> -> vector<32x64xf32>
    %271 = vector.broadcast %41 : vector<1x64xf32> to vector<32x64xf32>
    %272 = arith.addf %270, %271 : vector<32x64xf32>
    %273 = vector.extract_strided_slice %264 {offsets = [64, 0], sizes = [32, 64], strides = [1, 1]} : vector<96x64xf32> to vector<32x64xf32>
    %cst_99 = arith.constant dense<0.000000e+00> : vector<32x64xf32>
    %274 = tpu.matmul %273, %37, %cst_99 {dimension_numbers = #tpu.dot_dimension_numbers<[1], [0], [0], [1], [0, 0, 1, 1], [], []>} : vector<32x64xf32>, vector<64x64xf32>, vector<32x64xf32> -> vector<32x64xf32>
    %275 = vector.broadcast %43 : vector<1x64xf32> to vector<32x64xf32>
    %276 = arith.addf %274, %275 : vector<32x64xf32>
    %277 = arith.subf %13, %268 : vector<32x64xf32>
    %278 = arith.addf %277, %261 : vector<32x64xf32>
    %279 = arith.addf %21, %272 : vector<32x64xf32>
    %280 = arith.negf %279 : vector<32x64xf32>
    %281 = math.exp %280 : vector<32x64xf32>
    %cst_100 = arith.constant 1.000000e+00 : f32
    %282 = vector.broadcast %cst_100 : f32 to vector<32x64xf32>
    %283 = arith.addf %282, %281 : vector<32x64xf32>
    %284 = arith.divf %282, %283 : vector<32x64xf32>
    %285 = arith.addf %29, %276 : vector<32x64xf32>
    %286 = arith.negf %285 : vector<32x64xf32>
    %287 = math.exp %286 : vector<32x64xf32>
    %cst_101 = arith.constant 1.000000e+00 : f32
    %288 = vector.broadcast %cst_101 : f32 to vector<32x64xf32>
    %289 = arith.addf %288, %287 : vector<32x64xf32>
    %290 = arith.divf %288, %289 : vector<32x64xf32>
    %291 = arith.mulf %284, %257 : vector<32x64xf32>
    %292 = arith.mulf %290, %278 : vector<32x64xf32>
    %293 = arith.addf %291, %292 : vector<32x64xf32>
    %cst_102 = arith.constant 0.00999999977 : f32
    %294 = vector.broadcast %cst_102 : f32 to vector<32x64xf32>
    %295 = arith.cmpf ogt, %293, %294 : vector<32x64xf32>
    %cst_103 = arith.constant 0.000000e+00 : f32
    %296 = vector.broadcast %cst_103 : f32 to vector<32x64xf32>
    %297 = arith.select %295, %293, %296 : vector<32x64xi1>, vector<32x64xf32>
    %c7_i32 = arith.constant 7 : i32
    %cst_104 = arith.constant dense<0.000000e+00> : vector<96x64xf32>
    %298 = tpu.matmul %30, %297, %cst_104 {dimension_numbers = #tpu.dot_dimension_numbers<[1], [0], [0], [1], [0, 0, 1, 1], [], []>} : vector<96x32xf32>, vector<32x64xf32>, vector<96x64xf32> -> vector<96x64xf32>
    %299 = vector.broadcast %31 : vector<96x1xf32> to vector<96x64xf32>
    %300 = arith.addf %298, %299 : vector<96x64xf32>
    %301 = vector.extract_strided_slice %300 {offsets = [0, 0], sizes = [32, 64], strides = [1, 1]} : vector<96x64xf32> to vector<32x64xf32>
    %cst_105 = arith.constant dense<0.000000e+00> : vector<32x64xf32>
    %302 = tpu.matmul %301, %33, %cst_105 {dimension_numbers = #tpu.dot_dimension_numbers<[1], [0], [0], [1], [0, 0, 1, 1], [], []>} : vector<32x64xf32>, vector<64x64xf32>, vector<32x64xf32> -> vector<32x64xf32>
    %303 = vector.broadcast %39 : vector<1x64xf32> to vector<32x64xf32>
    %304 = arith.addf %302, %303 : vector<32x64xf32>
    %305 = vector.extract_strided_slice %300 {offsets = [32, 0], sizes = [32, 64], strides = [1, 1]} : vector<96x64xf32> to vector<32x64xf32>
    %cst_106 = arith.constant dense<0.000000e+00> : vector<32x64xf32>
    %306 = tpu.matmul %305, %35, %cst_106 {dimension_numbers = #tpu.dot_dimension_numbers<[1], [0], [0], [1], [0, 0, 1, 1], [], []>} : vector<32x64xf32>, vector<64x64xf32>, vector<32x64xf32> -> vector<32x64xf32>
    %307 = vector.broadcast %41 : vector<1x64xf32> to vector<32x64xf32>
    %308 = arith.addf %306, %307 : vector<32x64xf32>
    %309 = vector.extract_strided_slice %300 {offsets = [64, 0], sizes = [32, 64], strides = [1, 1]} : vector<96x64xf32> to vector<32x64xf32>
    %cst_107 = arith.constant dense<0.000000e+00> : vector<32x64xf32>
    %310 = tpu.matmul %309, %37, %cst_107 {dimension_numbers = #tpu.dot_dimension_numbers<[1], [0], [0], [1], [0, 0, 1, 1], [], []>} : vector<32x64xf32>, vector<64x64xf32>, vector<32x64xf32> -> vector<32x64xf32>
    %311 = vector.broadcast %43 : vector<1x64xf32> to vector<32x64xf32>
    %312 = arith.addf %310, %311 : vector<32x64xf32>
    %313 = arith.subf %13, %304 : vector<32x64xf32>
    %314 = arith.addf %313, %297 : vector<32x64xf32>
    %315 = arith.addf %21, %308 : vector<32x64xf32>
    %316 = arith.negf %315 : vector<32x64xf32>
    %317 = math.exp %316 : vector<32x64xf32>
    %cst_108 = arith.constant 1.000000e+00 : f32
    %318 = vector.broadcast %cst_108 : f32 to vector<32x64xf32>
    %319 = arith.addf %318, %317 : vector<32x64xf32>
    %320 = arith.divf %318, %319 : vector<32x64xf32>
    %321 = arith.addf %29, %312 : vector<32x64xf32>
    %322 = arith.negf %321 : vector<32x64xf32>
    %323 = math.exp %322 : vector<32x64xf32>
    %cst_109 = arith.constant 1.000000e+00 : f32
    %324 = vector.broadcast %cst_109 : f32 to vector<32x64xf32>
    %325 = arith.addf %324, %323 : vector<32x64xf32>
    %326 = arith.divf %324, %325 : vector<32x64xf32>
    %327 = arith.mulf %320, %293 : vector<32x64xf32>
    %328 = arith.mulf %326, %314 : vector<32x64xf32>
    %329 = arith.addf %327, %328 : vector<32x64xf32>
    %cst_110 = arith.constant 0.00999999977 : f32
    %330 = vector.broadcast %cst_110 : f32 to vector<32x64xf32>
    %331 = arith.cmpf ogt, %329, %330 : vector<32x64xf32>
    %cst_111 = arith.constant 0.000000e+00 : f32
    %332 = vector.broadcast %cst_111 : f32 to vector<32x64xf32>
    %333 = arith.select %331, %329, %332 : vector<32x64xi1>, vector<32x64xf32>
    %c0_112 = arith.constant 0 : index
    %c0_113 = arith.constant 0 : index
    %334 = vector.load %arg9[%c0_112, %c0_113] : memref<16x32xf32, #tpu.memory_space<vmem>>, vector<16x32xf32>
    %c0_114 = arith.constant 0 : index
    %c0_115 = arith.constant 0 : index
    %335 = vector.load %arg10[%c0_114, %c0_115] : memref<16x1xf32, #tpu.memory_space<vmem>>, vector<16x1xf32>
    %c0_116 = arith.constant 0 : index
    %c0_117 = arith.constant 0 : index
    %336 = vector.load %arg11[%c0_116, %c0_117] : memref<64x32xf32, #tpu.memory_space<vmem>>, vector<64x32xf32>
    %c0_118 = arith.constant 0 : index
    %c0_119 = arith.constant 0 : index
    %337 = vector.load %arg12[%c0_118, %c0_119] : memref<1x32xf32, #tpu.memory_space<vmem>>, vector<1x32xf32>
    %cst_120 = arith.constant dense<0.000000e+00> : vector<16x64xf32>
    %338 = tpu.matmul %334, %333, %cst_120 {dimension_numbers = #tpu.dot_dimension_numbers<[1], [0], [0], [1], [0, 0, 1, 1], [], []>} : vector<16x32xf32>, vector<32x64xf32>, vector<16x64xf32> -> vector<16x64xf32>
    %339 = vector.broadcast %335 : vector<16x1xf32> to vector<16x64xf32>
    %340 = arith.addf %338, %339 : vector<16x64xf32>
    %cst_121 = arith.constant dense<0.000000e+00> : vector<16x32xf32>
    %341 = tpu.matmul %340, %336, %cst_121 {dimension_numbers = #tpu.dot_dimension_numbers<[1], [0], [0], [1], [0, 0, 1, 1], [], []>} : vector<16x64xf32>, vector<64x32xf32>, vector<16x32xf32> -> vector<16x32xf32>
    %342 = vector.broadcast %337 : vector<1x32xf32> to vector<16x32xf32>
    %343 = arith.addf %341, %342 : vector<16x32xf32>
    %cst_122 = arith.constant 0.000000e+00 : f32
    %344 = vector.broadcast %cst_122 : f32 to vector<16x32xf32>
    %345 = arith.maximumf %343, %344 : vector<16x32xf32>
    %c0_123 = arith.constant 0 : index
    %c0_124 = arith.constant 0 : index
    %346 = vector.load %arg13[%c0_123, %c0_124] : memref<16x16xf32, #tpu.memory_space<vmem>>, vector<16x16xf32>
    %c0_125 = arith.constant 0 : index
    %c0_126 = arith.constant 0 : index
    %347 = vector.load %arg14[%c0_125, %c0_126] : memref<16x1xf32, #tpu.memory_space<vmem>>, vector<16x1xf32>
    %c0_127 = arith.constant 0 : index
    %c0_128 = arith.constant 0 : index
    %348 = vector.load %arg15[%c0_127, %c0_128] : memref<32x32xf32, #tpu.memory_space<vmem>>, vector<32x32xf32>
    %c0_129 = arith.constant 0 : index
    %c0_130 = arith.constant 0 : index
    %349 = vector.load %arg16[%c0_129, %c0_130] : memref<1x32xf32, #tpu.memory_space<vmem>>, vector<1x32xf32>
    %cst_131 = arith.constant dense<0.000000e+00> : vector<16x32xf32>
    %350 = tpu.matmul %346, %345, %cst_131 {dimension_numbers = #tpu.dot_dimension_numbers<[1], [0], [0], [1], [0, 0, 1, 1], [], []>} : vector<16x16xf32>, vector<16x32xf32>, vector<16x32xf32> -> vector<16x32xf32>
    %351 = vector.broadcast %347 : vector<16x1xf32> to vector<16x32xf32>
    %352 = arith.addf %350, %351 : vector<16x32xf32>
    %cst_132 = arith.constant dense<0.000000e+00> : vector<16x32xf32>
    %353 = tpu.matmul %352, %348, %cst_132 {dimension_numbers = #tpu.dot_dimension_numbers<[1], [0], [0], [1], [0, 0, 1, 1], [], []>} : vector<16x32xf32>, vector<32x32xf32>, vector<16x32xf32> -> vector<16x32xf32>
    %354 = vector.broadcast %349 : vector<1x32xf32> to vector<16x32xf32>
    %355 = arith.addf %353, %354 : vector<16x32xf32>
    %cst_133 = arith.constant 0.000000e+00 : f32
    %356 = vector.broadcast %cst_133 : f32 to vector<16x32xf32>
    %357 = arith.maximumf %355, %356 : vector<16x32xf32>
    %c0_134 = arith.constant 0 : index
    %c0_135 = arith.constant 0 : index
    %358 = vector.load %arg17[%c0_134, %c0_135] : memref<1x16xf32, #tpu.memory_space<vmem>>, vector<1x16xf32>
    %c0_136 = arith.constant 0 : index
    %c0_137 = arith.constant 0 : index
    %359 = vector.load %arg18[%c0_136, %c0_137] : memref<1x1xf32, #tpu.memory_space<vmem>>, vector<1x1xf32>
    %c0_138 = arith.constant 0 : index
    %c0_139 = arith.constant 0 : index
    %360 = vector.load %arg19[%c0_138, %c0_139] : memref<32x22xf32, #tpu.memory_space<vmem>>, vector<32x22xf32>
    %c0_140 = arith.constant 0 : index
    %c0_141 = arith.constant 0 : index
    %361 = vector.load %arg20[%c0_140, %c0_141] : memref<1x22xf32, #tpu.memory_space<vmem>>, vector<1x22xf32>
    %cst_142 = arith.constant dense<0.000000e+00> : vector<1x32xf32>
    %362 = tpu.matmul %358, %357, %cst_142 {dimension_numbers = #tpu.dot_dimension_numbers<[1], [0], [0], [1], [0, 0, 1, 1], [], []>} : vector<1x16xf32>, vector<16x32xf32>, vector<1x32xf32> -> vector<1x32xf32>
    %363 = vector.broadcast %359 : vector<1x1xf32> to vector<1x32xf32>
    %364 = arith.addf %362, %363 : vector<1x32xf32>
    %cst_143 = arith.constant dense<0.000000e+00> : vector<1x22xf32>
    %365 = tpu.matmul %364, %360, %cst_143 {dimension_numbers = #tpu.dot_dimension_numbers<[1], [0], [0], [1], [0, 0, 1, 1], [], []>} : vector<1x32xf32>, vector<32x22xf32>, vector<1x22xf32> -> vector<1x22xf32>
    %366 = arith.addf %365, %361 : vector<1x22xf32>
    %cst_144 = arith.constant 0.000000e+00 : f32
    %367 = vector.broadcast %cst_144 : f32 to vector<1x22xf32>
    %368 = arith.maximumf %366, %367 : vector<1x22xf32>
    %c0_145 = arith.constant 0 : index
    %c0_146 = arith.constant 0 : index
    %369 = vector.load %arg21[%c0_145, %c0_146] : memref<1x22xf32, #tpu.memory_space<vmem>>, vector<1x22xf32>
    tpu.vector_store %arg21[%c0_145, %c0_146], %368 {strides = array<i32>} : memref<1x22xf32, #tpu.memory_space<vmem>>, vector<1x22xf32>,
    return
  }
}

</mosaic_0001>

<bundles_post_ra>
// kernel: mesc_sd_forward.1
= control target key start
LH: loop header
LB: loop body
LE: loop exit
PB: predicated region body
PF: predicated region fallthrough
CT: control target
= control target key end

     0   :  { %vm195_vm0 = vcmask 1042432   ;;  %vm158_vm1 = vcmask 220160   ;;  %v7889_v3 = vmov 0   ;;  %vm7890_vm2 = vmmov 1   ;;  %s9829_s0 = inlined_call_operand.vmem [shape: f32[27,16], index: 0, kind: input, shape index: {}]   ;;  %s9830_s1 = inlined_call_operand.vmem [shape: f32[96,27], index: 1, kind: input, shape index: {}]   ;;  %s9831_s18 = inlined_call_operand.<no memory space> [shape: f32[1,1], index: 18, kind: input, shape index: {}]   ;;  %s9832_s2 = inlined_call_operand.vmem [shape: f32[96,1], index: 2, kind: input, shape index: {}]   ;;  %s9833_s6 = inlined_call_operand.vmem [shape: f32[96,1], index: 6, kind: input, shape index: {}]   ;;  %s9834_s10 = inlined_call_operand.vmem [shape: f32[16,1], index: 10, kind: input, shape index: {}]   ;;  %s9835_s14 = inlined_call_operand.vmem [shape: f32[16,1], index: 14, kind: input, shape index: {}]   ;;  %s9836_s3 = inlined_call_operand.vmem [shape: f32[3,16,64], index: 3, kind: input, shape index: {}]   ;;  %s9837_s5 = inlined_call_operand.vmem [shape: f32[96,32], index: 5, kind: input, shape index: {}]   ;;  %s9838_s7 = inlined_call_operand.vmem [shape: f32[3,64,64], index: 7, kind: input, shape index: {}]   ;;  %s9839_s4 = inlined_call_operand.vmem [shape: f32[3,1,64], index: 4, kind: input, shape index: {}]   ;;  %s9840_s8 = inlined_call_operand.vmem [shape: f32[3,1,64], index: 8, kind: input, shape index: {}]   ;;  %s9841_s9 = inlined_call_operand.vmem [shape: f32[16,32], index: 9, kind: input, shape index: {}]   ;;  %s9842_s11 = inlined_call_operand.vmem [shape: f32[64,32], index: 11, kind: input, shape index: {}]   ;;  %s9843_s13 = inlined_call_operand.vmem [shape: f32[16,16], index: 13, kind: input, shape index: {}]   ;;  %s9844_s12 = inlined_call_operand.vmem [shape: f32[1,32], index: 12, kind: input, shape index: {}]   ;;  %s9845_s15 = inlined_call_operand.vmem [shape: f32[32,32], index: 15, kind: input, shape index: {}]   ;;  %s9846_s19 = inlined_call_operand.vmem [shape: f32[32,22], index: 19, kind: input, shape index: {}]   ;;  %s9847_s16 = inlined_call_operand.vmem [shape: f32[1,32], index: 16, kind: input, shape index: {}]   ;;  %s9848_s17 = inlined_call_operand.vmem [shape: f32[1,16], index: 17, kind: input, shape index: {}]   ;;  %s9849_s20 = inlined_call_operand.vmem [shape: f32[1,22], index: 20, kind: input, shape index: {}]   ;;  %s9850_s21 = inlined_call_operand.vmem [shape: f32[1,22], index: 21, kind: output, shape index: {}]  }
   0x1   :  { %9925 = sst [smem:[#allocation22_spill]] %s9829_s0  ;;  %7601 = vset.pattern.permute.xlu0 %v7889_v3  ;;  %7602 = vset.pattern.permute.xlu1 %v7889_v3  ;;  %vm7062_vm3 = vmpackc.low %vm195_vm0, %vm7890_vm2  ;;  %v5013_v46 = vld [vmem:[%s9835_s14] sm:$0xff]  ;;  %v5014_v47 = vld [vmem:[%s9835_s14 + $0x8] sm:$0xff]  ;;  %vm333_vm4 = vcmask 130048   ;;  %vm762_vm5 = vcmask 261120   ;;  %vm930_vm6 = vcmask 523264  }
   0x2   :  { %9926 = sst [smem:[#allocation23_spill]] %s9830_s1  ;;  %s9931_s26 = sld [smem:[#allocation22_spill]]  ;;  %v324_v49 = vld [vmem:[%s9836_s3] sm:$0xff]  ;;  %v325_v50 = vld [vmem:[%s9836_s3 + $0x8] sm:$0xff]  ;;  %v5387_v52 = vld [vmem:[%s9836_s3 + $0x10] sm:$0xff] }
   0x3   :  { %9927 = sst [smem:[#allocation24_spill]] %s9831_s18  ;;  %s9933_s24 = sld [smem:[#allocation23_spill]]  ;;  %v7067_v51 = vpack.c.bf16 %v325_v50, %v324_v49  ;;  %v5388_v53 = vld [vmem:[%s9836_s3 + $0x18] sm:$0xff]  ;;  %v5395_v60 = vld [vmem:[%s9836_s3 + $0x20] sm:$0xff]  ;;  %v5396_v61 = vld [vmem:[%s9836_s3 + $0x28] sm:$0xff] }
   0x4   :  { %9928 = sst [smem:[#allocation25_spill]] %s9832_s2  ;;  %s9932_s30 = sld [smem:[#allocation24_spill]]  ;;  %v7071_v54 = vpack.c.bf16 %v5388_v53, %v5387_v52  ;;  %v675_v49 = vld [vmem:[%s9838_s7 + $0x20] sm:$0xff]  ;;  %v676_v50 = vld [vmem:[%s9838_s7 + $0x28] sm:$0xff]  ;;  %v677_v52 = vld [vmem:[%s9838_s7 + $0x30] sm:$0xff] }
   0x5   :  { %9929 = sst [smem:[#allocation26_spill]] %s9833_s6  ;;  %s9934_s27 = sld [smem:[#allocation25_spill]]  ;;  %7068 = vmatprep.subr.bf16.mxu1 %v7067_v51  ;;  %v678_v53 = vld [vmem:[%s9838_s7 + $0x38] sm:$0xff] }
   0x6   :  { %9930 = sst [smem:[#allocation27_spill]] %s9834_s10  ;;  %s9935_s6 = sld [smem:[#allocation26_spill]]  ;;  %7070 = vmatpush3.bf16.msra.mxu1 %v7067_v51  ;;  %v8294_v51 = vpack.c.bf16 %v676_v50, %v675_v49 }
   0x7   :  { %s9936_s29 = sld [smem:[#allocation27_spill]]  ;;  %7072 = vmatprep.subr.bf16.mxu1 %v7071_v54 }
   0x8   :  { %v82_v0 = vld [vmem:[%s9931_s26] sm:$0xff]  ;;  %v83_v1 = vld [vmem:[%s9931_s26 + $0x8] sm:$0xff]  ;;  %v84_v2 = vld [vmem:[%s9931_s26 + $0x10] sm:$0xff]  ;;  %9939 = vst [vmem:[#allocation5_spill] sm:$0xff] %v8294_v51 }
   0x9   :  { %v7057_v5 = vpack.c.bf16 %v83_v1, %v82_v0  ;;  %v85_v6 = vld [vmem:[%s9931_s26 + $0x18] sm:$0x7]  ;;  %v70_v7 = vld [vmem:[%s9933_s24] sm:$0xff]  ;;  %v71_v12 = vld [vmem:[%s9933_s24 + $0x8] sm:$0xff] }
   0xa   :  { %v26_v4 = vstv %s9932_s30  ;;  %v7061_v8 = vpack.c.bf16 %v85_v6, %v84_v2  ;;  %6213 = vmatprep.mubr.msk.f32.mxu0 %vm158_vm1, %v70_v7  ;;  %v72_v14 = vld [vmem:[%s9933_s24 + $0x10] sm:$0xff]  ;;  %v73_v16 = vld [vmem:[%s9933_s24 + $0x18] sm:$0xff]  ;;  %v74_v18 = vld [vmem:[%s9933_s24 + $0x20] sm:$0xff]  ;;  %v7075_v2 = vpack.c.bf16 %v5396_v61, %v5395_v60 }
   0xb   :  { %27 = vst [vmem:[#allocation2] sm:$0x1] %v26_v4  ;;  %7058 = vmatprep.subr.bf16.mxu0 %v7057_v5  ;;  %v86_v9 = vld [vmem:[%s9934_s27] sm:$0xff]  ;;  %v88_v10 = vld [vmem:[%s9934_s27 + $0x10] sm:$0xff]  ;;  %v87_v11 = vld [vmem:[%s9934_s27 + $0x8] sm:$0xff] }
   0xc   :  { %7060 = vmatpush3.bf16.msra.mxu0 %v7057_v5  ;;  %100 = vperm.xlu0 %7601, %v86_v9   ;;  %v89_v13 = vld [vmem:[%s9934_s27 + $0x18] sm:$0xff]  ;;  %v90_v15 = vld [vmem:[%s9934_s27 + $0x20] sm:$0xff]  ;;  %v91_v17 = vld [vmem:[%s9934_s27 + $0x28] sm:$0xff] }
   0xd   :  { %7063 = vmatprep.subr.msk.bf16.mxu0 %vm7062_vm3, %v7061_v8  ;;  %110 = vperm.xlu1 %7602, %v88_v10   ;;  %v92_v19 = vld [vmem:[%s9934_s27 + $0x30] sm:$0xff]  ;;  %v75_v20 = vld [vmem:[%s9933_s24 + $0x28] sm:$0xff]  ;;  %v93_v21 = vld [vmem:[%s9934_s27 + $0x38] sm:$0xff] }
   0xe   :  { %v76_v22 = vld [vmem:[%s9933_s24 + $0x30] sm:$0xff]  ;;  %v94_v23 = vld [vmem:[%s9934_s27 + $0x40] sm:$0xff]  ;;  %v77_v24 = vld [vmem:[%s9933_s24 + $0x38] sm:$0xff] }
   0xf   :  { %v95_v25 = vld [vmem:[%s9934_s27 + $0x48] sm:$0xff]  ;;  %v78_v26 = vld [vmem:[%s9933_s24 + $0x40] sm:$0xff]  ;;  %v96_v27 = vld [vmem:[%s9934_s27 + $0x50] sm:$0xff] }
  0x10   :  { %7066 = vmatpush3.bf16.msk.msra.mxu0 %vm7062_vm3, %v7061_v8  ;;  %105 = vperm.xlu0 %7601, %v87_v11   ;;  %v79_v28 = vld [vmem:[%s9933_s24 + $0x48] sm:$0xff]  ;;  %v97_v29 = vld [vmem:[%s9934_s27 + $0x58] sm:$0xff]  ;;  %v80_v30 = vld [vmem:[%s9933_s24 + $0x50] sm:$0xff] }
  0x11   :  { %115 = vperm.xlu1 %7602, %v89_v13   ;;  %v659_v31 = vld [vmem:[%s9935_s6] sm:$0xff]  ;;  %v81_v32 = vld [vmem:[%s9933_s24 + $0x58] sm:$0xff]  ;;  %v660_v33 = vld [vmem:[%s9935_s6 + $0x8] sm:$0xff] }
  0x12   :  { %v661_v34 = vld [vmem:[%s9935_s6 + $0x10] sm:$0xff]  ;;  %v662_v35 = vld [vmem:[%s9935_s6 + $0x18] sm:$0xff]  ;;  %v663_v36 = vld [vmem:[%s9935_s6 + $0x20] sm:$0xff] }
  0x13   :  { %6214 = vmatmul.mubr.msk.f32.vlgmr.msra.gmra.mrb[0].mxu0 %vm158_vm1, %v71_v12  ;;  %v667_v37 = vld [vmem:[%s9935_s6 + $0x40] sm:$0xff]  ;;  %v664_v38 = vld [vmem:[%s9935_s6 + $0x28] sm:$0xff]  ;;  %v665_v40 = vld [vmem:[%s9935_s6 + $0x30] sm:$0xff] }
  0x14   :  { %6216 = vmatprep.mubr.msk.f32.mxu0 %vm158_vm1, %v72_v14  ;;  %120 = vperm.xlu0 %7601, %v90_v15   ;;  %v668_v39 = vld [vmem:[%s9935_s6 + $0x48] sm:$0xff]  ;;  %v669_v41 = vld [vmem:[%s9935_s6 + $0x50] sm:$0xff]  ;;  %v666_v42 = vld [vmem:[%s9935_s6 + $0x38] sm:$0xff] }
  0x15   :  { %125 = vperm.xlu1 %7602, %v91_v17   ;;  %v670_v43 = vld [vmem:[%s9935_s6 + $0x58] sm:$0xff]  ;;  %v4820_v44 = vld [vmem:[%s9936_s29] sm:$0xff]  ;;  %v4821_v45 = vld [vmem:[%s9936_s29 + $0x8] sm:$0xff] }
  0x16   :  { %v5201_v48 = vld [vmem:[#allocation2] sm:$0x1]  ;;  %v5413_v60 = vld [vmem:[%s9838_s7 + $0x90] sm:$0xff]  ;;  %v5414_v61 = vld [vmem:[%s9838_s7 + $0x98] sm:$0xff] }
  0x17   :  { %6217 = vmatmul.mubr.msk.f32.gmra.mrb[2].mxu0 %vm158_vm1, %v73_v16 }
  0x18   :  { %6219 = vmatprep.mubr.msk.f32.mxu0 %vm158_vm1, %v74_v18  ;;  %130 = vperm.xlu0 %7601, %v92_v19   ;;  %v9856_v19 = vmov 0.0  }
  0x19   :  { %135 = vperm.xlu1 %7602, %v93_v21  }
  0x1b   :  { %6220 = vmatmul.mubr.msk.f32.gmra.mrb[4].mxu0 %vm158_vm1, %v75_v20 }
  0x1c   :  { %6222 = vmatprep.mubr.msk.f32.mxu0 %vm158_vm1, %v76_v22  ;;  %140 = vperm.xlu0 %7601, %v94_v23  }
  0x1d   :  { %145 = vperm.xlu1 %7602, %v95_v25  }
  0x1f   :  { %6223 = vmatmul.mubr.msk.f32.gmra.mrb[6].mxu0 %vm158_vm1, %v77_v24 }
  0x20   :  { %6225 = vmatprep.mubr.msk.f32.mxu0 %vm158_vm1, %v78_v26  ;;  %150 = vperm.xlu0 %7601, %v96_v27  }
  0x21   :  { %155 = vperm.xlu1 %7602, %v97_v29  }
  0x23   :  { %6226 = vmatmul.mubr.msk.f32.gmra.mrb[8].mxu0 %vm158_vm1, %v79_v28 }
  0x24   :  { %6228 = vmatprep.mubr.msk.f32.mxu0 %vm158_vm1, %v80_v30  ;;  %704 = vperm.xlu0 %7601, %v659_v31   ;;  %v8185_v31 = vld [vmem:[%s9837_s5] sm:$0xff] }
  0x25   :  { %709 = vperm.xlu1 %7602, %v660_v33   ;;  %v8199_v33 = vld [vmem:[%s9837_s5 + $0x10] sm:$0xff] }
  0x27   :  { %6229 = vmatmul.mubr.msk.f32.gmra.mrb[10].mxu0 %vm158_vm1, %v81_v32  ;;  %v8194_v32 = vld [vmem:[%s9837_s5 + $0x8] sm:$0xff] }
  0x28   :  { %714 = vperm.xlu0 %7601, %v661_v34   ;;  %v8208_v34 = vld [vmem:[%s9837_s5 + $0x18] sm:$0xff] }
  0x29   :  { %719 = vperm.xlu1 %7602, %v662_v35   ;;  %v8213_v35 = vld [vmem:[%s9837_s5 + $0x20] sm:$0xff] }
  0x2c   :  { %724 = vperm.xlu0 %7601, %v663_v36   ;;  %v8222_v36 = vld [vmem:[%s9837_s5 + $0x28] sm:$0xff] }
  0x2d   :  { %744 = vperm.xlu1 %7602, %v667_v37   ;;  %v8227_v37 = vld [vmem:[%s9837_s5 + $0x30] sm:$0xff] }
  0x30   :  { %729 = vperm.xlu0 %7601, %v664_v38   ;;  %v8236_v38 = vld [vmem:[%s9837_s5 + $0x38] sm:$0xff] }
  0x31   :  { %749 = vperm.xlu1 %7602, %v668_v39   ;;  %v8241_v39 = vld [vmem:[%s9837_s5 + $0x40] sm:$0xff] }
  0x34   :  { %734 = vperm.xlu0 %7601, %v665_v40   ;;  %v8250_v40 = vld [vmem:[%s9837_s5 + $0x48] sm:$0xff] }
  0x35   :  { %754 = vperm.xlu1 %7602, %v669_v41   ;;  %v8255_v41 = vld [vmem:[%s9837_s5 + $0x50] sm:$0xff] }
  0x38   :  { %739 = vperm.xlu0 %7601, %v666_v42   ;;  %v8264_v42 = vld [vmem:[%s9837_s5 + $0x58] sm:$0xff] }
  0x39   :  { %759 = vperm.xlu1 %7602, %v670_v43   ;;  %v671_v43 = vld [vmem:[%s9838_s7] sm:$0xff] }
  0x3c   :  { %4833 = vperm.xlu0 %7601, %v4820_v44   ;;  %v672_v44 = vld [vmem:[%s9838_s7 + $0x8] sm:$0xff] }
  0x3d   :  { %4838 = vperm.xlu1 %7602, %v4821_v45   ;;  %v8274_v45 = vpack.c.bf16 %v672_v44, %v671_v43 }
  0x3f   :  { %9937 = vst [vmem:[#allocation3_spill] sm:$0xff] %v8274_v45  ;;  %7080 = vmatprep.subr.bf16.mxu0 %v8274_v45 }
  0x40   :  { %5022 = vperm.xlu0 %7601, %v5013_v46   ;;  %7082 = vmatpush3.bf16.msra.mxu0 %v8274_v45  ;;  %v673_v46 = vld [vmem:[%s9838_s7 + $0x10] sm:$0xff] }
  0x41   :  { %5027 = vperm.xlu1 %7602, %v5014_v47   ;;  %v674_v47 = vld [vmem:[%s9838_s7 + $0x18] sm:$0xff] }
  0x44   :  { %5209 = vperm.xlu0 %7601, %v5201_v48   ;;  %v8284_v48 = vpack.c.bf16 %v674_v47, %v673_v46  ;;  %v5407_v46 = vld [vmem:[%s9838_s7 + $0x60] sm:$0xff]  ;;  %v5408_v47 = vld [vmem:[%s9838_s7 + $0x68] sm:$0xff] }
  0x46   :  { %9938 = vst [vmem:[#allocation4_spill] sm:$0xff] %v8284_v48  ;;  %7084 = vmatprep.subr.bf16.mxu0 %v8284_v48 }
  0x47   :  { %7086 = vmatpush3.bf16.msra.mxu0 %v8284_v48 }
  0x48   :  { %7088 = vmatprep.subr.bf16.mxu0 %v8294_v51 }
  0x4b   :  { %7090 = vmatpush3.bf16.msra.mxu0 %v8294_v51 }
  0x8b   :  { %v101_v55 = vpop.permute.xlu0 %100 }
  0x8c   :  { %v111_v56 = vpop.permute.xlu1 %110 }
  0x8f   :  { %v106_v57 = vpop.permute.xlu0 %105 }
  0x90   :  { %v116_v58 = vpop.permute.xlu1 %115 }
  0x93   :  { %v121_v0 = vpop.permute.xlu0 %120 }
  0x94   :  { %v126_v3 = vpop.permute.xlu1 %125 }
  0x97   :  { %v131_v9 = vpop.permute.xlu0 %130 }
  0x98   :  { %v136_v11 = vpop.permute.xlu1 %135 }
  0x9b   :  { %v141_v17 = vpop.permute.xlu0 %140 }
  0x9c   :  { %v146_v20 = vpop.permute.xlu1 %145 }
  0x9f   :  { %v151_v26 = vpop.permute.xlu0 %150 }
  0xa0   :  { %v156_v28 = vpop.permute.xlu1 %155 }
  0xe6   :  { %v6215_v59 = vpop.f32.mrb[0].mxu0 }
  0xe7   :  { %v265_v62 = vpop.f32.mrb[1].mxu0  ;;  %v271_v1 = vadd.f32 %v6215_v59, %v106_v57  ;;  %v5404_v59 = vld [vmem:[%s9838_s7 + $0x48] sm:$0xff] }
  0xe8   :  { %v266_v63 = vadd.f32 %v265_v62, %v101_v55  ;;  %v5412_v55 = vld [vmem:[%s9838_s7 + $0x88] sm:$0xff] }
  0xea   :  { %v6218_v4 = vpop.f32.mrb[2].mxu0  ;;  %6235 = vmatprep.mubr.msk.f32.mxu1 %vm333_vm4, %v266_v63  ;;  %v8332_v63 = vpack.c.bf16 %v5414_v61, %v5413_v60 }
  0xeb   :  { %v275_v5 = vpop.f32.mrb[3].mxu0  ;;  %6236 = vmatmul.mubr.msk.f32.vlgmr.msra.gmra.mrb[0].mxu1 %vm333_vm4, %v271_v1  ;;  %v281_v7 = vadd.f32 %v6218_v4, %v116_v58  ;;  %v5403_v58 = vld [vmem:[%s9838_s7 + $0x40] sm:$0xff]  ;;  %v5416_v1 = vld [vmem:[%s9838_s7 + $0xa8] sm:$0xff]  ;;  %v5418_v4 = vld [vmem:[%s9838_s7 + $0xb8] sm:$0xff] }
  0xec   :  { %v276_v6 = vadd.f32 %v275_v5, %v111_v56  ;;  %7074 = vmatpush3.bf16.msra.mxu1 %v7071_v54  ;;  %v5411_v54 = vld [vmem:[%s9838_s7 + $0x80] sm:$0xff]  ;;  %v8310_v56 = vpack.c.bf16 %v678_v53, %v677_v52  ;;  %v8330_v62 = vpack.c.bf16 %v5404_v59, %v5403_v58  ;;  %v8416_v53 = vpack.c.bf16 %v5408_v47, %v5407_v46  ;;  %v5410_v58 = vld [vmem:[%s9838_s7 + $0x78] sm:$0xff] }
  0xed   :  { %7076 = vmatprep.subr.bf16.mxu1 %v7075_v2  ;;  %v8312_v57 = vpack.c.bf16 %v5412_v55, %v5411_v54  ;;  %v5409_v55 = vld [vmem:[%s9838_s7 + $0x70] sm:$0xff] }
  0xee   :  { %v6221_v8 = vpop.f32.mrb[4].mxu0  ;;  %6238 = vmatprep.mubr.msk.f32.mxu1 %vm333_vm4, %v276_v6  ;;  %9940 = vst [vmem:[#allocation6_spill] sm:$0xff] %v8310_v56  ;;  %7092 = vmatprep.subr.bf16.mxu0 %v8310_v56 }
  0xef   :  { %v285_v10 = vpop.f32.mrb[5].mxu0  ;;  %6239 = vmatmul.mubr.msk.f32.gmra.mrb[2].mxu1 %vm333_vm4, %v281_v7  ;;  %v291_v13 = vadd.f32 %v6221_v8, %v126_v3  ;;  %7094 = vmatpush3.bf16.msra.mxu0 %v8310_v56  ;;  %v5417_v3 = vld [vmem:[%s9838_s7 + $0xb0] sm:$0xff] }
  0xf0   :  { %v286_v12 = vadd.f32 %v285_v10, %v121_v0  ;;  %7096 = vmatprep.subr.bf16.mxu0 %v8330_v62  ;;  %v5415_v0 = vld [vmem:[%s9838_s7 + $0xa0] sm:$0xff]  ;;  %v8353_v5 = vpack.c.bf16 %v5418_v4, %v5417_v3 }
  0xf2   :  { %v6224_v14 = vpop.f32.mrb[6].mxu0  ;;  %6245 = vmatprep.mubr.msk.f32.mxu1 %vm333_vm4, %v286_v12 }
  0xf3   :  { %v295_v15 = vpop.f32.mrb[7].mxu0  ;;  %6246 = vmatmul.mubr.msk.f32.vlgmr.msra.gmra.mrb[4].mxu1 %vm333_vm4, %v291_v13  ;;  %v301_v18 = vadd.f32 %v6224_v14, %v136_v11  ;;  %v8374_v14 = vpop.permute.xlu0 %704 }
  0xf4   :  { %v296_v16 = vadd.f32 %v295_v15, %v131_v9  ;;  %7078 = vmatpush3.bf16.msra.mxu1 %v7075_v2  ;;  %v8343_v2 = vpack.c.bf16 %v5416_v1, %v5415_v0  ;;  %v8376_v15 = vpop.permute.xlu1 %709  ;;  %v8433_v1 = vpack.c.bf16 %v5410_v58, %v5409_v55 }
  0xf5   :  { %6261 = vmatprep.subr.mxu1 %v9856_v19 }
  0xf6   :  { %v6227_v21 = vpop.f32.mrb[8].mxu0  ;;  %6248 = vmatprep.mubr.msk.f32.mxu1 %vm333_vm4, %v296_v16 }
  0xf7   :  { %v305_v22 = vpop.f32.mrb[9].mxu0  ;;  %6249 = vmatmul.mubr.msk.f32.gmra.mrb[6].mxu1 %vm333_vm4, %v301_v18  ;;  %v311_v24 = vadd.f32 %v6227_v21, %v146_v20  ;;  %v8384_v20 = vpop.permute.xlu0 %714 }
  0xf8   :  { %v306_v23 = vadd.f32 %v305_v22, %v141_v17  ;;  %v8388_v22 = vpop.permute.xlu1 %719 }
  0xfa   :  { %v6230_v25 = vpop.f32.mrb[10].mxu0  ;;  %6255 = vmatprep.mubr.msk.f32.mxu1 %vm333_vm4, %v306_v23 }
  0xfb   :  { %v315_v27 = vpop.f32.mrb[11].mxu0  ;;  %6256 = vmatmul.mubr.msk.f32.vlgmr.msra.gmra.mrb[8].mxu1 %vm333_vm4, %v311_v24  ;;  %v321_v30 = vadd.f32 %v6230_v25, %v156_v28  ;;  %v5405_v24 = vld [vmem:[%s9838_s7 + $0x50] sm:$0xff]  ;;  %v5406_v25 = vld [vmem:[%s9838_s7 + $0x58] sm:$0xff]  ;;  %v8397_v28 = vpop.permute.xlu0 %724 }
  0xfc   :  { %v316_v29 = vadd.f32 %v315_v27, %v151_v26  ;;  %6262 = vmatpush3.msra.mxu1 %v9856_v19  ;;  %v8402_v43 = vpop.permute.xlu1 %744 }
  0xfd   :  { %7112 = vmatprep.subr.bf16.mxu1 %v8312_v57 }
  0xfe   :  { %6258 = vmatprep.mubr.msk.f32.mxu1 %vm333_vm4, %v316_v29 }
  0xff   :  { %6259 = vmatmul.mubr.msk.f32.gmra.mrb[10].mxu1 %vm333_vm4, %v321_v30  ;;  %v8400_v30 = vpack.c.bf16 %v5406_v25, %v5405_v24  ;;  %v8425_v59 = vpop.permute.xlu0 %729 }
 0x100   :  { %6263 = vmatprep.mubr.msk.f32.mxu1 %vm762_vm5, %v8185_v31  ;;  %v8428_v61 = vpop.permute.xlu1 %749 }
 0x101   :  { %9941 = vst [vmem:[#allocation7_spill] sm:$0xff] %v8428_v61 }
 0x103   :  { %6264 = vmatmul.mubr.msk.f32.vlgmr.msra.gmra.mrb[12].mxu1 %vm762_vm5, %v8194_v32 }
 0x104   :  { %6266 = vmatprep.mubr.msk.f32.mxu1 %vm762_vm5, %v8199_v33  ;;  %7114 = vmatpush3.bf16.msra.mxu1 %v8312_v57  ;;  %v8440_v24 = vpop.permute.xlu1 %754 }
 0x105   :  { %7116 = vmatprep.subr.bf16.mxu1 %v8332_v63  ;;  %9942 = vst [vmem:[#allocation8_spill] sm:$0xff] %v8440_v24 }
 0x107   :  { %6267 = vmatmul.mubr.msk.f32.gmra.mrb[14].mxu1 %vm762_vm5, %v8208_v34 }
 0x108   :  { %6269 = vmatprep.mubr.msk.f32.mxu1 %vm762_vm5, %v8213_v35  ;;  %7118 = vmatpush3.bf16.msra.mxu1 %v8332_v63 }
 0x109   :  { %7120 = vmatprep.subr.bf16.mxu1 %v8343_v2 }
 0x10b   :  { %6270 = vmatmul.mubr.msk.f32.gmra.mrb[16].mxu1 %vm762_vm5, %v8222_v36 }
 0x10c   :  { %6272 = vmatprep.mubr.msk.f32.mxu1 %vm762_vm5, %v8227_v37  ;;  %7122 = vmatpush3.bf16.msra.mxu1 %v8343_v2 }
 0x10d   :  { %7124 = vmatprep.subr.bf16.mxu1 %v8353_v5 }
 0x10f   :  { %6273 = vmatmul.mubr.msk.f32.gmra.mrb[18].mxu1 %vm762_vm5, %v8236_v38 }
 0x110   :  { %6275 = vmatprep.mubr.msk.f32.mxu1 %vm762_vm5, %v8241_v39  ;;  %7126 = vmatpush3.bf16.msra.mxu1 %v8353_v5 }
 0x111   :  { %7140 = vmatprep.subr.bf16.mxu1 %v8274_v45 }
 0x113   :  { %6276 = vmatmul.mubr.msk.f32.gmra.mrb[20].mxu1 %vm762_vm5, %v8250_v40 }
 0x114   :  { %6278 = vmatprep.mubr.msk.f32.mxu1 %vm762_vm5, %v8255_v41 }
 0x117   :  { %6279 = vmatmul.mubr.msk.f32.gmra.mrb[22].mxu1 %vm762_vm5, %v8264_v42 }
 0x1be   :  { %v8358_v6 = vpop.f32.mrb[0].mxu1 }
 0x1bf   :  { %v8360_v7 = vpop.f32.mrb[1].mxu1 }
 0x1c2   :  { %v8362_v8 = vpop.f32.mrb[2].mxu1 }
 0x1c3   :  { %v8364_v9 = vpop.f32.mrb[3].mxu1 }
 0x1c6   :  { %v8366_v10 = vpop.f32.mrb[4].mxu1 }
 0x1c7   :  { %v8368_v11 = vpop.f32.mrb[5].mxu1 }
 0x1ca   :  { %v8370_v12 = vpop.f32.mrb[6].mxu1 }
 0x1cb   :  { %v8372_v13 = vpop.f32.mrb[7].mxu1 }
 0x1ce   :  { %v8378_v16 = vpop.f32.mrb[8].mxu1 }
 0x1cf   :  { %v8380_v17 = vpop.f32.mrb[9].mxu1 }
 0x1d2   :  { %v8382_v18 = vpop.f32.mrb[10].mxu1 }
 0x1d3   :  { %v8386_v21 = vpop.f32.mrb[11].mxu1 }
 0x1d6   :  { %v6265_v23 = vpop.f32.mrb[12].mxu1 }
 0x1d7   :  { %v865_v26 = vpop.f32.mrb[13].mxu1  ;;  %v871_v29 = vadd.f32 %v6265_v23, %v8376_v15  ;;  %v8437_v23 = vpop.permute.xlu0 %734 }
 0x1d8   :  { %v866_v27 = vadd.f32 %v865_v26, %v8374_v14 }
 0x1da   :  { %v6268_v44 = vpop.f32.mrb[14].mxu1  ;;  %6297 = vmatprep.mubr.msk.f32.mxu0 %vm930_vm6, %v866_v27 }
 0x1db   :  { %v875_v49 = vpop.f32.mrb[15].mxu1  ;;  %6298 = vmatmul.mubr.msk.f32.vlgmr.msra.gmra.mrb[12].mxu0 %vm930_vm6, %v871_v29  ;;  %v881_v52 = vadd.f32 %v6268_v44, %v8388_v22 }
 0x1dc   :  { %v876_v50 = vadd.f32 %v875_v49, %v8384_v20  ;;  %7098 = vmatpush3.bf16.msra.mxu0 %v8330_v62 }
 0x1dd   :  { %7100 = vmatprep.subr.bf16.mxu0 %v8400_v30 }
 0x1de   :  { %v6271_v54 = vpop.f32.mrb[16].mxu1  ;;  %6300 = vmatprep.mubr.msk.f32.mxu0 %vm930_vm6, %v876_v50  ;;  %v8450_v50 = vpop.permute.xlu0 %739 }
 0x1df   :  { %v885_v60 = vpop.f32.mrb[17].mxu1  ;;  %6301 = vmatmul.mubr.msk.f32.gmra.mrb[14].mxu0 %vm930_vm6, %v881_v52  ;;  %v891_v29 = vadd.f32 %v6271_v54, %v8425_v59  ;;  %v8452_v52 = vpop.permute.xlu1 %759 }
 0x1e0   :  { %v886_v0 = vadd.f32 %v885_v60, %v8397_v28  ;;  %7102 = vmatpush3.bf16.msra.mxu0 %v8400_v30  ;;  %9943 = vst [vmem:[#allocation9_spill] sm:$0xff] %v8452_v52 }
 0x1e1   :  { %7104 = vmatprep.subr.bf16.mxu0 %v8416_v53 }
 0x1e2   :  { %v6274_v3 = vpop.f32.mrb[18].mxu1  ;;  %6319 = vmatprep.mubr.msk.f32.mxu0 %vm930_vm6, %v886_v0 }
 0x1e3   :  { %v895_v4 = vpop.f32.mrb[19].mxu1  ;;  %v901_v54 = vadd.f32 %v6274_v3, %v8450_v50 }
 0x1e4   :  { %7106 = vmatpush3.bf16.msra.mxu0 %v8416_v53  ;;  %v896_v46 = vadd.f32 %v895_v4, %v8437_v23 }
 0x1e5   :  { %7108 = vmatprep.subr.bf16.mxu0 %v8433_v1 }
 0x1e6   :  { %v6277_v25 = vpop.f32.mrb[20].mxu1 }
 0x1e7   :  { %v905_v26 = vpop.f32.mrb[21].mxu1  ;;  %v911_v44 = vadd.f32 %v6277_v25, %v8428_v61  ;;  %v5390_v25 = vld [vmem:[%s9839_s4 + $0x1] ss:$0 sm:$0xff] }
 0x1e8   :  { %v906_v27 = vadd.f32 %v905_v26, %v8402_v43  ;;  %7110 = vmatpush3.bf16.msra.mxu0 %v8433_v1  ;;  %v5398_v26 = vld [vmem:[%s9839_s4 + $0x2] ss:$0 sm:$0xff] }
 0x1ea   :  { %v6280_v47 = vpop.f32.mrb[22].mxu1  ;;  %6341 = vmatprep.mubr.msk.f32.mxu1 %vm930_vm6, %v906_v27  ;;  %v8488_v27 = vld [vmem:[%s9840_s8 + $0x1] ss:$0 sm:$0xff] }
 0x1eb   :  { %6320 = vmatmul.mubr.msk.f32.vlgmr.msra.gmra.mrb[16].mxu0 %vm930_vm6, %v891_v29  ;;  %v915_v49 = vpop.f32.mrb[23].mxu1  ;;  %6342 = vmatmul.mubr.msk.f32.vlgmr.msra.gmra.mrb[24].mxu1 %vm930_vm6, %v911_v44  ;;  %v921_v58 = vadd.f32 %v6280_v47, %v8452_v52  ;;  %v8493_v29 = vld [vmem:[%s9840_s8 + $0x2] ss:$0 sm:$0xff]  ;;  %v8496_v47 = vadd.f32 %v8366_v10, %v5390_v25  ;;  %v8512_v52 = vadd.f32 %v8370_v12, %v5390_v25 }
 0x1ec   :  { %v916_v55 = vadd.f32 %v915_v49, %v8440_v24  ;;  %6322 = vmatprep.mubr.msk.f32.mxu0 %vm930_vm6, %v896_v46  ;;  %7142 = vmatpush3.bf16.msra.mxu1 %v8274_v45  ;;  %v8499_v49 = vadd.f32 %v8378_v16, %v5398_v26  ;;  %v8515_v16 = vadd.f32 %v5390_v25, %v8372_v13 }
 0x1ed   :  { %7144 = vmatprep.subr.bf16.mxu1 %v8284_v48  ;;  %9944 = vst [vmem:[#allocation10_spill] sm:$0xff] %v8496_v47  ;;  %9948 = vst [vmem:[#allocation14_spill] sm:$0xff] %v8512_v52 }
 0x1ee   :  { %6344 = vmatprep.mubr.msk.f32.mxu1 %vm930_vm6, %v916_v55  ;;  %9945 = vst [vmem:[#allocation11_spill] sm:$0xff] %v8499_v49  ;;  %9949 = vst [vmem:[#allocation15_spill] sm:$0xff] %v8515_v16 }
 0x1ef   :  { %6323 = vmatmul.mubr.msk.f32.gmra.mrb[18].mxu0 %vm930_vm6, %v901_v54  ;;  %6345 = vmatmul.mubr.msk.f32.gmra.mrb[26].mxu1 %vm930_vm6, %v921_v58 }
 0x1f0   :  { %6355 = vmatprep.mubr.msk.f32.mxu0 %vm762_vm5, %v8185_v31  ;;  %7146 = vmatpush3.bf16.msra.mxu1 %v8284_v48 }
 0x1f1   :  { %7148 = vmatprep.subr.bf16.mxu1 %v8294_v51 }
 0x1f4   :  { %7150 = vmatpush3.bf16.msra.mxu1 %v8294_v51  ;;  %v8507_v51 = vadd.f32 %v5398_v26, %v8380_v17  ;;  %v8523_v17 = vadd.f32 %v5398_v26, %v8386_v21 }
 0x1f5   :  { %7152 = vmatprep.subr.bf16.mxu1 %v8310_v56 }
 0x1f6   :  { %9947 = vst [vmem:[#allocation13_spill] sm:$0xff] %v8507_v51  ;;  %9950 = vst [vmem:[#allocation16_spill] sm:$0xff] %v8523_v17 }
 0x1f8   :  { %7154 = vmatpush3.bf16.msra.mxu1 %v8310_v56  ;;  %v8504_v56 = vadd.f32 %v5390_v25, %v8368_v11  ;;  %v8520_v11 = vadd.f32 %v8382_v18, %v5398_v26 }
 0x1f9   :  { %7172 = vmatprep.subr.bf16.mxu1 %v8312_v57 }
 0x1fa   :  { %9946 = vst [vmem:[#allocation12_spill] sm:$0xff] %v8504_v56 }
 0x2ae   :  { %v8471_v60 = vpop.f32.mrb[12].mxu0 }
 0x2af   :  { %v8473_v0 = vpop.f32.mrb[13].mxu0 }
 0x2b2   :  { %v8475_v3 = vpop.f32.mrb[14].mxu0 }
 0x2b3   :  { %v8477_v4 = vpop.f32.mrb[15].mxu0 }
 0x2be   :  { %v6321_v44 = vpop.f32.mrb[16].mxu0  ;;  %v6343_v46 = vpop.f32.mrb[24].mxu1 }
 0x2bf   :  { %v1118_v55 = vadd.f32 %v6321_v44, %v8488_v27  ;;  %v1112_v54 = vpop.f32.mrb[17].mxu0  ;;  %v1221_v58 = vadd.f32 %v6343_v46, %v8493_v29  ;;  %v1215_v19 = vpop.f32.mrb[25].mxu1 }
 0x2c0   :  { %v1113_v48 = vadd.f32 %v8488_v27, %v1112_v54  ;;  %v1216_v10 = vadd.f32 %v8493_v29, %v1215_v19 }
 0x2c1   :  { %v1243_v44 = vadd.f32 %v1118_v55, %v8496_v47  ;;  %v1271_v46 = vadd.f32 %v1221_v58, %v8499_v49 }
 0x2c2   :  { %v1242_v54 = vadd.f32 %v1113_v48, %v8504_v56  ;;  %v1270_v19 = vadd.f32 %v1216_v10, %v8507_v51  ;;  %v6324_v24 = vpop.f32.mrb[18].mxu0  ;;  %v6346_v12 = vpop.f32.mrb[26].mxu1 }
 0x2c3   :  { %v5449_v45 = vmul.f32 -1.442695, %v1243_v44  ;;  %v5453_v61 = vmul.f32 -1.442695, %v1271_v46  ;;  %v1128_v13 = vadd.f32 %v6324_v24, %v8488_v27  ;;  %v1122_v25 = vpop.f32.mrb[19].mxu0  ;;  %v1231_v55 = vadd.f32 %v6346_v12, %v8493_v29  ;;  %v1225_v58 = vpop.f32.mrb[27].mxu1 }
 0x2c4   :  { %v5448_v49 = vmul.f32 -1.442695, %v1242_v54  ;;  %v5452_v18 = vmul.f32 -1.442695, %v1270_v19  ;;  %v1123_v47 = vadd.f32 %v8488_v27, %v1122_v25  ;;  %v1226_v21 = vadd.f32 %v8493_v29, %v1225_v58 }
 0x2c5   :  { %7603 = vpow2.f32 %v5449_v45  ;;  %v1245_v48 = vadd.f32 %v1128_v13, %v8512_v52  ;;  %v1273_v26 = vadd.f32 %v1231_v55, %v8520_v11 }
 0x2c6   :  { %7605 = vpow2.f32 %v5448_v49  ;;  %v1244_v10 = vadd.f32 %v1123_v47, %v8515_v16  ;;  %v1272_v24 = vadd.f32 %v1226_v21, %v8523_v17 }
 0x2c7   :  { %7607 = vpow2.f32 %v5453_v61  ;;  %v5451_v44 = vmul.f32 -1.442695, %v1245_v48  ;;  %v5455_v46 = vmul.f32 -1.442695, %v1273_v26 }
 0x2c8   :  { %7609 = vpow2.f32 %v5452_v18  ;;  %v5450_v54 = vmul.f32 -1.442695, %v1244_v10  ;;  %v5454_v19 = vmul.f32 -1.442695, %v1272_v24  ;;  %v8538_v24 = vld [vmem:[%s9840_s8] ss:$0 sm:$0xff] }
 0x2c9   :  { %7611 = vpow2.f32 %v5451_v44  ;;  %9951 = vst [vmem:[#allocation17_spill] sm:$0xff] %v8538_v24 }
 0x2ca   :  { %7613 = vpow2.f32 %v5450_v54  ;;  %v5382_v54 = vld [vmem:[%s9839_s4] ss:$0 sm:$0xff] }
 0x2cb   :  { %7615 = vpow2.f32 %v5455_v46 }
 0x2cc   :  { %7617 = vpow2.f32 %v5454_v19  ;;  %v1015_v19 = vadd.f32 %v8471_v60, %v8538_v24 }
 0x2cf   :  { %v7604_v45 = vpop.eup %7603 }
 0x2d0   :  { %v7606_v12 = vpop.eup %7605  ;;  %v1259_v13 = vadd.f32 1.0, %v7604_v45  ;;  %v1010_v45 = vadd.f32 %v8538_v24, %v8473_v0  ;;  %v1020_v0 = vadd.f32 %v8538_v24, %v8477_v4 }
 0x2d1   :  { %v7608_v25 = vpop.eup %7607  ;;  %v1258_v55 = vadd.f32 1.0, %v7606_v12  ;;  %v8548_v12 = vadd.f32 %v8358_v6, %v5382_v54 }
 0x2d2   :  { %v7610_v49 = vpop.eup %7609  ;;  %7619 = vrcp.f32 %v1259_v13  ;;  %v1287_v47 = vadd.f32 1.0, %v7608_v25  ;;  %v8551_v25 = vadd.f32 %v5382_v54, %v8360_v7 }
 0x2d3   :  { %v7612_v58 = vpop.eup %7611  ;;  %7621 = vrcp.f32 %v1258_v55  ;;  %v1286_v61 = vadd.f32 1.0, %v7610_v49  ;;  %9952 = vst [vmem:[#allocation18_spill] sm:$0xff] %v8548_v12  ;;  %v1235_v49 = vsub.f32 %v8548_v12, %v1015_v19 }
 0x2d4   :  { %v7614_v21 = vpop.eup %7613  ;;  %7623 = vrcp.f32 %v1287_v47  ;;  %v1261_v18 = vadd.f32 1.0, %v7612_v58  ;;  %9953 = vst [vmem:[#allocation19_spill] sm:$0xff] %v8551_v25  ;;  %v1025_v47 = vadd.f32 %v8475_v3, %v8538_v24  ;;  %v1234_v60 = vsub.f32 %v8551_v25, %v1010_v45 }
 0x2d5   :  { %v7616_v48 = vpop.eup %7615  ;;  %7625 = vrcp.f32 %v1286_v61  ;;  %v1260_v26 = vadd.f32 1.0, %v7614_v21 }
 0x2d6   :  { %v7618_v10 = vpop.eup %7617  ;;  %7627 = vrcp.f32 %v1261_v18  ;;  %v1289_v44 = vadd.f32 1.0, %v7616_v48  ;;  %v8560_v18 = vadd.f32 %v8362_v8, %v5382_v54 }
 0x2d7   :  { %7629 = vrcp.f32 %v1260_v26  ;;  %v1288_v46 = vadd.f32 1.0, %v7618_v10  ;;  %v8563_v26 = vadd.f32 %v5382_v54, %v8364_v9 }
 0x2d8   :  { %7631 = vrcp.f32 %v1289_v44  ;;  %9954 = vst [vmem:[#allocation20_spill] sm:$0xff] %v8560_v18  ;;  %v1237_v3 = vsub.f32 %v8560_v18, %v1025_v47 }
 0x2d9   :  { %7633 = vrcp.f32 %v1288_v46  ;;  %9955 = vst [vmem:[#allocation21_spill] sm:$0xff] %v8563_v26  ;;  %v1236_v4 = vsub.f32 %v8563_v26, %v1020_v0 }
 0x2dc   :  { %v7620_v13 = vpop.eup %7619 }
 0x2dd   :  { %v7622_v55 = vpop.eup %7621  ;;  %v1299_v58 = vmul.f32 0.0, %v7620_v13 }
 0x2de   :  { %v7624_v61 = vpop.eup %7623  ;;  %v1298_v21 = vmul.f32 0.0, %v7622_v55 }
 0x2df   :  { %v7626_v6 = vpop.eup %7625  ;;  %v1303_v7 = vmul.f32 %v7624_v61, %v1235_v49 }
 0x2e0   :  { %v7628_v48 = vpop.eup %7627  ;;  %v1302_v10 = vmul.f32 %v7626_v6, %v1234_v60 }
 0x2e1   :  { %v7630_v44 = vpop.eup %7629  ;;  %v1301_v46 = vmul.f32 0.0, %v7628_v48  ;;  %v8566_v19 = vadd.f32 %v1303_v7, %v1299_v58 }
 0x2e2   :  { %v7632_v45 = vpop.eup %7631  ;;  %v1300_v13 = vmul.f32 0.0, %v7630_v44  ;;  %v8569_v55 = vadd.f32 %v1302_v10, %v1298_v21 }
 0x2e3   :  { %v7634_v8 = vpop.eup %7633  ;;  %vm1311_vm7 = vcmp.gt.f32.partialorder %v8566_v19, 0.01  ;;  %v1305_v49 = vmul.f32 %v7632_v45, %v1237_v3 }
 0x2e4   :  { %vm1310_vm8 = vcmp.gt.f32.partialorder %v8569_v55, 0.01  ;;  %v7127_v9 = vpack.c.bf16 %v8566_v19, %v8569_v55  ;;  %v1304_v54 = vmul.f32 %v7634_v8, %v1236_v4 }
 0x2e5   :  { %vm7128_vm9 = vmpackc.low %vm1311_vm7, %vm1310_vm8  ;;  %v8579_v47 = vadd.f32 %v1305_v49, %v1301_v46 }
 0x2e6   :  { %7129 = vmatprep.subr.msk.bf16.mxu0 %vm7128_vm9, %v7127_v9  ;;  %v8581_v58 = vadd.f32 %v1304_v54, %v1300_v13 }
 0x2e7   :  { %7132 = vmatpush3.bf16.msk.msra.mxu0 %vm7128_vm9, %v7127_v9  ;;  %vm1313_vm10 = vcmp.gt.f32.partialorder %v8579_v47, 0.01 }
 0x2e8   :  { %vm1312_vm11 = vcmp.gt.f32.partialorder %v8581_v58, 0.01  ;;  %v7133_v61 = vpack.c.bf16 %v8579_v47, %v8581_v58 }
 0x2e9   :  { %vm7134_vm12 = vmpackc.low %vm1313_vm10, %vm1312_vm11 }
 0x2ea   :  { %7135 = vmatprep.subr.msk.bf16.mxu0 %vm7134_vm12, %v7133_v61 }
 0x2eb   :  { %7138 = vmatpush3.bf16.msk.msra.mxu0 %vm7134_vm12, %v7133_v61 }
 0x2ec   :  { %7156 = vmatprep.subr.bf16.mxu0 %v8330_v62 }
 0x2ee   :  { %6356 = vmatmul.mubr.msk.f32.vlgmr.msra.gmra.mrb[20].mxu0 %vm762_vm5, %v8194_v32 }
 0x2ef   :  { %6358 = vmatprep.mubr.msk.f32.mxu0 %vm762_vm5, %v8199_v33  ;;  %7158 = vmatpush3.bf16.msra.mxu0 %v8330_v62 }
 0x2f0   :  { %7160 = vmatprep.subr.bf16.mxu0 %v8400_v30 }
 0x2f2   :  { %6359 = vmatmul.mubr.msk.f32.gmra.mrb[22].mxu0 %vm762_vm5, %v8208_v34 }
 0x2f3   :  { %6361 = vmatprep.mubr.msk.f32.mxu0 %vm762_vm5, %v8213_v35  ;;  %7162 = vmatpush3.bf16.msra.mxu0 %v8400_v30 }
 0x2f4   :  { %7164 = vmatprep.subr.bf16.mxu0 %v8416_v53 }
 0x2f6   :  { %6362 = vmatmul.mubr.msk.f32.gmra.mrb[24].mxu0 %vm762_vm5, %v8222_v36 }
 0x2f7   :  { %6364 = vmatprep.mubr.msk.f32.mxu0 %vm762_vm5, %v8227_v37  ;;  %7166 = vmatpush3.bf16.msra.mxu0 %v8416_v53 }
 0x2f8   :  { %7168 = vmatprep.subr.bf16.mxu0 %v8433_v1 }
 0x2fa   :  { %6365 = vmatmul.mubr.msk.f32.gmra.mrb[26].mxu0 %vm762_vm5, %v8236_v38 }
 0x2fb   :  { %6367 = vmatprep.mubr.msk.f32.mxu0 %vm762_vm5, %v8241_v39  ;;  %7170 = vmatpush3.bf16.msra.mxu0 %v8433_v1 }
 0x2fe   :  { %6368 = vmatmul.mubr.msk.f32.gmra.mrb[28].mxu0 %vm762_vm5, %v8250_v40 }
 0x2ff   :  { %6370 = vmatprep.mubr.msk.f32.mxu0 %vm762_vm5, %v8255_v41 }
 0x302   :  { %6371 = vmatmul.mubr.msk.f32.gmra.mrb[30].mxu0 %vm762_vm5, %v8264_v42 }
 0x3c1   :  { %v6357_v60 = vpop.f32.mrb[20].mxu0 }
 0x3c2   :  { %v1384_v0 = vpop.f32.mrb[21].mxu0  ;;  %v1390_v6 = vadd.f32 %v6357_v60, %v8376_v15 }
 0x3c3   :  { %v1385_v21 = vadd.f32 %v1384_v0, %v8374_v14  ;;  %v9956_v0 = vld [vmem:[#allocation7_spill] sm:$0xff] }
 0x3c5   :  { %v6360_v7 = vpop.f32.mrb[22].mxu0  ;;  %6389 = vmatprep.mubr.msk.f32.mxu1 %vm930_vm6, %v1385_v21 }
 0x3c6   :  { %v1394_v48 = vpop.f32.mrb[23].mxu0  ;;  %6390 = vmatmul.mubr.msk.f32.vlgmr.msra.gmra.mrb[28].mxu1 %vm930_vm6, %v1390_v6  ;;  %v1400_v44 = vadd.f32 %v6360_v7, %v8388_v22  ;;  %v9957_v6 = vld [vmem:[#allocation3_spill] sm:$0xff] }
 0x3c7   :  { %v1395_v10 = vadd.f32 %v1394_v48, %v8384_v20  ;;  %7174 = vmatpush3.bf16.msra.mxu1 %v8312_v57 }
 0x3c8   :  { %7176 = vmatprep.subr.bf16.mxu1 %v8332_v63 }
 0x3c9   :  { %v6363_v3 = vpop.f32.mrb[24].mxu0  ;;  %6392 = vmatprep.mubr.msk.f32.mxu1 %vm930_vm6, %v1395_v10  ;;  %v9958_v10 = vld [vmem:[#allocation8_spill] sm:$0xff] }
 0x3ca   :  { %v1404_v46 = vpop.f32.mrb[25].mxu0  ;;  %6393 = vmatmul.mubr.msk.f32.gmra.mrb[30].mxu1 %vm930_vm6, %v1400_v44  ;;  %v1410_v4 = vadd.f32 %v6363_v3, %v8425_v59  ;;  %v9959_v3 = vld [vmem:[#allocation9_spill] sm:$0xff] }
 0x3cb   :  { %v1405_v45 = vadd.f32 %v1404_v46, %v8397_v28  ;;  %7178 = vmatpush3.bf16.msra.mxu1 %v8332_v63 }
 0x3cc   :  { %7180 = vmatprep.subr.bf16.mxu1 %v8343_v2 }
 0x3cd   :  { %v6366_v13 = vpop.f32.mrb[26].mxu0  ;;  %6411 = vmatprep.mubr.msk.f32.mxu0 %vm930_vm6, %v1405_v45  ;;  %v9960_v45 = vld [vmem:[#allocation4_spill] sm:$0xff] }
 0x3ce   :  { %v1414_v8 = vpop.f32.mrb[27].mxu0  ;;  %6412 = vmatmul.mubr.msk.f32.vlgmr.msra.gmra.mrb[32].mxu0 %vm930_vm6, %v1410_v4  ;;  %v1420_v9 = vadd.f32 %v6366_v13, %v8450_v50  ;;  %v9962_v4 = vld [vmem:[#allocation6_spill] sm:$0xff] }
 0x3cf   :  { %v1415_v49 = vadd.f32 %v1414_v8, %v8437_v23  ;;  %7182 = vmatpush3.bf16.msra.mxu1 %v8343_v2 }
 0x3d0   :  { %7184 = vmatprep.subr.bf16.mxu1 %v8353_v5 }
 0x3d1   :  { %v6369_v54 = vpop.f32.mrb[28].mxu0  ;;  %6414 = vmatprep.mubr.msk.f32.mxu0 %vm930_vm6, %v1415_v49 }
 0x3d2   :  { %v1424_v61 = vpop.f32.mrb[29].mxu0  ;;  %6415 = vmatmul.mubr.msk.f32.gmra.mrb[34].mxu0 %vm930_vm6, %v1420_v9  ;;  %v1430_v21 = vadd.f32 %v6369_v54, %v9956_v0 }
 0x3d3   :  { %v1425_v60 = vadd.f32 %v1424_v61, %v8402_v43  ;;  %7186 = vmatpush3.bf16.msra.mxu1 %v8353_v5  ;;  %6447 = vmatprep.mubr.msk.f32.mxu0 %vm762_vm5, %v8185_v31  ;;  %v9961_v31 = vld [vmem:[#allocation5_spill] sm:$0xff]  ;;  %v1315_v61 = vsel %vm1311_vm7, %v8566_v19, 0.0 }
 0x3d4   :  { %7200 = vmatprep.subr.bf16.mxu1 %v9957_v6 }
 0x3d5   :  { %v6372_v7 = vpop.f32.mrb[30].mxu0  ;;  %6433 = vmatprep.mubr.msk.f32.mxu1 %vm930_vm6, %v1425_v60 }
 0x3d6   :  { %v1434_v48 = vpop.f32.mrb[31].mxu0  ;;  %6434 = vmatmul.mubr.msk.f32.vlgmr.msra.gmra.mrb[32].mxu1 %vm930_vm6, %v1430_v21  ;;  %v1440_v46 = vadd.f32 %v6372_v7, %v9959_v3 }
 0x3d7   :  { %v1435_v44 = vadd.f32 %v1434_v48, %v9958_v10  ;;  %7202 = vmatpush3.bf16.msra.mxu1 %v9957_v6  ;;  %v1314_v48 = vsel %vm1310_vm8, %v8569_v55, 0.0 }
 0x3d8   :  { %7204 = vmatprep.subr.bf16.mxu1 %v9960_v45 }
 0x3d9   :  { %6436 = vmatprep.mubr.msk.f32.mxu1 %vm930_vm6, %v1435_v44 }
 0x3da   :  { %6437 = vmatmul.mubr.msk.f32.gmra.mrb[34].mxu1 %vm930_vm6, %v1440_v46 }
 0x3db   :  { %7206 = vmatpush3.bf16.msra.mxu1 %v9960_v45 }
 0x3dc   :  { %7208 = vmatprep.subr.bf16.mxu1 %v9961_v31 }
 0x3df   :  { %7210 = vmatpush3.bf16.msra.mxu1 %v9961_v31 }
 0x3e0   :  { %7212 = vmatprep.subr.bf16.mxu1 %v9962_v4 }
 0x3e3   :  { %7214 = vmatpush3.bf16.msra.mxu1 %v9962_v4 }
 0x3e4   :  { %7232 = vmatprep.subr.bf16.mxu1 %v8312_v57 }
 0x499   :  { %v6391_v13 = vpop.f32.mrb[28].mxu1 }
 0x49a   :  { %v1527_v8 = vadd.f32 %v6391_v13, %v8538_v24  ;;  %v1521_v49 = vpop.f32.mrb[29].mxu1 }
 0x49b   :  { %v1522_v9 = vadd.f32 %v8538_v24, %v1521_v49 }
 0x49c   :  { %v1735_v54 = vsub.f32 %v8548_v12, %v1527_v8 }
 0x49d   :  { %v1734_v60 = vsub.f32 %v8551_v25, %v1522_v9  ;;  %v6394_v21 = vpop.f32.mrb[30].mxu1  ;;  %v1317_v9 = vsel %vm1313_vm10, %v8579_v47, 0.0 }
 0x49e   :  { %v8670_v7 = vadd.f32 %v1735_v54, %v1315_v61  ;;  %v1537_v44 = vadd.f32 %v6394_v21, %v8538_v24  ;;  %v1531_v46 = vpop.f32.mrb[31].mxu1  ;;  %v1316_v21 = vsel %vm1312_vm11, %v8581_v58, 0.0 }
 0x49f   :  { %v8676_v13 = vadd.f32 %v1734_v60, %v1314_v48  ;;  %v1532_v8 = vadd.f32 %v8538_v24, %v1531_v46  ;;  %v9963_v46 = vld [vmem:[#allocation10_spill] sm:$0xff] }
 0x4a0   :  { %v1737_v49 = vsub.f32 %v8560_v18, %v1537_v44 }
 0x4a1   :  { %v1736_v54 = vsub.f32 %v8563_v26, %v1532_v8  ;;  %v6413_v61 = vpop.f32.mrb[32].mxu0 }
 0x4a2   :  { %v8684_v25 = vadd.f32 %v1737_v49, %v1317_v9  ;;  %v1624_v60 = vadd.f32 %v6413_v61, %v8488_v27  ;;  %v1618_v48 = vpop.f32.mrb[33].mxu0 }
 0x4a3   :  { %v8690_v12 = vadd.f32 %v1736_v54, %v1316_v21  ;;  %v1619_v44 = vadd.f32 %v8488_v27, %v1618_v48 }
 0x4a4   :  { %v1743_v18 = vadd.f32 %v1624_v60, %v9963_v46 }
 0x4a5   :  { %v1742_v24 = vadd.f32 %v1619_v44, %v8504_v56  ;;  %v6416_v4 = vpop.f32.mrb[34].mxu0  ;;  %v9964_v56 = vld [vmem:[#allocation11_spill] sm:$0xff] }
 0x4a6   :  { %v5485_v8 = vmul.f32 -1.442695, %v1743_v18  ;;  %v1634_v49 = vadd.f32 %v6416_v4, %v8488_v27  ;;  %v1628_v9 = vpop.f32.mrb[35].mxu0 }
 0x4a7   :  { %v5484_v26 = vmul.f32 -1.442695, %v1742_v24  ;;  %v1629_v31 = vadd.f32 %v8488_v27, %v1628_v9 }
 0x4a8   :  { %v1745_v45 = vadd.f32 %v1634_v49, %v8512_v52  ;;  %7635 = vpow2.f32 %v5485_v8 }
 0x4a9   :  { %v1744_v61 = vadd.f32 %v1629_v31, %v8515_v16  ;;  %v6435_v54 = vpop.f32.mrb[32].mxu1  ;;  %7637 = vpow2.f32 %v5484_v26 }
 0x4aa   :  { %v5487_v21 = vmul.f32 -1.442695, %v1745_v45  ;;  %v1721_v48 = vadd.f32 %v6435_v54, %v8493_v29  ;;  %v1715_v60 = vpop.f32.mrb[33].mxu1 }
 0x4ab   :  { %v5486_v44 = vmul.f32 -1.442695, %v1744_v61  ;;  %v1716_v18 = vadd.f32 %v8493_v29, %v1715_v60 }
 0x4ac   :  { %v1771_v4 = vadd.f32 %v1721_v48, %v9964_v56  ;;  %7639 = vpow2.f32 %v5487_v21 }
 0x4ad   :  { %v1770_v24 = vadd.f32 %v1716_v18, %v8507_v51  ;;  %v6438_v46 = vpop.f32.mrb[34].mxu1  ;;  %7641 = vpow2.f32 %v5486_v44 }
 0x4ae   :  { %v5489_v9 = vmul.f32 -1.442695, %v1771_v4  ;;  %v1731_v49 = vadd.f32 %v6438_v46, %v8493_v29  ;;  %v1725_v31 = vpop.f32.mrb[35].mxu1 }
 0x4af   :  { %v5488_v8 = vmul.f32 -1.442695, %v1770_v24  ;;  %v1726_v45 = vadd.f32 %v8493_v29, %v1725_v31 }
 0x4b0   :  { %7643 = vpow2.f32 %v5489_v9  ;;  %v1773_v26 = vadd.f32 %v1731_v49, %v8520_v11 }
 0x4b1   :  { %7645 = vpow2.f32 %v5488_v8  ;;  %v1772_v61 = vadd.f32 %v1726_v45, %v8523_v17 }
 0x4b2   :  { %v5491_v54 = vmul.f32 -1.442695, %v1773_v26  ;;  %v7636_v60 = vpop.eup %7635 }
 0x4b3   :  { %v5490_v48 = vmul.f32 -1.442695, %v1772_v61  ;;  %v7638_v18 = vpop.eup %7637  ;;  %v1759_v21 = vadd.f32 1.0, %v7636_v60 }
 0x4b4   :  { %7647 = vpow2.f32 %v5491_v54  ;;  %v1758_v46 = vadd.f32 1.0, %v7638_v18 }
 0x4b5   :  { %7649 = vpow2.f32 %v5490_v48 }
 0x4b6   :  { %v7640_v4 = vpop.eup %7639  ;;  %7651 = vrcp.f32 %v1759_v21 }
 0x4b7   :  { %v7642_v51 = vpop.eup %7641  ;;  %v1761_v31 = vadd.f32 1.0, %v7640_v4  ;;  %7653 = vrcp.f32 %v1758_v46 }
 0x4b8   :  { %v1760_v45 = vadd.f32 1.0, %v7642_v51 }
 0x4ba   :  { %v7644_v44 = vpop.eup %7643 }
 0x4bb   :  { %v7646_v24 = vpop.eup %7645  ;;  %v1787_v9 = vadd.f32 1.0, %v7644_v44 }
 0x4bc   :  { %v1786_v49 = vadd.f32 1.0, %v7646_v24 }
 0x4bd   :  { %7655 = vrcp.f32 %v1787_v9 }
 0x4be   :  { %v7648_v8 = vpop.eup %7647  ;;  %7657 = vrcp.f32 %v1786_v49 }
 0x4bf   :  { %7659 = vrcp.f32 %v1761_v31  ;;  %v1789_v26 = vadd.f32 1.0, %v7648_v8  ;;  %v7650_v61 = vpop.eup %7649 }
 0x4c0   :  { %v1788_v54 = vadd.f32 1.0, %v7650_v61  ;;  %v7652_v48 = vpop.eup %7651 }
 0x4c1   :  { %7661 = vrcp.f32 %v1789_v26  ;;  %v7654_v60 = vpop.eup %7653  ;;  %v1799_v21 = vmul.f32 %v7652_v48, %v8566_v19 }
 0x4c2   :  { %7663 = vrcp.f32 %v1760_v45  ;;  %v1798_v44 = vmul.f32 %v7654_v60, %v8569_v55 }
 0x4c3   :  { %7665 = vrcp.f32 %v1788_v54 }
 0x4c7   :  { %v7656_v18 = vpop.eup %7655 }
 0x4c8   :  { %v7658_v17 = vpop.eup %7657  ;;  %v1803_v4 = vmul.f32 %v7656_v18, %v8670_v7 }
 0x4c9   :  { %v7660_v46 = vpop.eup %7659  ;;  %v1802_v51 = vmul.f32 %v7658_v17, %v8676_v13 }
 0x4ca   :  { %v8711_v24 = vadd.f32 %v1803_v4, %v1799_v21  ;;  %v1801_v8 = vmul.f32 %v7660_v46, %v8579_v47  ;;  %v8796_v21 = vld [vmem:[%s9837_s5] sm:$0xff] }
 0x4cb   :  { %v7662_v31 = vpop.eup %7661  ;;  %v8713_v9 = vadd.f32 %v1802_v51, %v1798_v44 }
 0x4cc   :  { %v7664_v49 = vpop.eup %7663  ;;  %vm1811_vm13 = vcmp.gt.f32.partialorder %v8711_v24, 0.01  ;;  %v1805_v45 = vmul.f32 %v7662_v31, %v8684_v25 }
 0x4cd   :  { %vm1810_vm14 = vcmp.gt.f32.partialorder %v8713_v9, 0.01  ;;  %v7187_v19 = vpack.c.bf16 %v8711_v24, %v8713_v9  ;;  %v7666_v55 = vpop.eup %7665  ;;  %v1800_v7 = vmul.f32 %v7664_v49, %v8581_v58  ;;  %v9965_v49 = vld [vmem:[#allocation4_spill] sm:$0xff] }
 0x4ce   :  { %vm7188_vm15 = vmpackc.low %vm1811_vm13, %vm1810_vm14  ;;  %v8725_v17 = vadd.f32 %v1805_v45, %v1801_v8  ;;  %v1804_v47 = vmul.f32 %v7666_v55, %v8690_v12  ;;  %v9966_v8 = vld [vmem:[#allocation5_spill] sm:$0xff]  ;;  %v9967_v45 = vld [vmem:[#allocation6_spill] sm:$0xff] }
 0x4cf   :  { %7189 = vmatprep.subr.msk.bf16.mxu0 %vm7188_vm15, %v7187_v19  ;;  %v9968_v55 = vld [vmem:[#allocation17_spill] sm:$0xff] }
 0x4d0   :  { %7192 = vmatpush3.bf16.msk.msra.mxu0 %vm7188_vm15, %v7187_v19  ;;  %v8729_v25 = vadd.f32 %v1804_v47, %v1800_v7  ;;  %vm1813_vm0 = vcmp.gt.f32.partialorder %v8725_v17, 0.01 }
 0x4d2   :  { %vm1812_vm1 = vcmp.gt.f32.partialorder %v8729_v25, 0.01  ;;  %v7193_v13 = vpack.c.bf16 %v8725_v17, %v8729_v25 }
 0x4d3   :  { %vm7194_vm2 = vmpackc.low %vm1813_vm0, %vm1812_vm1 }
 0x4d4   :  { %7195 = vmatprep.subr.msk.bf16.mxu0 %vm7194_vm2, %v7193_v13 }
 0x4d5   :  { %7198 = vmatpush3.bf16.msk.msra.mxu0 %vm7194_vm2, %v7193_v13 }
 0x4d6   :  { %7216 = vmatprep.subr.bf16.mxu0 %v8330_v62 }
 0x4d8   :  { %6448 = vmatmul.mubr.msk.f32.vlgmr.msra.gmra.mrb[36].mxu0 %vm762_vm5, %v8194_v32 }
 0x4d9   :  { %6450 = vmatprep.mubr.msk.f32.mxu0 %vm762_vm5, %v8199_v33  ;;  %7218 = vmatpush3.bf16.msra.mxu0 %v8330_v62 }
 0x4da   :  { %7220 = vmatprep.subr.bf16.mxu0 %v8400_v30 }
 0x4dc   :  { %6451 = vmatmul.mubr.msk.f32.gmra.mrb[38].mxu0 %vm762_vm5, %v8208_v34 }
 0x4dd   :  { %6453 = vmatprep.mubr.msk.f32.mxu0 %vm762_vm5, %v8213_v35  ;;  %7222 = vmatpush3.bf16.msra.mxu0 %v8400_v30 }
 0x4de   :  { %7224 = vmatprep.subr.bf16.mxu0 %v8416_v53 }
 0x4e0   :  { %6454 = vmatmul.mubr.msk.f32.gmra.mrb[40].mxu0 %vm762_vm5, %v8222_v36 }
 0x4e1   :  { %6456 = vmatprep.mubr.msk.f32.mxu0 %vm762_vm5, %v8227_v37  ;;  %7226 = vmatpush3.bf16.msra.mxu0 %v8416_v53 }
 0x4e2   :  { %7228 = vmatprep.subr.bf16.mxu0 %v8433_v1 }
 0x4e4   :  { %6457 = vmatmul.mubr.msk.f32.gmra.mrb[42].mxu0 %vm762_vm5, %v8236_v38 }
 0x4e5   :  { %6459 = vmatprep.mubr.msk.f32.mxu0 %vm762_vm5, %v8241_v39  ;;  %7230 = vmatpush3.bf16.msra.mxu0 %v8433_v1 }
 0x4e8   :  { %6460 = vmatmul.mubr.msk.f32.gmra.mrb[44].mxu0 %vm762_vm5, %v8250_v40 }
 0x4e9   :  { %6462 = vmatprep.mubr.msk.f32.mxu0 %vm762_vm5, %v8255_v41 }
 0x4ec   :  { %6463 = vmatmul.mubr.msk.f32.gmra.mrb[46].mxu0 %vm762_vm5, %v8264_v42 }
 0x5ab   :  { %v6449_v32 = vpop.f32.mrb[36].mxu0 }
 0x5ac   :  { %v1884_v33 = vpop.f32.mrb[37].mxu0  ;;  %v1890_v35 = vadd.f32 %v6449_v32, %v8376_v15  ;;  %v9969_v32 = vld [vmem:[#allocation18_spill] sm:$0xff] }
 0x5ad   :  { %v1885_v34 = vadd.f32 %v1884_v33, %v8374_v14 }
 0x5af   :  { %v6452_v36 = vpop.f32.mrb[38].mxu0  ;;  %6481 = vmatprep.mubr.msk.f32.mxu1 %vm930_vm6, %v1885_v34  ;;  %v1815_v34 = vsel %vm1811_vm13, %v8711_v24, 0.0 }
 0x5b0   :  { %v1894_v37 = vpop.f32.mrb[39].mxu0  ;;  %6482 = vmatmul.mubr.msk.f32.vlgmr.msra.gmra.mrb[36].mxu1 %vm930_vm6, %v1890_v35  ;;  %v1900_v39 = vadd.f32 %v6452_v36, %v8388_v22  ;;  %v9970_v35 = vld [vmem:[#allocation19_spill] sm:$0xff] }
 0x5b1   :  { %v1895_v38 = vadd.f32 %v1894_v37, %v8384_v20  ;;  %7234 = vmatpush3.bf16.msra.mxu1 %v8312_v57 }
 0x5b2   :  { %7236 = vmatprep.subr.bf16.mxu1 %v8332_v63 }
 0x5b3   :  { %v6455_v40 = vpop.f32.mrb[40].mxu0  ;;  %6484 = vmatprep.mubr.msk.f32.mxu1 %vm930_vm6, %v1895_v38 }
 0x5b4   :  { %v1904_v41 = vpop.f32.mrb[41].mxu0  ;;  %6485 = vmatmul.mubr.msk.f32.gmra.mrb[38].mxu1 %vm930_vm6, %v1900_v39  ;;  %v1910_v12 = vadd.f32 %v6455_v40, %v8425_v59  ;;  %v1814_v39 = vsel %vm1810_vm14, %v8713_v9, 0.0 }
 0x5b5   :  { %v1905_v42 = vadd.f32 %v1904_v41, %v8397_v28  ;;  %7238 = vmatpush3.bf16.msra.mxu1 %v8332_v63 }
 0x5b6   :  { %7240 = vmatprep.subr.bf16.mxu1 %v8343_v2 }
 0x5b7   :  { %v6458_v58 = vpop.f32.mrb[42].mxu0  ;;  %6503 = vmatprep.mubr.msk.f32.mxu0 %vm930_vm6, %v1905_v42 }
 0x5b8   :  { %v1914_v26 = vpop.f32.mrb[43].mxu0  ;;  %6504 = vmatmul.mubr.msk.f32.vlgmr.msra.gmra.mrb[48].mxu0 %vm930_vm6, %v1910_v12  ;;  %v1920_v54 = vadd.f32 %v6458_v58, %v8450_v50  ;;  %v9971_v58 = vld [vmem:[#allocation20_spill] sm:$0xff] }
 0x5b9   :  { %v1915_v61 = vadd.f32 %v1914_v26, %v8437_v23  ;;  %7242 = vmatpush3.bf16.msra.mxu1 %v8343_v2 }
 0x5ba   :  { %7244 = vmatprep.subr.bf16.mxu1 %v8353_v5 }
 0x5bb   :  { %v6461_v48 = vpop.f32.mrb[44].mxu0  ;;  %6506 = vmatprep.mubr.msk.f32.mxu0 %vm930_vm6, %v1915_v61  ;;  %v1817_v61 = vsel %vm1813_vm0, %v8725_v17, 0.0 }
 0x5bc   :  { %v1924_v60 = vpop.f32.mrb[45].mxu0  ;;  %6507 = vmatmul.mubr.msk.f32.gmra.mrb[50].mxu0 %vm930_vm6, %v1920_v54  ;;  %v1930_v4 = vadd.f32 %v6461_v48, %v9956_v0  ;;  %v9972_v54 = vld [vmem:[#allocation21_spill] sm:$0xff] }
 0x5bd   :  { %v1925_v18 = vadd.f32 %v1924_v60, %v8402_v43  ;;  %7246 = vmatpush3.bf16.msra.mxu1 %v8353_v5  ;;  %6539 = vmatprep.mubr.msk.f32.mxu0 %vm762_vm5, %v8796_v21 }
 0x5be   :  { %7260 = vmatprep.subr.bf16.mxu1 %v9957_v6 }
 0x5bf   :  { %v6464_v46 = vpop.f32.mrb[46].mxu0  ;;  %6525 = vmatprep.mubr.msk.f32.mxu1 %vm930_vm6, %v1925_v18 }
 0x5c0   :  { %v1934_v44 = vpop.f32.mrb[47].mxu0  ;;  %6526 = vmatmul.mubr.msk.f32.vlgmr.msra.gmra.mrb[40].mxu1 %vm930_vm6, %v1930_v4  ;;  %v1940_v31 = vadd.f32 %v6464_v46, %v9959_v3  ;;  %v1816_v4 = vsel %vm1812_vm1, %v8729_v25, 0.0 }
 0x5c1   :  { %v1935_v51 = vadd.f32 %v1934_v44, %v9958_v10  ;;  %7262 = vmatpush3.bf16.msra.mxu1 %v9957_v6 }
 0x5c2   :  { %7264 = vmatprep.subr.bf16.mxu1 %v9965_v49 }
 0x5c3   :  { %6528 = vmatprep.mubr.msk.f32.mxu1 %vm930_vm6, %v1935_v51 }
 0x5c4   :  { %6529 = vmatmul.mubr.msk.f32.gmra.mrb[42].mxu1 %vm930_vm6, %v1940_v31 }
 0x5c5   :  { %7266 = vmatpush3.bf16.msra.mxu1 %v9965_v49 }
 0x5c6   :  { %7268 = vmatprep.subr.bf16.mxu1 %v9966_v8 }
 0x5c9   :  { %7270 = vmatpush3.bf16.msra.mxu1 %v9966_v8 }
 0x5ca   :  { %7272 = vmatprep.subr.bf16.mxu1 %v9967_v45 }
 0x5cd   :  { %7274 = vmatpush3.bf16.msra.mxu1 %v9967_v45 }
 0x5ce   :  { %7292 = vmatprep.subr.bf16.mxu1 %v8312_v57 }
 0x683   :  { %v6483_v19 = vpop.f32.mrb[36].mxu1 }
 0x684   :  { %v2027_v7 = vadd.f32 %v6483_v19, %v9968_v55  ;;  %v2021_v47 = vpop.f32.mrb[37].mxu1  ;;  %v9973_v19 = vld [vmem:[#allocation10_spill] sm:$0xff] }
 0x685   :  { %v2022_v13 = vadd.f32 %v9968_v55, %v2021_v47  ;;  %v9974_v47 = vld [vmem:[#allocation12_spill] sm:$0xff] }
 0x686   :  { %v2235_v33 = vsub.f32 %v9969_v32, %v2027_v7 }
 0x687   :  { %v2234_v36 = vsub.f32 %v9970_v35, %v2022_v13  ;;  %v6486_v37 = vpop.f32.mrb[38].mxu1 }
 0x688   :  { %v8823_v38 = vadd.f32 %v2235_v33, %v1815_v34  ;;  %v2037_v40 = vadd.f32 %v6486_v37, %v9968_v55  ;;  %v2031_v41 = vpop.f32.mrb[39].mxu1 }
 0x689   :  { %v8829_v42 = vadd.f32 %v2234_v36, %v1814_v39  ;;  %v2032_v12 = vadd.f32 %v9968_v55, %v2031_v41 }
 0x68a   :  { %v2237_v26 = vsub.f32 %v9971_v58, %v2037_v40 }
 0x68b   :  { %v2236_v48 = vsub.f32 %v9972_v54, %v2032_v12  ;;  %v6505_v60 = vpop.f32.mrb[48].mxu0 }
 0x68c   :  { %v8837_v18 = vadd.f32 %v2237_v26, %v1817_v61  ;;  %v2124_v46 = vadd.f32 %v6505_v60, %v8488_v27  ;;  %v2118_v44 = vpop.f32.mrb[49].mxu0 }
 0x68d   :  { %v8843_v51 = vadd.f32 %v2236_v48, %v1816_v4  ;;  %v2119_v31 = vadd.f32 %v8488_v27, %v2118_v44 }
 0x68e   :  { %v2243_v7 = vadd.f32 %v2124_v46, %v9973_v19 }
 0x68f   :  { %v2242_v13 = vadd.f32 %v2119_v31, %v9974_v47  ;;  %v6508_v33 = vpop.f32.mrb[50].mxu0  ;;  %v9975_v31 = vld [vmem:[#allocation13_spill] sm:$0xff] }
 0x690   :  { %v5521_v34 = vmul.f32 -1.442695, %v2243_v7  ;;  %v2134_v36 = vadd.f32 %v6508_v33, %v8488_v27  ;;  %v2128_v37 = vpop.f32.mrb[51].mxu0 }
 0x691   :  { %v5520_v39 = vmul.f32 -1.442695, %v2242_v13  ;;  %v2129_v40 = vadd.f32 %v8488_v27, %v2128_v37 }
 0x692   :  { %v2245_v41 = vadd.f32 %v2134_v36, %v8512_v52  ;;  %7667 = vpow2.f32 %v5521_v34 }
 0x693   :  { %v2244_v12 = vadd.f32 %v2129_v40, %v8515_v16  ;;  %v6527_v26 = vpop.f32.mrb[40].mxu1  ;;  %7669 = vpow2.f32 %v5520_v39  ;;  %v9976_v40 = vld [vmem:[#allocation16_spill] sm:$0xff] }
 0x694   :  { %v5523_v61 = vmul.f32 -1.442695, %v2245_v41  ;;  %v2221_v48 = vadd.f32 %v6527_v26, %v8493_v29  ;;  %v2215_v60 = vpop.f32.mrb[41].mxu1 }
 0x695   :  { %v5522_v4 = vmul.f32 -1.442695, %v2244_v12  ;;  %v2216_v46 = vadd.f32 %v8493_v29, %v2215_v60 }
 0x696   :  { %v2271_v44 = vadd.f32 %v2221_v48, %v9964_v56  ;;  %7671 = vpow2.f32 %v5523_v61 }
 0x697   :  { %v2270_v7 = vadd.f32 %v2216_v46, %v9975_v31  ;;  %v6530_v13 = vpop.f32.mrb[42].mxu1  ;;  %7673 = vpow2.f32 %v5522_v4 }
 0x698   :  { %v5525_v27 = vmul.f32 -1.442695, %v2271_v44  ;;  %v2231_v33 = vadd.f32 %v6530_v13, %v8493_v29  ;;  %v2225_v36 = vpop.f32.mrb[43].mxu1 }
 0x699   :  { %v5524_v34 = vmul.f32 -1.442695, %v2270_v7  ;;  %v2226_v37 = vadd.f32 %v8493_v29, %v2225_v36 }
 0x69a   :  { %7675 = vpow2.f32 %v5525_v27  ;;  %v2273_v39 = vadd.f32 %v2231_v33, %v8520_v11 }
 0x69b   :  { %7677 = vpow2.f32 %v5524_v34  ;;  %v2272_v41 = vadd.f32 %v2226_v37, %v9976_v40 }
 0x69c   :  { %v5527_v12 = vmul.f32 -1.442695, %v2273_v39  ;;  %v7668_v48 = vpop.eup %7667 }
 0x69d   :  { %v5526_v26 = vmul.f32 -1.442695, %v2272_v41  ;;  %v7670_v60 = vpop.eup %7669  ;;  %v2259_v61 = vadd.f32 1.0, %v7668_v48 }
 0x69e   :  { %7679 = vpow2.f32 %v5527_v12  ;;  %v2258_v44 = vadd.f32 1.0, %v7670_v60 }
 0x69f   :  { %7681 = vpow2.f32 %v5526_v26 }
 0x6a0   :  { %v7672_v46 = vpop.eup %7671  ;;  %7683 = vrcp.f32 %v2259_v61 }
 0x6a1   :  { %v7674_v13 = vpop.eup %7673  ;;  %v2261_v29 = vadd.f32 1.0, %v7672_v46  ;;  %7685 = vrcp.f32 %v2258_v44 }
 0x6a2   :  { %v2260_v34 = vadd.f32 1.0, %v7674_v13 }
 0x6a4   :  { %v7676_v4 = vpop.eup %7675 }
 0x6a5   :  { %v7678_v7 = vpop.eup %7677  ;;  %v2287_v27 = vadd.f32 1.0, %v7676_v4 }
 0x6a6   :  { %v2286_v33 = vadd.f32 1.0, %v7678_v7 }
 0x6a7   :  { %7687 = vrcp.f32 %v2287_v27 }
 0x6a8   :  { %v7680_v36 = vpop.eup %7679  ;;  %7689 = vrcp.f32 %v2286_v33 }
 0x6a9   :  { %7691 = vrcp.f32 %v2261_v29  ;;  %v2289_v37 = vadd.f32 1.0, %v7680_v36  ;;  %v7682_v39 = vpop.eup %7681 }
 0x6aa   :  { %v2288_v41 = vadd.f32 1.0, %v7682_v39  ;;  %v7684_v12 = vpop.eup %7683  ;;  %v8912_v39 = vld [vmem:[%s9837_s5 + $0x18] sm:$0xff] }
 0x6ab   :  { %7693 = vrcp.f32 %v2289_v37  ;;  %v7686_v26 = vpop.eup %7685  ;;  %v2299_v61 = vmul.f32 %v7684_v12, %v8711_v24  ;;  %v8928_v12 = vld [vmem:[%s9837_s5 + $0x28] sm:$0xff] }
 0x6ac   :  { %7695 = vrcp.f32 %v2260_v34  ;;  %v2298_v4 = vmul.f32 %v7686_v26, %v8713_v9  ;;  %v8935_v26 = vld [vmem:[%s9837_s5 + $0x30] sm:$0xff] }
 0x6ad   :  { %7697 = vrcp.f32 %v2288_v41  ;;  %v8919_v41 = vld [vmem:[%s9837_s5 + $0x20] sm:$0xff] }
 0x6b1   :  { %v7688_v48 = vpop.eup %7687 }
 0x6b2   :  { %v7690_v60 = vpop.eup %7689  ;;  %v2303_v46 = vmul.f32 %v7688_v48, %v8823_v38  ;;  %v8944_v48 = vld [vmem:[%s9837_s5 + $0x38] sm:$0xff] }
 0x6b3   :  { %v7692_v44 = vpop.eup %7691  ;;  %v2302_v13 = vmul.f32 %v7690_v60, %v8829_v42  ;;  %v8951_v60 = vld [vmem:[%s9837_s5 + $0x40] sm:$0xff] }
 0x6b4   :  { %v8864_v7 = vadd.f32 %v2303_v46, %v2299_v61  ;;  %v2301_v36 = vmul.f32 %v7692_v44, %v8725_v17  ;;  %v8959_v61 = vld [vmem:[%s9837_s5 + $0x48] sm:$0xff]  ;;  %v8966_v46 = vld [vmem:[%s9837_s5 + $0x50] sm:$0xff]  ;;  %v8973_v44 = vld [vmem:[%s9837_s5 + $0x58] sm:$0xff] }
 0x6b5   :  { %v7694_v29 = vpop.eup %7693  ;;  %v8866_v27 = vadd.f32 %v2302_v13, %v2298_v4 }
 0x6b6   :  { %v7696_v33 = vpop.eup %7695  ;;  %vm2311_vm3 = vcmp.gt.f32.partialorder %v8864_v7, 0.01  ;;  %v2305_v34 = vmul.f32 %v7694_v29, %v8837_v18 }
 0x6b7   :  { %vm2310_vm7 = vcmp.gt.f32.partialorder %v8866_v27, 0.01  ;;  %v7247_v24 = vpack.c.bf16 %v8864_v7, %v8866_v27  ;;  %v7698_v9 = vpop.eup %7697  ;;  %v2300_v42 = vmul.f32 %v7696_v33, %v8729_v25  ;;  %v8896_v25 = vld [vmem:[%s9837_s5 + $0x8] sm:$0xff] }
 0x6b8   :  { %vm7248_vm8 = vmpackc.low %vm2311_vm3, %vm2310_vm7  ;;  %v8878_v38 = vadd.f32 %v2305_v34, %v2301_v36  ;;  %v2304_v17 = vmul.f32 %v7698_v9, %v8843_v51  ;;  %v8903_v51 = vld [vmem:[%s9837_s5 + $0x10] sm:$0xff] }
 0x6b9   :  { %7249 = vmatprep.subr.msk.bf16.mxu0 %vm7248_vm8, %v7247_v24 }
 0x6ba   :  { %7252 = vmatpush3.bf16.msk.msra.mxu0 %vm7248_vm8, %v7247_v24  ;;  %v8882_v18 = vadd.f32 %v2304_v17, %v2300_v42  ;;  %vm2313_vm9 = vcmp.gt.f32.partialorder %v8878_v38, 0.01 }
 0x6bc   :  { %vm2312_vm10 = vcmp.gt.f32.partialorder %v8882_v18, 0.01  ;;  %v7253_v37 = vpack.c.bf16 %v8878_v38, %v8882_v18 }
 0x6bd   :  { %vm7254_vm11 = vmpackc.low %vm2313_vm9, %vm2312_vm10 }
 0x6be   :  { %7255 = vmatprep.subr.msk.bf16.mxu0 %vm7254_vm11, %v7253_v37 }
 0x6bf   :  { %7258 = vmatpush3.bf16.msk.msra.mxu0 %vm7254_vm11, %v7253_v37 }
 0x6c0   :  { %7276 = vmatprep.subr.bf16.mxu0 %v8330_v62 }
 0x6c2   :  { %6540 = vmatmul.mubr.msk.f32.vlgmr.msra.gmra.mrb[52].mxu0 %vm762_vm5, %v8896_v25 }
 0x6c3   :  { %6542 = vmatprep.mubr.msk.f32.mxu0 %vm762_vm5, %v8903_v51  ;;  %7278 = vmatpush3.bf16.msra.mxu0 %v8330_v62 }
 0x6c4   :  { %7280 = vmatprep.subr.bf16.mxu0 %v8400_v30 }
 0x6c6   :  { %6543 = vmatmul.mubr.msk.f32.gmra.mrb[54].mxu0 %vm762_vm5, %v8912_v39 }
 0x6c7   :  { %6545 = vmatprep.mubr.msk.f32.mxu0 %vm762_vm5, %v8919_v41  ;;  %7282 = vmatpush3.bf16.msra.mxu0 %v8400_v30 }
 0x6c8   :  { %7284 = vmatprep.subr.bf16.mxu0 %v8416_v53 }
 0x6ca   :  { %6546 = vmatmul.mubr.msk.f32.gmra.mrb[56].mxu0 %vm762_vm5, %v8928_v12 }
 0x6cb   :  { %6548 = vmatprep.mubr.msk.f32.mxu0 %vm762_vm5, %v8935_v26  ;;  %7286 = vmatpush3.bf16.msra.mxu0 %v8416_v53 }
 0x6cc   :  { %7288 = vmatprep.subr.bf16.mxu0 %v8433_v1 }
 0x6ce   :  { %6549 = vmatmul.mubr.msk.f32.gmra.mrb[58].mxu0 %vm762_vm5, %v8944_v48 }
 0x6cf   :  { %6551 = vmatprep.mubr.msk.f32.mxu0 %vm762_vm5, %v8951_v60  ;;  %7290 = vmatpush3.bf16.msra.mxu0 %v8433_v1 }
 0x6d2   :  { %6552 = vmatmul.mubr.msk.f32.gmra.mrb[60].mxu0 %vm762_vm5, %v8959_v61 }
 0x6d3   :  { %6554 = vmatprep.mubr.msk.f32.mxu0 %vm762_vm5, %v8966_v46 }
 0x6d6   :  { %6555 = vmatmul.mubr.msk.f32.gmra.mrb[62].mxu0 %vm762_vm5, %v8973_v44 }
 0x795   :  { %v6541_v4 = vpop.f32.mrb[52].mxu0 }
 0x796   :  { %v2384_v13 = vpop.f32.mrb[53].mxu0  ;;  %v2390_v33 = vadd.f32 %v6541_v4, %v8376_v15 }
 0x797   :  { %v2385_v29 = vadd.f32 %v2384_v13, %v8374_v14 }
 0x799   :  { %v6544_v36 = vpop.f32.mrb[54].mxu0  ;;  %6573 = vmatprep.mubr.msk.f32.mxu1 %vm930_vm6, %v2385_v29 }
 0x79a   :  { %v2394_v34 = vpop.f32.mrb[55].mxu0  ;;  %6574 = vmatmul.mubr.msk.f32.vlgmr.msra.gmra.mrb[44].mxu1 %vm930_vm6, %v2390_v33  ;;  %v2400_v9 = vadd.f32 %v6544_v36, %v8388_v22 }
 0x79b   :  { %v2395_v24 = vadd.f32 %v2394_v34, %v8384_v20  ;;  %7294 = vmatpush3.bf16.msra.mxu1 %v8312_v57 }
 0x79c   :  { %7296 = vmatprep.subr.bf16.mxu1 %v8332_v63 }
 0x79d   :  { %v6547_v42 = vpop.f32.mrb[56].mxu0  ;;  %6576 = vmatprep.mubr.msk.f32.mxu1 %vm930_vm6, %v2395_v24 }
 0x79e   :  { %v2404_v17 = vpop.f32.mrb[57].mxu0  ;;  %6577 = vmatmul.mubr.msk.f32.gmra.mrb[46].mxu1 %vm930_vm6, %v2400_v9  ;;  %v2410_v4 = vadd.f32 %v6547_v42, %v8425_v59 }
 0x79f   :  { %v2405_v37 = vadd.f32 %v2404_v17, %v8397_v28  ;;  %7298 = vmatpush3.bf16.msra.mxu1 %v8332_v63 }
 0x7a0   :  { %7300 = vmatprep.subr.bf16.mxu1 %v8343_v2 }
 0x7a1   :  { %v6550_v13 = vpop.f32.mrb[58].mxu0  ;;  %6595 = vmatprep.mubr.msk.f32.mxu0 %vm930_vm6, %v2405_v37 }
 0x7a2   :  { %v2414_v29 = vpop.f32.mrb[59].mxu0  ;;  %6596 = vmatmul.mubr.msk.f32.vlgmr.msra.gmra.mrb[64].mxu0 %vm930_vm6, %v2410_v4  ;;  %v2420_v36 = vadd.f32 %v6550_v13, %v8450_v50 }
 0x7a3   :  { %v2415_v33 = vadd.f32 %v2414_v29, %v8437_v23  ;;  %7302 = vmatpush3.bf16.msra.mxu1 %v8343_v2 }
 0x7a4   :  { %7304 = vmatprep.subr.bf16.mxu1 %v8353_v5 }
 0x7a5   :  { %v6553_v34 = vpop.f32.mrb[60].mxu0  ;;  %6598 = vmatprep.mubr.msk.f32.mxu0 %vm930_vm6, %v2415_v33 }
 0x7a6   :  { %v2424_v24 = vpop.f32.mrb[61].mxu0  ;;  %6599 = vmatmul.mubr.msk.f32.gmra.mrb[66].mxu0 %vm930_vm6, %v2420_v36  ;;  %v2430_v42 = vadd.f32 %v6553_v34, %v9956_v0 }
 0x7a7   :  { %v2425_v9 = vadd.f32 %v2424_v24, %v8402_v43  ;;  %7306 = vmatpush3.bf16.msra.mxu1 %v8353_v5  ;;  %6631 = vmatprep.mubr.msk.f32.mxu0 %vm762_vm5, %v8796_v21 }
 0x7a8   :  { %7320 = vmatprep.subr.bf16.mxu1 %v9957_v6 }
 0x7a9   :  { %v6556_v17 = vpop.f32.mrb[62].mxu0  ;;  %6617 = vmatprep.mubr.msk.f32.mxu1 %vm930_vm6, %v2425_v9  ;;  %v2315_v9 = vsel %vm2311_vm3, %v8864_v7, 0.0 }
 0x7aa   :  { %v2434_v37 = vpop.f32.mrb[63].mxu0  ;;  %6618 = vmatmul.mubr.msk.f32.vlgmr.msra.gmra.mrb[48].mxu1 %vm930_vm6, %v2430_v42  ;;  %v2440_v13 = vadd.f32 %v6556_v17, %v9959_v3 }
 0x7ab   :  { %v2435_v4 = vadd.f32 %v2434_v37, %v9958_v10  ;;  %7322 = vmatpush3.bf16.msra.mxu1 %v9957_v6 }
 0x7ac   :  { %7324 = vmatprep.subr.bf16.mxu1 %v9965_v49 }
 0x7ad   :  { %6620 = vmatprep.mubr.msk.f32.mxu1 %vm930_vm6, %v2435_v4  ;;  %v2314_v4 = vsel %vm2310_vm7, %v8866_v27, 0.0 }
 0x7ae   :  { %6621 = vmatmul.mubr.msk.f32.gmra.mrb[50].mxu1 %vm930_vm6, %v2440_v13 }
 0x7af   :  { %7326 = vmatpush3.bf16.msra.mxu1 %v9965_v49 }
 0x7b0   :  { %7328 = vmatprep.subr.bf16.mxu1 %v9966_v8 }
 0x7b3   :  { %7330 = vmatpush3.bf16.msra.mxu1 %v9966_v8 }
 0x7b4   :  { %7332 = vmatprep.subr.bf16.mxu1 %v9967_v45 }
 0x7b7   :  { %7334 = vmatpush3.bf16.msra.mxu1 %v9967_v45 }
 0x7b8   :  { %7352 = vmatprep.subr.bf16.mxu1 %v8312_v57 }
 0x86d   :  { %v6575_v29 = vpop.f32.mrb[44].mxu1 }
 0x86e   :  { %v2527_v33 = vadd.f32 %v6575_v29, %v9968_v55  ;;  %v2521_v36 = vpop.f32.mrb[45].mxu1 }
 0x86f   :  { %v2522_v34 = vadd.f32 %v9968_v55, %v2521_v36 }
 0x870   :  { %v2735_v24 = vsub.f32 %v9969_v32, %v2527_v33  ;;  %v9037_v33 = vld [vmem:[%s9840_s8] ss:$0 sm:$0xff] }
 0x871   :  { %v2734_v42 = vsub.f32 %v9970_v35, %v2522_v34  ;;  %v6578_v17 = vpop.f32.mrb[46].mxu1  ;;  %9977 = vst [vmem:[#allocation7_spill] sm:$0xff] %v9037_v33 }
 0x872   :  { %v9026_v37 = vadd.f32 %v2735_v24, %v2315_v9  ;;  %v2537_v13 = vadd.f32 %v6578_v17, %v9968_v55  ;;  %v2531_v29 = vpop.f32.mrb[47].mxu1  ;;  %v2317_v24 = vsel %vm2313_vm9, %v8878_v38, 0.0  ;;  %v9053_v17 = vld [vmem:[%s9840_s8 + $0x1] ss:$0 sm:$0xff] }
 0x873   :  { %v9032_v45 = vadd.f32 %v2734_v42, %v2314_v4  ;;  %v2532_v36 = vadd.f32 %v9037_v33, %v2531_v29  ;;  %v2316_v42 = vsel %vm2312_vm10, %v8882_v18, 0.0 }
 0x874   :  { %v2737_v34 = vsub.f32 %v9971_v58, %v2537_v13 }
 0x875   :  { %v2736_v9 = vsub.f32 %v9972_v54, %v2532_v36  ;;  %v6597_v35 = vpop.f32.mrb[64].mxu0 }
 0x876   :  { %v9045_v55 = vadd.f32 %v2737_v34, %v2317_v24  ;;  %v2624_v4 = vadd.f32 %v9053_v17, %v6597_v35  ;;  %v2618_v13 = vpop.f32.mrb[65].mxu0 }
 0x877   :  { %v9056_v29 = vadd.f32 %v2736_v9, %v2316_v42  ;;  %v2619_v58 = vadd.f32 %v9053_v17, %v2618_v13 }
 0x878   :  { %v2743_v36 = vadd.f32 %v2624_v4, %v9973_v19  ;;  %v9068_v4 = vld [vmem:[%s9840_s8 + $0x2] ss:$0 sm:$0xff] }
 0x879   :  { %v2742_v34 = vadd.f32 %v2619_v58, %v9974_v47  ;;  %v6600_v24 = vpop.f32.mrb[66].mxu0 }
 0x87a   :  { %v5557_v54 = vmul.f32 -1.442695, %v2743_v36  ;;  %v2634_v32 = vadd.f32 %v9053_v17, %v6600_v24  ;;  %v2628_v33 = vpop.f32.mrb[67].mxu0 }
 0x87b   :  { %v5556_v8 = vmul.f32 -1.442695, %v2742_v34  ;;  %v2629_v49 = vadd.f32 %v9053_v17, %v2628_v33 }
 0x87c   :  { %v2745_v3 = vadd.f32 %v2634_v32, %v8512_v52  ;;  %7699 = vpow2.f32 %v5557_v54 }
 0x87d   :  { %v2744_v35 = vadd.f32 %v2629_v49, %v8515_v16  ;;  %v6619_v9 = vpop.f32.mrb[48].mxu1  ;;  %7701 = vpow2.f32 %v5556_v8 }
 0x87e   :  { %v5559_v42 = vmul.f32 -1.442695, %v2745_v3  ;;  %v2721_v58 = vadd.f32 %v9068_v4, %v6619_v9  ;;  %v2715_v13 = vpop.f32.mrb[49].mxu1 }
 0x87f   :  { %v5558_v36 = vmul.f32 -1.442695, %v2744_v35  ;;  %v2716_v34 = vadd.f32 %v9068_v4, %v2715_v13 }
 0x880   :  { %v2771_v33 = vadd.f32 %v2721_v58, %v9964_v56  ;;  %7703 = vpow2.f32 %v5559_v42 }
 0x881   :  { %v2770_v32 = vadd.f32 %v2716_v34, %v9975_v31  ;;  %v6622_v49 = vpop.f32.mrb[50].mxu1  ;;  %7705 = vpow2.f32 %v5558_v36 }
 0x882   :  { %v5561_v54 = vmul.f32 -1.442695, %v2771_v33  ;;  %v2731_v3 = vadd.f32 %v9068_v4, %v6622_v49  ;;  %v2725_v24 = vpop.f32.mrb[51].mxu1 }
 0x883   :  { %v5560_v16 = vmul.f32 -1.442695, %v2770_v32  ;;  %v2726_v52 = vadd.f32 %v9068_v4, %v2725_v24 }
 0x884   :  { %7707 = vpow2.f32 %v5561_v54  ;;  %v2773_v8 = vadd.f32 %v2731_v3, %v8520_v11 }
 0x885   :  { %7709 = vpow2.f32 %v5560_v16  ;;  %v2772_v35 = vadd.f32 %v2726_v52, %v9976_v40 }
 0x886   :  { %v5563_v9 = vmul.f32 -1.442695, %v2773_v8  ;;  %v7700_v13 = vpop.eup %7699 }
 0x887   :  { %v5562_v58 = vmul.f32 -1.442695, %v2772_v35  ;;  %v7702_v34 = vpop.eup %7701  ;;  %v2759_v42 = vadd.f32 1.0, %v7700_v13 }
 0x888   :  { %7711 = vpow2.f32 %v5563_v9  ;;  %v2758_v49 = vadd.f32 1.0, %v7702_v34 }
 0x889   :  { %7713 = vpow2.f32 %v5562_v58 }
 0x88a   :  { %v7704_v33 = vpop.eup %7703  ;;  %7715 = vrcp.f32 %v2759_v42 }
 0x88b   :  { %v7706_v31 = vpop.eup %7705  ;;  %v2761_v24 = vadd.f32 1.0, %v7704_v33  ;;  %7717 = vrcp.f32 %v2758_v49 }
 0x88c   :  { %v2760_v52 = vadd.f32 1.0, %v7706_v31 }
 0x88e   :  { %v7708_v36 = vpop.eup %7707 }
 0x88f   :  { %v7710_v32 = vpop.eup %7709  ;;  %v2787_v54 = vadd.f32 1.0, %v7708_v36 }
 0x890   :  { %v2786_v3 = vadd.f32 1.0, %v7710_v32 }
 0x891   :  { %7719 = vrcp.f32 %v2787_v54 }
 0x892   :  { %v7712_v16 = vpop.eup %7711  ;;  %7721 = vrcp.f32 %v2786_v3 }
 0x893   :  { %7723 = vrcp.f32 %v2761_v24  ;;  %v2789_v8 = vadd.f32 1.0, %v7712_v16  ;;  %v7714_v35 = vpop.eup %7713 }
 0x894   :  { %v2788_v9 = vadd.f32 1.0, %v7714_v35  ;;  %v7716_v58 = vpop.eup %7715 }
 0x895   :  { %7725 = vrcp.f32 %v2789_v8  ;;  %v7718_v13 = vpop.eup %7717  ;;  %v2799_v42 = vmul.f32 %v7716_v58, %v8864_v7 }
 0x896   :  { %7727 = vrcp.f32 %v2760_v52  ;;  %v2798_v36 = vmul.f32 %v7718_v13, %v8866_v27 }
 0x897   :  { %7729 = vrcp.f32 %v2788_v9 }
 0x89b   :  { %v7720_v34 = vpop.eup %7719 }
 0x89c   :  { %v7722_v40 = vpop.eup %7721  ;;  %v2803_v33 = vmul.f32 %v7720_v34, %v9026_v37 }
 0x89d   :  { %v7724_v49 = vpop.eup %7723  ;;  %v2802_v31 = vmul.f32 %v7722_v40, %v9032_v45 }
 0x89e   :  { %v9082_v32 = vadd.f32 %v2803_v33, %v2799_v42  ;;  %v2801_v16 = vmul.f32 %v7724_v49, %v8878_v38 }
 0x89f   :  { %v7726_v24 = vpop.eup %7725  ;;  %v9084_v54 = vadd.f32 %v2802_v31, %v2798_v36 }
 0x8a0   :  { %v7728_v3 = vpop.eup %7727  ;;  %vm2811_vm12 = vcmp.gt.f32.partialorder %v9082_v32, 0.01  ;;  %v2805_v52 = vmul.f32 %v7726_v24, %v9045_v55 }
 0x8a1   :  { %vm2810_vm13 = vcmp.gt.f32.partialorder %v9084_v54, 0.01  ;;  %v7307_v7 = vpack.c.bf16 %v9082_v32, %v9084_v54  ;;  %v7730_v27 = vpop.eup %7729  ;;  %v2800_v40 = vmul.f32 %v7728_v3, %v8882_v18 }
 0x8a2   :  { %vm7308_vm14 = vmpackc.low %vm2811_vm12, %vm2810_vm13  ;;  %v9096_v45 = vadd.f32 %v2805_v52, %v2801_v16  ;;  %v2804_v38 = vmul.f32 %v7730_v27, %v9056_v29 }
 0x8a3   :  { %7309 = vmatprep.subr.msk.bf16.mxu0 %vm7308_vm14, %v7307_v7 }
 0x8a4   :  { %7312 = vmatpush3.bf16.msk.msra.mxu0 %vm7308_vm14, %v7307_v7  ;;  %v9100_v37 = vadd.f32 %v2804_v38, %v2800_v40  ;;  %vm2813_vm15 = vcmp.gt.f32.partialorder %v9096_v45, 0.01 }
 0x8a6   :  { %vm2812_vm0 = vcmp.gt.f32.partialorder %v9100_v37, 0.01  ;;  %v7313_v55 = vpack.c.bf16 %v9096_v45, %v9100_v37 }
 0x8a7   :  { %vm7314_vm1 = vmpackc.low %vm2813_vm15, %vm2812_vm0 }
 0x8a8   :  { %7315 = vmatprep.subr.msk.bf16.mxu0 %vm7314_vm1, %v7313_v55 }
 0x8a9   :  { %7318 = vmatpush3.bf16.msk.msra.mxu0 %vm7314_vm1, %v7313_v55 }
 0x8aa   :  { %7336 = vmatprep.subr.bf16.mxu0 %v8330_v62 }
 0x8ac   :  { %6632 = vmatmul.mubr.msk.f32.vlgmr.msra.gmra.mrb[68].mxu0 %vm762_vm5, %v8896_v25 }
 0x8ad   :  { %6634 = vmatprep.mubr.msk.f32.mxu0 %vm762_vm5, %v8903_v51  ;;  %7338 = vmatpush3.bf16.msra.mxu0 %v8330_v62 }
 0x8ae   :  { %7340 = vmatprep.subr.bf16.mxu0 %v8400_v30 }
 0x8b0   :  { %6635 = vmatmul.mubr.msk.f32.gmra.mrb[70].mxu0 %vm762_vm5, %v8912_v39 }
 0x8b1   :  { %6637 = vmatprep.mubr.msk.f32.mxu0 %vm762_vm5, %v8919_v41  ;;  %7342 = vmatpush3.bf16.msra.mxu0 %v8400_v30 }
 0x8b2   :  { %7344 = vmatprep.subr.bf16.mxu0 %v8416_v53 }
 0x8b4   :  { %6638 = vmatmul.mubr.msk.f32.gmra.mrb[72].mxu0 %vm762_vm5, %v8928_v12 }
 0x8b5   :  { %6640 = vmatprep.mubr.msk.f32.mxu0 %vm762_vm5, %v8935_v26  ;;  %7346 = vmatpush3.bf16.msra.mxu0 %v8416_v53 }
 0x8b6   :  { %7348 = vmatprep.subr.bf16.mxu0 %v8433_v1 }
 0x8b8   :  { %6641 = vmatmul.mubr.msk.f32.gmra.mrb[74].mxu0 %vm762_vm5, %v8944_v48 }
 0x8b9   :  { %6643 = vmatprep.mubr.msk.f32.mxu0 %vm762_vm5, %v8951_v60  ;;  %7350 = vmatpush3.bf16.msra.mxu0 %v8433_v1 }
 0x8bc   :  { %6644 = vmatmul.mubr.msk.f32.gmra.mrb[76].mxu0 %vm762_vm5, %v8959_v61 }
 0x8bd   :  { %6646 = vmatprep.mubr.msk.f32.mxu0 %vm762_vm5, %v8966_v46 }
 0x8c0   :  { %6647 = vmatmul.mubr.msk.f32.gmra.mrb[78].mxu0 %vm762_vm5, %v8973_v44 }
 0x97f   :  { %v6633_v18 = vpop.f32.mrb[68].mxu0 }
 0x980   :  { %v2884_v29 = vpop.f32.mrb[69].mxu0  ;;  %v2890_v35 = vadd.f32 %v6633_v18, %v8376_v15 }
 0x981   :  { %v2885_v8 = vadd.f32 %v2884_v29, %v8374_v14  ;;  %v9978_v29 = vld [vmem:[#allocation9_spill] sm:$0xff] }
 0x983   :  { %v6636_v9 = vpop.f32.mrb[70].mxu0  ;;  %6665 = vmatprep.mubr.msk.f32.mxu1 %vm930_vm6, %v2885_v8 }
 0x984   :  { %v2894_v58 = vpop.f32.mrb[71].mxu0  ;;  %6666 = vmatmul.mubr.msk.f32.vlgmr.msra.gmra.mrb[52].mxu1 %vm930_vm6, %v2890_v35  ;;  %v2900_v34 = vadd.f32 %v6636_v9, %v8388_v22  ;;  %v9979_v35 = vld [vmem:[#allocation4_spill] sm:$0xff]  ;;  %v9981_v9 = vld [vmem:[#allocation6_spill] sm:$0xff] }
 0x985   :  { %v2895_v13 = vadd.f32 %v2894_v58, %v8384_v20  ;;  %7354 = vmatpush3.bf16.msra.mxu1 %v8312_v57 }
 0x986   :  { %7356 = vmatprep.subr.bf16.mxu1 %v8332_v63 }
 0x987   :  { %v6639_v42 = vpop.f32.mrb[72].mxu0  ;;  %6668 = vmatprep.mubr.msk.f32.mxu1 %vm930_vm6, %v2895_v13  ;;  %v9982_v13 = vld [vmem:[#allocation7_spill] sm:$0xff] }
 0x988   :  { %v2904_v33 = vpop.f32.mrb[73].mxu0  ;;  %6669 = vmatmul.mubr.msk.f32.gmra.mrb[54].mxu1 %vm930_vm6, %v2900_v34  ;;  %v2910_v36 = vadd.f32 %v6639_v42, %v8425_v59 }
 0x989   :  { %v2905_v49 = vadd.f32 %v2904_v33, %v8397_v28  ;;  %7358 = vmatpush3.bf16.msra.mxu1 %v8332_v63 }
 0x98a   :  { %7360 = vmatprep.subr.bf16.mxu1 %v8343_v2 }
 0x98b   :  { %v6642_v31 = vpop.f32.mrb[74].mxu0  ;;  %6687 = vmatprep.mubr.msk.f32.mxu0 %vm930_vm6, %v2905_v49  ;;  %v9983_v49 = vld [vmem:[#allocation18_spill] sm:$0xff] }
 0x98c   :  { %v2914_v24 = vpop.f32.mrb[75].mxu0  ;;  %6688 = vmatmul.mubr.msk.f32.vlgmr.msra.gmra.mrb[80].mxu0 %vm930_vm6, %v2910_v36  ;;  %v2920_v16 = vadd.f32 %v6642_v31, %v8450_v50  ;;  %v2815_v31 = vsel %vm2811_vm12, %v9082_v32, 0.0 }
 0x98d   :  { %v2915_v3 = vadd.f32 %v2914_v24, %v8437_v23  ;;  %7362 = vmatpush3.bf16.msra.mxu1 %v8343_v2  ;;  %v9984_v24 = vld [vmem:[#allocation19_spill] sm:$0xff] }
 0x98e   :  { %7364 = vmatprep.subr.bf16.mxu1 %v8353_v5 }
 0x98f   :  { %v6645_v52 = vpop.f32.mrb[76].mxu0  ;;  %6690 = vmatprep.mubr.msk.f32.mxu0 %vm930_vm6, %v2915_v3 }
 0x990   :  { %v2924_v7 = vpop.f32.mrb[77].mxu0  ;;  %6691 = vmatmul.mubr.msk.f32.gmra.mrb[82].mxu0 %vm930_vm6, %v2920_v16  ;;  %v2930_v40 = vadd.f32 %v6645_v52, %v9956_v0 }
 0x991   :  { %v2925_v27 = vadd.f32 %v2924_v7, %v8402_v43  ;;  %7366 = vmatpush3.bf16.msra.mxu1 %v8353_v5  ;;  %6723 = vmatprep.mubr.msk.f32.mxu0 %vm762_vm5, %v8796_v21  ;;  %v9980_v21 = vld [vmem:[#allocation5_spill] sm:$0xff]  ;;  %v2814_v7 = vsel %vm2810_vm13, %v9084_v54, 0.0 }
 0x992   :  { %7380 = vmatprep.subr.bf16.mxu1 %v9957_v6 }
 0x993   :  { %v6648_v38 = vpop.f32.mrb[78].mxu0  ;;  %6709 = vmatprep.mubr.msk.f32.mxu1 %vm930_vm6, %v2925_v27 }
 0x994   :  { %v2934_v55 = vpop.f32.mrb[79].mxu0  ;;  %6710 = vmatmul.mubr.msk.f32.vlgmr.msra.gmra.mrb[56].mxu1 %vm930_vm6, %v2930_v40  ;;  %v2940_v8 = vadd.f32 %v6648_v38, %v9978_v29 }
 0x995   :  { %v2935_v18 = vadd.f32 %v2934_v55, %v9958_v10  ;;  %7382 = vmatpush3.bf16.msra.mxu1 %v9957_v6 }
 0x996   :  { %7384 = vmatprep.subr.bf16.mxu1 %v9979_v35 }
 0x997   :  { %6712 = vmatprep.mubr.msk.f32.mxu1 %vm930_vm6, %v2935_v18  ;;  %v9985_v18 = vld [vmem:[#allocation20_spill] sm:$0xff] }
 0x998   :  { %6713 = vmatmul.mubr.msk.f32.gmra.mrb[58].mxu1 %vm930_vm6, %v2940_v8 }
 0x999   :  { %7386 = vmatpush3.bf16.msra.mxu1 %v9979_v35 }
 0x99a   :  { %7388 = vmatprep.subr.bf16.mxu1 %v9980_v21 }
 0x99d   :  { %7390 = vmatpush3.bf16.msra.mxu1 %v9980_v21 }
 0x99e   :  { %7392 = vmatprep.subr.bf16.mxu1 %v9981_v9 }
 0x9a1   :  { %7394 = vmatpush3.bf16.msra.mxu1 %v9981_v9 }
 0x9a2   :  { %7412 = vmatprep.subr.bf16.mxu1 %v8312_v57 }
 0xa57   :  { %v6667_v58 = vpop.f32.mrb[52].mxu1 }
 0xa58   :  { %v3027_v34 = vadd.f32 %v9982_v13, %v6667_v58  ;;  %v3021_v42 = vpop.f32.mrb[53].mxu1  ;;  %v2817_v58 = vsel %vm2813_vm15, %v9096_v45, 0.0 }
 0xa59   :  { %v3022_v33 = vadd.f32 %v9982_v13, %v3021_v42 }
 0xa5a   :  { %v3235_v36 = vsub.f32 %v9983_v49, %v3027_v34  ;;  %v9986_v34 = vld [vmem:[#allocation21_spill] sm:$0xff] }
 0xa5b   :  { %v3234_v3 = vsub.f32 %v9984_v24, %v3022_v33  ;;  %v6670_v16 = vpop.f32.mrb[54].mxu1 }
 0xa5c   :  { %v9189_v52 = vadd.f32 %v3235_v36, %v2815_v31  ;;  %v3037_v27 = vadd.f32 %v9982_v13, %v6670_v16  ;;  %v3031_v40 = vpop.f32.mrb[55].mxu1  ;;  %v2816_v31 = vsel %vm2812_vm0, %v9100_v37, 0.0 }
 0xa5d   :  { %v9195_v38 = vadd.f32 %v3234_v3, %v2814_v7  ;;  %v3032_v55 = vadd.f32 %v9982_v13, %v3031_v40  ;;  %v9987_v13 = vld [vmem:[#allocation14_spill] sm:$0xff] }
 0xa5e   :  { %v3237_v8 = vsub.f32 %v9985_v18, %v3037_v27 }
 0xa5f   :  { %v3236_v42 = vsub.f32 %v9986_v34, %v3032_v55  ;;  %v6689_v33 = vpop.f32.mrb[80].mxu0 }
 0xa60   :  { %v9203_v36 = vadd.f32 %v3237_v8, %v2817_v58  ;;  %v3124_v3 = vadd.f32 %v9053_v17, %v6689_v33  ;;  %v3118_v16 = vpop.f32.mrb[81].mxu0  ;;  %v9988_v33 = vld [vmem:[#allocation15_spill] sm:$0xff] }
 0xa61   :  { %v9209_v7 = vadd.f32 %v3236_v42, %v2816_v31  ;;  %v3119_v27 = vadd.f32 %v9053_v17, %v3118_v16 }
 0xa62   :  { %v3243_v40 = vadd.f32 %v3124_v3, %v9973_v19 }
 0xa63   :  { %v3242_v18 = vadd.f32 %v3119_v27, %v9974_v47  ;;  %v6692_v24 = vpop.f32.mrb[82].mxu0  ;;  %v9989_v47 = vld [vmem:[#allocation13_spill] sm:$0xff] }
 0xa64   :  { %v5593_v55 = vmul.f32 -1.442695, %v3243_v40  ;;  %v3134_v8 = vadd.f32 %v9053_v17, %v6692_v24  ;;  %v3128_v58 = vpop.f32.mrb[83].mxu0 }
 0xa65   :  { %v5592_v34 = vmul.f32 -1.442695, %v3242_v18  ;;  %v3129_v49 = vadd.f32 %v9053_v17, %v3128_v58 }
 0xa66   :  { %v3245_v9 = vadd.f32 %v3134_v8, %v9987_v13  ;;  %7731 = vpow2.f32 %v5593_v55 }
 0xa67   :  { %v3244_v21 = vadd.f32 %v3129_v49, %v9988_v33  ;;  %v6711_v42 = vpop.f32.mrb[56].mxu1  ;;  %7733 = vpow2.f32 %v5592_v34 }
 0xa68   :  { %v5595_v31 = vmul.f32 -1.442695, %v3245_v9  ;;  %v3221_v16 = vadd.f32 %v9068_v4, %v6711_v42  ;;  %v3215_v3 = vpop.f32.mrb[57].mxu1 }
 0xa69   :  { %v5594_v27 = vmul.f32 -1.442695, %v3244_v21  ;;  %v3216_v40 = vadd.f32 %v9068_v4, %v3215_v3  ;;  %v9990_v21 = vld [vmem:[#allocation16_spill] sm:$0xff] }
 0xa6a   :  { %v3271_v24 = vadd.f32 %v3221_v16, %v9964_v56  ;;  %7735 = vpow2.f32 %v5595_v31 }
 0xa6b   :  { %v3270_v18 = vadd.f32 %v3216_v40, %v9989_v47  ;;  %v6714_v19 = vpop.f32.mrb[58].mxu1  ;;  %7737 = vpow2.f32 %v5594_v27 }
 0xa6c   :  { %v5597_v58 = vmul.f32 -1.442695, %v3271_v24  ;;  %v3231_v8 = vadd.f32 %v9068_v4, %v6714_v19  ;;  %v3225_v49 = vpop.f32.mrb[59].mxu1 }
 0xa6d   :  { %v5596_v55 = vmul.f32 -1.442695, %v3270_v18  ;;  %v3226_v9 = vadd.f32 %v9068_v4, %v3225_v49 }
 0xa6e   :  { %7739 = vpow2.f32 %v5597_v58  ;;  %v3273_v34 = vadd.f32 %v3231_v8, %v8520_v11 }
 0xa6f   :  { %7741 = vpow2.f32 %v5596_v55  ;;  %v3272_v42 = vadd.f32 %v3226_v9, %v9990_v21 }
 0xa70   :  { %v5599_v3 = vmul.f32 -1.442695, %v3273_v34  ;;  %v7732_v56 = vpop.eup %7731 }
 0xa71   :  { %v5598_v16 = vmul.f32 -1.442695, %v3272_v42  ;;  %v7734_v40 = vpop.eup %7733  ;;  %v3259_v31 = vadd.f32 1.0, %v7732_v56 }
 0xa72   :  { %7743 = vpow2.f32 %v5599_v3  ;;  %v3258_v19 = vadd.f32 1.0, %v7734_v40 }
 0xa73   :  { %7745 = vpow2.f32 %v5598_v16 }
 0xa74   :  { %v7736_v24 = vpop.eup %7735  ;;  %7747 = vrcp.f32 %v3259_v31 }
 0xa75   :  { %v7738_v47 = vpop.eup %7737  ;;  %v3261_v49 = vadd.f32 1.0, %v7736_v24  ;;  %7749 = vrcp.f32 %v3258_v19 }
 0xa76   :  { %v3260_v9 = vadd.f32 1.0, %v7738_v47 }
 0xa78   :  { %v7740_v27 = vpop.eup %7739 }
 0xa79   :  { %v7742_v18 = vpop.eup %7741  ;;  %v3287_v58 = vadd.f32 1.0, %v7740_v27 }
 0xa7a   :  { %v3286_v8 = vadd.f32 1.0, %v7742_v18 }
 0xa7b   :  { %7751 = vrcp.f32 %v3287_v58 }
 0xa7c   :  { %v7744_v55 = vpop.eup %7743  ;;  %7753 = vrcp.f32 %v3286_v8 }
 0xa7d   :  { %7755 = vrcp.f32 %v3261_v49  ;;  %v3289_v34 = vadd.f32 1.0, %v7744_v55  ;;  %v7746_v42 = vpop.eup %7745 }
 0xa7e   :  { %v3288_v56 = vadd.f32 1.0, %v7746_v42  ;;  %v7748_v3 = vpop.eup %7747 }
 0xa7f   :  { %7757 = vrcp.f32 %v3289_v34  ;;  %v7750_v16 = vpop.eup %7749  ;;  %v3299_v31 = vmul.f32 %v7748_v3, %v9082_v32 }
 0xa80   :  { %7759 = vrcp.f32 %v3260_v9  ;;  %v3298_v27 = vmul.f32 %v7750_v16, %v9084_v54 }
 0xa81   :  { %7761 = vrcp.f32 %v3288_v56 }
 0xa85   :  { %v7752_v40 = vpop.eup %7751 }
 0xa86   :  { %v7754_v21 = vpop.eup %7753  ;;  %v3303_v24 = vmul.f32 %v7752_v40, %v9189_v52 }
 0xa87   :  { %v7756_v19 = vpop.eup %7755  ;;  %v3302_v47 = vmul.f32 %v7754_v21, %v9195_v38 }
 0xa88   :  { %v9230_v18 = vadd.f32 %v3303_v24, %v3299_v31  ;;  %v3301_v55 = vmul.f32 %v7756_v19, %v9096_v45  ;;  %v9315_v31 = vld [vmem:[%s9837_s5] sm:$0xff] }
 0xa89   :  { %v7758_v49 = vpop.eup %7757  ;;  %v9232_v58 = vadd.f32 %v3302_v47, %v3298_v27 }
 0xa8a   :  { %v7760_v8 = vpop.eup %7759  ;;  %vm3311_vm2 = vcmp.gt.f32.partialorder %v9230_v18, 0.01  ;;  %v3305_v9 = vmul.f32 %v7758_v49, %v9203_v36 }
 0xa8b   :  { %vm3310_vm3 = vcmp.gt.f32.partialorder %v9232_v58, 0.01  ;;  %v7367_v32 = vpack.c.bf16 %v9230_v18, %v9232_v58  ;;  %v7762_v54 = vpop.eup %7761  ;;  %v3300_v38 = vmul.f32 %v7760_v8, %v9100_v37  ;;  %v9991_v8 = vld [vmem:[#allocation5_spill] sm:$0xff] }
 0xa8c   :  { %vm7368_vm7 = vmpackc.low %vm3311_vm2, %vm3310_vm3  ;;  %v9244_v52 = vadd.f32 %v3305_v9, %v3301_v55  ;;  %v3304_v45 = vmul.f32 %v7762_v54, %v9209_v7  ;;  %v9992_v55 = vld [vmem:[#allocation6_spill] sm:$0xff] }
 0xa8d   :  { %7369 = vmatprep.subr.msk.bf16.mxu0 %vm7368_vm7, %v7367_v32 }
 0xa8e   :  { %7372 = vmatpush3.bf16.msk.msra.mxu0 %vm7368_vm7, %v7367_v32  ;;  %v9248_v36 = vadd.f32 %v3304_v45, %v3300_v38  ;;  %vm3313_vm8 = vcmp.gt.f32.partialorder %v9244_v52, 0.01  ;;  %v9993_v32 = vld [vmem:[#allocation7_spill] sm:$0xff] }
 0xa90   :  { %vm3312_vm9 = vcmp.gt.f32.partialorder %v9248_v36, 0.01  ;;  %v7373_v21 = vpack.c.bf16 %v9244_v52, %v9248_v36 }
 0xa91   :  { %vm7374_vm10 = vmpackc.low %vm3313_vm8, %vm3312_vm9 }
 0xa92   :  { %7375 = vmatprep.subr.msk.bf16.mxu0 %vm7374_vm10, %v7373_v21 }
 0xa93   :  { %7378 = vmatpush3.bf16.msk.msra.mxu0 %vm7374_vm10, %v7373_v21  ;;  %v9994_v21 = vld [vmem:[#allocation18_spill] sm:$0xff] }
 0xa94   :  { %7396 = vmatprep.subr.bf16.mxu0 %v8330_v62 }
 0xa96   :  { %6724 = vmatmul.mubr.msk.f32.vlgmr.msra.gmra.mrb[84].mxu0 %vm762_vm5, %v8896_v25 }
 0xa97   :  { %6726 = vmatprep.mubr.msk.f32.mxu0 %vm762_vm5, %v8903_v51  ;;  %7398 = vmatpush3.bf16.msra.mxu0 %v8330_v62 }
 0xa98   :  { %7400 = vmatprep.subr.bf16.mxu0 %v8400_v30 }
 0xa9a   :  { %6727 = vmatmul.mubr.msk.f32.gmra.mrb[86].mxu0 %vm762_vm5, %v8912_v39 }
 0xa9b   :  { %6729 = vmatprep.mubr.msk.f32.mxu0 %vm762_vm5, %v8919_v41  ;;  %7402 = vmatpush3.bf16.msra.mxu0 %v8400_v30 }
 0xa9c   :  { %7404 = vmatprep.subr.bf16.mxu0 %v8416_v53 }
 0xa9e   :  { %6730 = vmatmul.mubr.msk.f32.gmra.mrb[88].mxu0 %vm762_vm5, %v8928_v12 }
 0xa9f   :  { %6732 = vmatprep.mubr.msk.f32.mxu0 %vm762_vm5, %v8935_v26  ;;  %7406 = vmatpush3.bf16.msra.mxu0 %v8416_v53 }
 0xaa0   :  { %7408 = vmatprep.subr.bf16.mxu0 %v8433_v1 }
 0xaa2   :  { %6733 = vmatmul.mubr.msk.f32.gmra.mrb[90].mxu0 %vm762_vm5, %v8944_v48 }
 0xaa3   :  { %6735 = vmatprep.mubr.msk.f32.mxu0 %vm762_vm5, %v8951_v60  ;;  %7410 = vmatpush3.bf16.msra.mxu0 %v8433_v1 }
 0xaa6   :  { %6736 = vmatmul.mubr.msk.f32.gmra.mrb[92].mxu0 %vm762_vm5, %v8959_v61 }
 0xaa7   :  { %6738 = vmatprep.mubr.msk.f32.mxu0 %vm762_vm5, %v8966_v46 }
 0xaaa   :  { %6739 = vmatmul.mubr.msk.f32.gmra.mrb[94].mxu0 %vm762_vm5, %v8973_v44 }
 0xb69   :  { %v6725_v25 = vpop.f32.mrb[84].mxu0 }
 0xb6a   :  { %v3384_v51 = vpop.f32.mrb[85].mxu0  ;;  %v3390_v41 = vadd.f32 %v6725_v25, %v8376_v15 }
 0xb6b   :  { %v3385_v39 = vadd.f32 %v3384_v51, %v8374_v14  ;;  %v3315_v51 = vsel %vm3311_vm2, %v9230_v18, 0.0 }
 0xb6d   :  { %v6728_v12 = vpop.f32.mrb[86].mxu0  ;;  %6757 = vmatprep.mubr.msk.f32.mxu1 %vm930_vm6, %v3385_v39  ;;  %v9995_v39 = vld [vmem:[#allocation19_spill] sm:$0xff] }
 0xb6e   :  { %v3394_v26 = vpop.f32.mrb[87].mxu0  ;;  %6758 = vmatmul.mubr.msk.f32.vlgmr.msra.gmra.mrb[60].mxu1 %vm930_vm6, %v3390_v41  ;;  %v3400_v60 = vadd.f32 %v6728_v12, %v8388_v22 }
 0xb6f   :  { %v3395_v48 = vadd.f32 %v3394_v26, %v8384_v20  ;;  %7414 = vmatpush3.bf16.msra.mxu1 %v8312_v57 }
 0xb70   :  { %7416 = vmatprep.subr.bf16.mxu1 %v8332_v63 }
 0xb71   :  { %v6731_v61 = vpop.f32.mrb[88].mxu0  ;;  %6760 = vmatprep.mubr.msk.f32.mxu1 %vm930_vm6, %v3395_v48  ;;  %v3314_v48 = vsel %vm3310_vm3, %v9232_v58, 0.0 }
 0xb72   :  { %v3404_v46 = vpop.f32.mrb[89].mxu0  ;;  %6761 = vmatmul.mubr.msk.f32.gmra.mrb[62].mxu1 %vm930_vm6, %v3400_v60  ;;  %v3410_v37 = vadd.f32 %v6731_v61, %v8425_v59 }
 0xb73   :  { %v3405_v44 = vadd.f32 %v3404_v46, %v8397_v28  ;;  %7418 = vmatpush3.bf16.msra.mxu1 %v8332_v63 }
 0xb74   :  { %7420 = vmatprep.subr.bf16.mxu1 %v8343_v2 }
 0xb75   :  { %v6734_v7 = vpop.f32.mrb[90].mxu0  ;;  %6779 = vmatprep.mubr.msk.f32.mxu0 %vm930_vm6, %v3405_v44 }
 0xb76   :  { %v3414_v34 = vpop.f32.mrb[91].mxu0  ;;  %6780 = vmatmul.mubr.msk.f32.vlgmr.msra.gmra.mrb[96].mxu0 %vm930_vm6, %v3410_v37  ;;  %v3420_v56 = vadd.f32 %v6734_v7, %v8450_v50  ;;  %v9996_v37 = vld [vmem:[#allocation20_spill] sm:$0xff] }
 0xb77   :  { %v3415_v42 = vadd.f32 %v3414_v34, %v8437_v23  ;;  %7422 = vmatpush3.bf16.msra.mxu1 %v8343_v2  ;;  %v3317_v34 = vsel %vm3313_vm8, %v9244_v52, 0.0 }
 0xb78   :  { %7424 = vmatprep.subr.bf16.mxu1 %v8353_v5 }
 0xb79   :  { %v6737_v3 = vpop.f32.mrb[92].mxu0  ;;  %6782 = vmatprep.mubr.msk.f32.mxu0 %vm930_vm6, %v3415_v42  ;;  %v9997_v42 = vld [vmem:[#allocation21_spill] sm:$0xff] }
 0xb7a   :  { %v3424_v16 = vpop.f32.mrb[93].mxu0  ;;  %6783 = vmatmul.mubr.msk.f32.gmra.mrb[98].mxu0 %vm930_vm6, %v3420_v56  ;;  %v3430_v24 = vadd.f32 %v6737_v3, %v9956_v0 }
 0xb7b   :  { %v3425_v40 = vadd.f32 %v3424_v16, %v8402_v43  ;;  %7426 = vmatpush3.bf16.msra.mxu1 %v8353_v5  ;;  %6815 = vmatprep.mubr.msk.f32.mxu0 %vm762_vm5, %v9315_v31 }
 0xb7c   :  { %7440 = vmatprep.subr.bf16.mxu1 %v9957_v6 }
 0xb7d   :  { %v6740_v19 = vpop.f32.mrb[94].mxu0  ;;  %6801 = vmatprep.mubr.msk.f32.mxu1 %vm930_vm6, %v3425_v40  ;;  %v3316_v40 = vsel %vm3312_vm9, %v9248_v36, 0.0 }
 0xb7e   :  { %v3434_v27 = vpop.f32.mrb[95].mxu0  ;;  %6802 = vmatmul.mubr.msk.f32.vlgmr.msra.gmra.mrb[64].mxu1 %vm930_vm6, %v3430_v24  ;;  %v3440_v49 = vadd.f32 %v6740_v19, %v9978_v29 }
 0xb7f   :  { %v3435_v47 = vadd.f32 %v3434_v27, %v9958_v10  ;;  %7442 = vmatpush3.bf16.msra.mxu1 %v9957_v6 }
 0xb80   :  { %7444 = vmatprep.subr.bf16.mxu1 %v9979_v35 }
 0xb81   :  { %6804 = vmatprep.mubr.msk.f32.mxu1 %vm930_vm6, %v3435_v47 }
 0xb82   :  { %6805 = vmatmul.mubr.msk.f32.gmra.mrb[66].mxu1 %vm930_vm6, %v3440_v49  ;;  %v9998_v49 = vld [vmem:[#allocation10_spill] sm:$0xff] }
 0xb83   :  { %7446 = vmatpush3.bf16.msra.mxu1 %v9979_v35 }
 0xb84   :  { %7448 = vmatprep.subr.bf16.mxu1 %v9991_v8 }
 0xb87   :  { %7450 = vmatpush3.bf16.msra.mxu1 %v9991_v8 }
 0xb88   :  { %7452 = vmatprep.subr.bf16.mxu1 %v9992_v55 }
 0xb8b   :  { %7454 = vmatpush3.bf16.msra.mxu1 %v9992_v55 }
 0xb8c   :  { %7472 = vmatprep.subr.bf16.mxu1 %v8312_v57 }
 0xc41   :  { %v6759_v9 = vpop.f32.mrb[60].mxu1 }
 0xc42   :  { %v3527_v54 = vadd.f32 %v9993_v32, %v6759_v9  ;;  %v3521_v38 = vpop.f32.mrb[61].mxu1 }
 0xc43   :  { %v3522_v45 = vadd.f32 %v9993_v32, %v3521_v38 }
 0xc44   :  { %v3735_v25 = vsub.f32 %v9994_v21, %v3527_v54 }
 0xc45   :  { %v3734_v41 = vsub.f32 %v9995_v39, %v3522_v45  ;;  %v6762_v12 = vpop.f32.mrb[62].mxu1 }
 0xc46   :  { %v9342_v26 = vadd.f32 %v3735_v25, %v3315_v51  ;;  %v3537_v60 = vadd.f32 %v9993_v32, %v6762_v12  ;;  %v3531_v61 = vpop.f32.mrb[63].mxu1 }
 0xc47   :  { %v9348_v46 = vadd.f32 %v3734_v41, %v3314_v48  ;;  %v3532_v44 = vadd.f32 %v9993_v32, %v3531_v61  ;;  %v9999_v32 = vld [vmem:[#allocation12_spill] sm:$0xff] }
 0xc48   :  { %v3737_v7 = vsub.f32 %v9996_v37, %v3537_v60 }
 0xc49   :  { %v3736_v56 = vsub.f32 %v9997_v42, %v3532_v44  ;;  %v6781_v3 = vpop.f32.mrb[96].mxu0 }
 0xc4a   :  { %v9356_v16 = vadd.f32 %v3737_v7, %v3317_v34  ;;  %v3624_v24 = vadd.f32 %v9053_v17, %v6781_v3  ;;  %v3618_v19 = vpop.f32.mrb[97].mxu0 }
 0xc4b   :  { %v9362_v27 = vadd.f32 %v3736_v56, %v3316_v40  ;;  %v3619_v47 = vadd.f32 %v9053_v17, %v3618_v19  ;;  %v10000_v40 = vld [vmem:[#allocation11_spill] sm:$0xff]  ;;  %v10001_v19 = vld [vmem:[#allocation13_spill] sm:$0xff] }
 0xc4c   :  { %v3743_v9 = vadd.f32 %v3624_v24, %v9998_v49 }
 0xc4d   :  { %v3742_v54 = vadd.f32 %v3619_v47, %v9999_v32  ;;  %v6784_v38 = vpop.f32.mrb[98].mxu0 }
 0xc4e   :  { %v5629_v45 = vmul.f32 -1.442695, %v3743_v9  ;;  %v3634_v25 = vadd.f32 %v9053_v17, %v6784_v38  ;;  %v3628_v51 = vpop.f32.mrb[99].mxu0 }
 0xc4f   :  { %v5628_v41 = vmul.f32 -1.442695, %v3742_v54  ;;  %v3629_v12 = vadd.f32 %v9053_v17, %v3628_v51 }
 0xc50   :  { %v3745_v48 = vadd.f32 %v3634_v25, %v9987_v13  ;;  %7763 = vpow2.f32 %v5629_v45 }
 0xc51   :  { %v3744_v60 = vadd.f32 %v3629_v12, %v9988_v33  ;;  %v6803_v61 = vpop.f32.mrb[64].mxu1  ;;  %7765 = vpow2.f32 %v5628_v41  ;;  %v10002_v41 = vld [vmem:[#allocation16_spill] sm:$0xff] }
 0xc52   :  { %v5631_v44 = vmul.f32 -1.442695, %v3745_v48  ;;  %v3721_v7 = vadd.f32 %v9068_v4, %v6803_v61  ;;  %v3715_v34 = vpop.f32.mrb[65].mxu1 }
 0xc53   :  { %v5630_v56 = vmul.f32 -1.442695, %v3744_v60  ;;  %v3716_v3 = vadd.f32 %v9068_v4, %v3715_v34 }
 0xc54   :  { %v3771_v24 = vadd.f32 %v3721_v7, %v10000_v40  ;;  %7767 = vpow2.f32 %v5631_v44 }
 0xc55   :  { %v3770_v47 = vadd.f32 %v3716_v3, %v10001_v19  ;;  %v6806_v9 = vpop.f32.mrb[66].mxu1  ;;  %7769 = vpow2.f32 %v5630_v56 }
 0xc56   :  { %v5633_v17 = vmul.f32 -1.442695, %v3771_v24  ;;  %v3731_v54 = vadd.f32 %v9068_v4, %v6806_v9  ;;  %v3725_v38 = vpop.f32.mrb[67].mxu1 }
 0xc57   :  { %v5632_v45 = vmul.f32 -1.442695, %v3770_v47  ;;  %v3726_v25 = vadd.f32 %v9068_v4, %v3725_v38 }
 0xc58   :  { %7771 = vpow2.f32 %v5633_v17  ;;  %v3773_v51 = vadd.f32 %v3731_v54, %v8520_v11 }
 0xc59   :  { %7773 = vpow2.f32 %v5632_v45  ;;  %v3772_v12 = vadd.f32 %v3726_v25, %v10002_v41 }
 0xc5a   :  { %v5635_v48 = vmul.f32 -1.442695, %v3773_v51  ;;  %v7764_v61 = vpop.eup %7763 }
 0xc5b   :  { %v5634_v60 = vmul.f32 -1.442695, %v3772_v12  ;;  %v7766_v7 = vpop.eup %7765  ;;  %v3759_v44 = vadd.f32 1.0, %v7764_v61 }
 0xc5c   :  { %7775 = vpow2.f32 %v5635_v48  ;;  %v3758_v3 = vadd.f32 1.0, %v7766_v7 }
 0xc5d   :  { %7777 = vpow2.f32 %v5634_v60 }
 0xc5e   :  { %v7768_v34 = vpop.eup %7767  ;;  %7779 = vrcp.f32 %v3759_v44 }
 0xc5f   :  { %v7770_v24 = vpop.eup %7769  ;;  %v3761_v4 = vadd.f32 1.0, %v7768_v34  ;;  %7781 = vrcp.f32 %v3758_v3 }
 0xc60   :  { %v3760_v38 = vadd.f32 1.0, %v7770_v24 }
 0xc62   :  { %v7772_v56 = vpop.eup %7771 }
 0xc63   :  { %v7774_v47 = vpop.eup %7773  ;;  %v3787_v9 = vadd.f32 1.0, %v7772_v56 }
 0xc64   :  { %v3786_v17 = vadd.f32 1.0, %v7774_v47 }
 0xc65   :  { %7783 = vrcp.f32 %v3787_v9 }
 0xc66   :  { %v7776_v54 = vpop.eup %7775  ;;  %7785 = vrcp.f32 %v3786_v17 }
 0xc67   :  { %7787 = vrcp.f32 %v3761_v4  ;;  %v3789_v45 = vadd.f32 1.0, %v7776_v54  ;;  %v7778_v25 = vpop.eup %7777 }
 0xc68   :  { %v3788_v51 = vadd.f32 1.0, %v7778_v25  ;;  %v7780_v12 = vpop.eup %7779  ;;  %v9438_v25 = vld [vmem:[%s9837_s5 + $0x20] sm:$0xff] }
 0xc69   :  { %7789 = vrcp.f32 %v3789_v45  ;;  %v7782_v48 = vpop.eup %7781  ;;  %v3799_v7 = vmul.f32 %v7780_v12, %v9230_v18  ;;  %v9431_v45 = vld [vmem:[%s9837_s5 + $0x18] sm:$0xff]  ;;  %v9454_v12 = vld [vmem:[%s9837_s5 + $0x30] sm:$0xff] }
 0xc6a   :  { %7791 = vrcp.f32 %v3760_v38  ;;  %v3798_v3 = vmul.f32 %v7782_v48, %v9232_v58  ;;  %v9463_v48 = vld [vmem:[%s9837_s5 + $0x38] sm:$0xff] }
 0xc6b   :  { %7793 = vrcp.f32 %v3788_v51  ;;  %v9447_v51 = vld [vmem:[%s9837_s5 + $0x28] sm:$0xff] }
 0xc6f   :  { %v7784_v60 = vpop.eup %7783 }
 0xc70   :  { %v7786_v61 = vpop.eup %7785  ;;  %v3803_v44 = vmul.f32 %v7784_v60, %v9342_v26  ;;  %v9470_v60 = vld [vmem:[%s9837_s5 + $0x40] sm:$0xff] }
 0xc71   :  { %v7788_v34 = vpop.eup %7787  ;;  %v3802_v24 = vmul.f32 %v7786_v61, %v9348_v46  ;;  %v9478_v61 = vld [vmem:[%s9837_s5 + $0x48] sm:$0xff] }
 0xc72   :  { %v9383_v56 = vadd.f32 %v3803_v44, %v3799_v7  ;;  %v3801_v17 = vmul.f32 %v7788_v34, %v9244_v52  ;;  %v9485_v7 = vld [vmem:[%s9837_s5 + $0x50] sm:$0xff]  ;;  %v9492_v44 = vld [vmem:[%s9837_s5 + $0x58] sm:$0xff] }
 0xc73   :  { %v7790_v47 = vpop.eup %7789  ;;  %v9385_v4 = vadd.f32 %v3802_v24, %v3798_v3 }
 0xc74   :  { %v7792_v9 = vpop.eup %7791  ;;  %vm3811_vm11 = vcmp.gt.f32.partialorder %v9383_v56, 0.01  ;;  %v3805_v54 = vmul.f32 %v7790_v47, %v9356_v16 }
 0xc75   :  { %vm3810_vm12 = vcmp.gt.f32.partialorder %v9385_v4, 0.01  ;;  %v7427_v18 = vpack.c.bf16 %v9383_v56, %v9385_v4  ;;  %v7794_v58 = vpop.eup %7793  ;;  %v3800_v46 = vmul.f32 %v7792_v9, %v9248_v36  ;;  %v9415_v36 = vld [vmem:[%s9837_s5 + $0x8] sm:$0xff] }
 0xc76   :  { %vm7428_vm13 = vmpackc.low %vm3811_vm11, %vm3810_vm12  ;;  %v9397_v26 = vadd.f32 %v3805_v54, %v3801_v17  ;;  %v3804_v52 = vmul.f32 %v7794_v58, %v9362_v27  ;;  %v9422_v27 = vld [vmem:[%s9837_s5 + $0x10] sm:$0xff] }
 0xc77   :  { %7429 = vmatprep.subr.msk.bf16.mxu0 %vm7428_vm13, %v7427_v18 }
 0xc78   :  { %7432 = vmatpush3.bf16.msk.msra.mxu0 %vm7428_vm13, %v7427_v18  ;;  %v9401_v16 = vadd.f32 %v3804_v52, %v3800_v46  ;;  %vm3813_vm14 = vcmp.gt.f32.partialorder %v9397_v26, 0.01 }
 0xc7a   :  { %vm3812_vm15 = vcmp.gt.f32.partialorder %v9401_v16, 0.01  ;;  %v7433_v38 = vpack.c.bf16 %v9397_v26, %v9401_v16 }
 0xc7b   :  { %vm7434_vm0 = vmpackc.low %vm3813_vm14, %vm3812_vm15 }
 0xc7c   :  { %7435 = vmatprep.subr.msk.bf16.mxu0 %vm7434_vm0, %v7433_v38 }
 0xc7d   :  { %7438 = vmatpush3.bf16.msk.msra.mxu0 %vm7434_vm0, %v7433_v38 }
 0xc7e   :  { %7456 = vmatprep.subr.bf16.mxu0 %v8330_v62 }
 0xc80   :  { %6816 = vmatmul.mubr.msk.f32.vlgmr.msra.gmra.mrb[100].mxu0 %vm762_vm5, %v9415_v36 }
 0xc81   :  { %6818 = vmatprep.mubr.msk.f32.mxu0 %vm762_vm5, %v9422_v27  ;;  %7458 = vmatpush3.bf16.msra.mxu0 %v8330_v62 }
 0xc82   :  { %7460 = vmatprep.subr.bf16.mxu0 %v8400_v30 }
 0xc84   :  { %6819 = vmatmul.mubr.msk.f32.gmra.mrb[102].mxu0 %vm762_vm5, %v9431_v45 }
 0xc85   :  { %6821 = vmatprep.mubr.msk.f32.mxu0 %vm762_vm5, %v9438_v25  ;;  %7462 = vmatpush3.bf16.msra.mxu0 %v8400_v30 }
 0xc86   :  { %7464 = vmatprep.subr.bf16.mxu0 %v8416_v53 }
 0xc88   :  { %6822 = vmatmul.mubr.msk.f32.gmra.mrb[104].mxu0 %vm762_vm5, %v9447_v51 }
 0xc89   :  { %6824 = vmatprep.mubr.msk.f32.mxu0 %vm762_vm5, %v9454_v12  ;;  %7466 = vmatpush3.bf16.msra.mxu0 %v8416_v53 }
 0xc8a   :  { %7468 = vmatprep.subr.bf16.mxu0 %v8433_v1 }
 0xc8c   :  { %6825 = vmatmul.mubr.msk.f32.gmra.mrb[106].mxu0 %vm762_vm5, %v9463_v48 }
 0xc8d   :  { %6827 = vmatprep.mubr.msk.f32.mxu0 %vm762_vm5, %v9470_v60  ;;  %7470 = vmatpush3.bf16.msra.mxu0 %v8433_v1 }
 0xc90   :  { %6828 = vmatmul.mubr.msk.f32.gmra.mrb[108].mxu0 %vm762_vm5, %v9478_v61 }
 0xc91   :  { %6830 = vmatprep.mubr.msk.f32.mxu0 %vm762_vm5, %v9485_v7 }
 0xc94   :  { %6831 = vmatmul.mubr.msk.f32.gmra.mrb[110].mxu0 %vm762_vm5, %v9492_v44 }
 0xd53   :  { %v6817_v34 = vpop.f32.mrb[100].mxu0 }
 0xd54   :  { %v3884_v3 = vpop.f32.mrb[101].mxu0  ;;  %v3890_v47 = vadd.f32 %v6817_v34, %v8376_v15 }
 0xd55   :  { %v3885_v24 = vadd.f32 %v3884_v3, %v8374_v14 }
 0xd57   :  { %v6820_v9 = vpop.f32.mrb[102].mxu0  ;;  %6849 = vmatprep.mubr.msk.f32.mxu1 %vm930_vm6, %v3885_v24 }
 0xd58   :  { %v3894_v17 = vpop.f32.mrb[103].mxu0  ;;  %6850 = vmatmul.mubr.msk.f32.vlgmr.msra.gmra.mrb[68].mxu1 %vm930_vm6, %v3890_v47  ;;  %v3900_v18 = vadd.f32 %v6820_v9, %v8388_v22 }
 0xd59   :  { %v3895_v54 = vadd.f32 %v3894_v17, %v8384_v20  ;;  %7474 = vmatpush3.bf16.msra.mxu1 %v8312_v57 }
 0xd5a   :  { %7476 = vmatprep.subr.bf16.mxu1 %v8332_v63 }
 0xd5b   :  { %v6823_v58 = vpop.f32.mrb[104].mxu0  ;;  %6852 = vmatprep.mubr.msk.f32.mxu1 %vm930_vm6, %v3895_v54 }
 0xd5c   :  { %v3904_v46 = vpop.f32.mrb[105].mxu0  ;;  %6853 = vmatmul.mubr.msk.f32.gmra.mrb[70].mxu1 %vm930_vm6, %v3900_v18  ;;  %v3910_v38 = vadd.f32 %v6823_v58, %v8425_v59 }
 0xd5d   :  { %v3905_v52 = vadd.f32 %v3904_v46, %v8397_v28  ;;  %7478 = vmatpush3.bf16.msra.mxu1 %v8332_v63 }
 0xd5e   :  { %7480 = vmatprep.subr.bf16.mxu1 %v8343_v2 }
 0xd5f   :  { %v6826_v34 = vpop.f32.mrb[106].mxu0  ;;  %6871 = vmatprep.mubr.msk.f32.mxu0 %vm930_vm6, %v3905_v52 }
 0xd60   :  { %v3914_v3 = vpop.f32.mrb[107].mxu0  ;;  %6872 = vmatmul.mubr.msk.f32.vlgmr.msra.gmra.mrb[112].mxu0 %vm930_vm6, %v3910_v38  ;;  %v3920_v47 = vadd.f32 %v6826_v34, %v8450_v50 }
 0xd61   :  { %v3915_v24 = vadd.f32 %v3914_v3, %v8437_v23  ;;  %7482 = vmatpush3.bf16.msra.mxu1 %v8343_v2 }
 0xd62   :  { %7484 = vmatprep.subr.bf16.mxu1 %v8353_v5 }
 0xd63   :  { %v6829_v9 = vpop.f32.mrb[108].mxu0  ;;  %6874 = vmatprep.mubr.msk.f32.mxu0 %vm930_vm6, %v3915_v24 }
 0xd64   :  { %v3924_v17 = vpop.f32.mrb[109].mxu0  ;;  %6875 = vmatmul.mubr.msk.f32.gmra.mrb[114].mxu0 %vm930_vm6, %v3920_v47  ;;  %v3930_v18 = vadd.f32 %v6829_v9, %v9956_v0 }
 0xd65   :  { %v3925_v54 = vadd.f32 %v3924_v17, %v8402_v43  ;;  %7486 = vmatpush3.bf16.msra.mxu1 %v8353_v5  ;;  %6907 = vmatprep.mubr.msk.f32.mxu0 %vm762_vm5, %v9315_v31  ;;  %v9541_v31 = vld [vmem:[%s9840_s8] ss:$0 sm:$0xff]  ;;  %v3814_v17 = vsel %vm3810_vm12, %v9385_v4, 0.0 }
 0xd66   :  { %7500 = vmatprep.subr.bf16.mxu1 %v9957_v6 }
 0xd67   :  { %v6832_v58 = vpop.f32.mrb[110].mxu0  ;;  %6893 = vmatprep.mubr.msk.f32.mxu1 %vm930_vm6, %v3925_v54 }
 0xd68   :  { %v3934_v46 = vpop.f32.mrb[111].mxu0  ;;  %6894 = vmatmul.mubr.msk.f32.vlgmr.msra.gmra.mrb[72].mxu1 %vm930_vm6, %v3930_v18  ;;  %v3940_v38 = vadd.f32 %v6832_v58, %v9978_v29 }
 0xd69   :  { %v3935_v52 = vadd.f32 %v3934_v46, %v9958_v10  ;;  %7502 = vmatpush3.bf16.msra.mxu1 %v9957_v6 }
 0xd6a   :  { %7504 = vmatprep.subr.bf16.mxu1 %v9979_v35 }
 0xd6b   :  { %6896 = vmatprep.mubr.msk.f32.mxu1 %vm930_vm6, %v3935_v52 }
 0xd6c   :  { %6897 = vmatmul.mubr.msk.f32.gmra.mrb[74].mxu1 %vm930_vm6, %v3940_v38  ;;  %v3817_v38 = vsel %vm3813_vm14, %v9397_v26, 0.0 }
 0xd6d   :  { %7506 = vmatpush3.bf16.msra.mxu1 %v9979_v35 }
 0xd6e   :  { %7508 = vmatprep.subr.bf16.mxu1 %v9991_v8 }
 0xd71   :  { %7510 = vmatpush3.bf16.msra.mxu1 %v9991_v8  ;;  %v3815_v8 = vsel %vm3811_vm11, %v9383_v56, 0.0 }
 0xd72   :  { %7512 = vmatprep.subr.bf16.mxu1 %v9992_v55 }
 0xd75   :  { %7514 = vmatpush3.bf16.msra.mxu1 %v9992_v55 }
 0xd76   :  { %7532 = vmatprep.subr.bf16.mxu1 %v8312_v57 }
 0xe2b   :  { %v6851_v6 = vpop.f32.mrb[68].mxu1 }
 0xe2c   :  { %v4027_v34 = vadd.f32 %v9541_v31, %v6851_v6  ;;  %v4021_v3 = vpop.f32.mrb[69].mxu1 }
 0xe2d   :  { %v4022_v35 = vadd.f32 %v9541_v31, %v4021_v3 }
 0xe2e   :  { %v4235_v24 = vsub.f32 %v9994_v21, %v4027_v34 }
 0xe2f   :  { %v4234_v55 = vsub.f32 %v9995_v39, %v4022_v35  ;;  %v6854_v47 = vpop.f32.mrb[70].mxu1  ;;  %v3816_v35 = vsel %vm3812_vm15, %v9401_v16, 0.0 }
 0xe30   :  { %v9550_v9 = vadd.f32 %v4235_v24, %v3815_v8  ;;  %v4037_v54 = vadd.f32 %v9541_v31, %v6854_v47  ;;  %v4031_v18 = vpop.f32.mrb[71].mxu1  ;;  %v9572_v24 = vld [vmem:[%s9840_s8 + $0x1] ss:$0 sm:$0xff] }
 0xe31   :  { %v9556_v58 = vadd.f32 %v4234_v55, %v3814_v17  ;;  %v4032_v46 = vadd.f32 %v9541_v31, %v4031_v18 }
 0xe32   :  { %v4237_v52 = vsub.f32 %v9996_v37, %v4037_v54 }
 0xe33   :  { %v4236_v6 = vsub.f32 %v9997_v42, %v4032_v46  ;;  %v6873_v34 = vpop.f32.mrb[112].mxu0 }
 0xe34   :  { %v9564_v3 = vadd.f32 %v4237_v52, %v3817_v38  ;;  %v4124_v8 = vadd.f32 %v9572_v24, %v6873_v34  ;;  %v4118_v55 = vpop.f32.mrb[113].mxu0 }
 0xe35   :  { %v9575_v47 = vadd.f32 %v4236_v6, %v3816_v35  ;;  %v4119_v17 = vadd.f32 %v9572_v24, %v4118_v55 }
 0xe36   :  { %v4243_v54 = vadd.f32 %v4124_v8, %v9998_v49  ;;  %v9587_v8 = vld [vmem:[%s9840_s8 + $0x2] ss:$0 sm:$0xff] }
 0xe37   :  { %v4242_v18 = vadd.f32 %v4119_v17, %v9999_v32  ;;  %v6876_v46 = vpop.f32.mrb[114].mxu0 }
 0xe38   :  { %v5665_v52 = vmul.f32 -1.442695, %v4243_v54  ;;  %v4134_v38 = vadd.f32 %v9572_v24, %v6876_v46  ;;  %v4128_v42 = vpop.f32.mrb[115].mxu0 }
 0xe39   :  { %v5664_v37 = vmul.f32 -1.442695, %v4242_v18  ;;  %v4129_v39 = vadd.f32 %v9572_v24, %v4128_v42 }
 0xe3a   :  { %v4245_v21 = vadd.f32 %v4134_v38, %v9987_v13  ;;  %7795 = vpow2.f32 %v5665_v52 }
 0xe3b   :  { %v4244_v34 = vadd.f32 %v4129_v39, %v9988_v33  ;;  %v6895_v6 = vpop.f32.mrb[72].mxu1  ;;  %7797 = vpow2.f32 %v5664_v37 }
 0xe3c   :  { %v5667_v35 = vmul.f32 -1.442695, %v4245_v21  ;;  %v4221_v55 = vadd.f32 %v9587_v8, %v6895_v6  ;;  %v4215_v17 = vpop.f32.mrb[73].mxu1 }
 0xe3d   :  { %v5666_v54 = vmul.f32 -1.442695, %v4244_v34  ;;  %v4216_v18 = vadd.f32 %v9587_v8, %v4215_v17 }
 0xe3e   :  { %v4271_v42 = vadd.f32 %v4221_v55, %v10000_v40  ;;  %7799 = vpow2.f32 %v5667_v35 }
 0xe3f   :  { %v4270_v46 = vadd.f32 %v4216_v18, %v10001_v19  ;;  %v6898_v39 = vpop.f32.mrb[74].mxu1  ;;  %7801 = vpow2.f32 %v5666_v54 }
 0xe40   :  { %v5669_v52 = vmul.f32 -1.442695, %v4271_v42  ;;  %v4231_v21 = vadd.f32 %v9587_v8, %v6898_v39  ;;  %v4225_v38 = vpop.f32.mrb[75].mxu1 }
 0xe41   :  { %v5668_v33 = vmul.f32 -1.442695, %v4270_v46  ;;  %v4226_v13 = vadd.f32 %v9587_v8, %v4225_v38 }
 0xe42   :  { %7803 = vpow2.f32 %v5669_v52  ;;  %v4273_v37 = vadd.f32 %v4231_v21, %v8520_v11 }
 0xe43   :  { %7805 = vpow2.f32 %v5668_v33  ;;  %v4272_v34 = vadd.f32 %v4226_v13, %v10002_v41 }
 0xe44   :  { %v5671_v6 = vmul.f32 -1.442695, %v4273_v37  ;;  %v7796_v17 = vpop.eup %7795 }
 0xe45   :  { %v5670_v55 = vmul.f32 -1.442695, %v4272_v34  ;;  %v7798_v18 = vpop.eup %7797  ;;  %v4259_v35 = vadd.f32 1.0, %v7796_v17 }
 0xe46   :  { %7807 = vpow2.f32 %v5671_v6  ;;  %v4258_v39 = vadd.f32 1.0, %v7798_v18 }
 0xe47   :  { %7809 = vpow2.f32 %v5670_v55 }
 0xe48   :  { %v7800_v42 = vpop.eup %7799  ;;  %7811 = vrcp.f32 %v4259_v35 }
 0xe49   :  { %v7802_v19 = vpop.eup %7801  ;;  %v4261_v38 = vadd.f32 1.0, %v7800_v42  ;;  %7813 = vrcp.f32 %v4258_v39 }
 0xe4a   :  { %v4260_v13 = vadd.f32 1.0, %v7802_v19 }
 0xe4c   :  { %v7804_v54 = vpop.eup %7803 }
 0xe4d   :  { %v7806_v46 = vpop.eup %7805  ;;  %v4287_v52 = vadd.f32 1.0, %v7804_v54 }
 0xe4e   :  { %v4286_v21 = vadd.f32 1.0, %v7806_v46 }
 0xe4f   :  { %7815 = vrcp.f32 %v4287_v52 }
 0xe50   :  { %v7808_v33 = vpop.eup %7807  ;;  %7817 = vrcp.f32 %v4286_v21 }
 0xe51   :  { %7819 = vrcp.f32 %v4261_v38  ;;  %v4289_v37 = vadd.f32 1.0, %v7808_v33  ;;  %v7810_v34 = vpop.eup %7809 }
 0xe52   :  { %v4288_v6 = vadd.f32 1.0, %v7810_v34  ;;  %v7812_v55 = vpop.eup %7811 }
 0xe53   :  { %7821 = vrcp.f32 %v4289_v37  ;;  %v7814_v17 = vpop.eup %7813  ;;  %v4299_v35 = vmul.f32 %v7812_v55, %v9383_v56 }
 0xe54   :  { %7823 = vrcp.f32 %v4260_v13  ;;  %v4298_v54 = vmul.f32 %v7814_v17, %v9385_v4 }
 0xe55   :  { %7825 = vrcp.f32 %v4288_v6 }
 0xe59   :  { %v7816_v18 = vpop.eup %7815 }
 0xe5a   :  { %v7818_v41 = vpop.eup %7817  ;;  %v4303_v42 = vmul.f32 %v7816_v18, %v9550_v9  ;;  %v10003_v18 = vld [vmem:[#allocation18_spill] sm:$0xff] }
 0xe5b   :  { %v7820_v39 = vpop.eup %7819  ;;  %v4302_v19 = vmul.f32 %v7818_v41, %v9556_v58 }
 0xe5c   :  { %v9601_v46 = vadd.f32 %v4303_v42, %v4299_v35  ;;  %v4301_v33 = vmul.f32 %v7820_v39, %v9397_v26  ;;  %v10004_v39 = vld [vmem:[#allocation19_spill] sm:$0xff] }
 0xe5d   :  { %v7822_v38 = vpop.eup %7821  ;;  %v9603_v52 = vadd.f32 %v4302_v19, %v4298_v54 }
 0xe5e   :  { %v7824_v21 = vpop.eup %7823  ;;  %vm4311_vm1 = vcmp.gt.f32.partialorder %v9601_v46, 0.01  ;;  %v4305_v13 = vmul.f32 %v7822_v38, %v9564_v3 }
 0xe5f   :  { %vm4310_vm2 = vcmp.gt.f32.partialorder %v9603_v52, 0.01  ;;  %v7487_v56 = vpack.c.bf16 %v9601_v46, %v9603_v52  ;;  %v7826_v4 = vpop.eup %7825  ;;  %v4300_v9 = vmul.f32 %v7824_v21, %v9401_v16  ;;  %v4315_v42 = vsel %vm4311_vm1, %v9601_v46, 0.0 }
 0xe60   :  { %vm7488_vm3 = vmpackc.low %vm4311_vm1, %vm4310_vm2  ;;  %v9615_v41 = vadd.f32 %v4305_v13, %v4301_v33  ;;  %v4304_v26 = vmul.f32 %v7826_v4, %v9575_v47  ;;  %v4827_v47 = vld [vmem:[%s9842_s11 + $0x28] sm:$0xff]  ;;  %v4314_v21 = vsel %vm4310_vm2, %v9603_v52, 0.0 }
 0xe61   :  { %7489 = vmatprep.subr.msk.bf16.mxu0 %vm7488_vm3, %v7487_v56 }
 0xe62   :  { %7492 = vmatpush3.bf16.msk.msra.mxu0 %vm7488_vm3, %v7487_v56  ;;  %v9619_v58 = vadd.f32 %v4304_v26, %v4300_v9  ;;  %vm4313_vm7 = vcmp.gt.f32.partialorder %v9615_v41, 0.01  ;;  %v10005_v9 = vld [vmem:[#allocation20_spill] sm:$0xff] }
 0xe64   :  { %vm4312_vm8 = vcmp.gt.f32.partialorder %v9619_v58, 0.01  ;;  %v7493_v3 = vpack.c.bf16 %v9615_v41, %v9619_v58 }
 0xe65   :  { %vm7494_vm9 = vmpackc.low %vm4313_vm7, %vm4312_vm8 }
 0xe66   :  { %7495 = vmatprep.subr.msk.bf16.mxu0 %vm7494_vm9, %v7493_v3 }
 0xe67   :  { %7498 = vmatpush3.bf16.msk.msra.mxu0 %vm7494_vm9, %v7493_v3  ;;  %v4317_v3 = vsel %vm4313_vm7, %v9615_v41, 0.0 }
 0xe68   :  { %7516 = vmatprep.subr.bf16.mxu0 %v8330_v62 }
 0xe6a   :  { %6908 = vmatmul.mubr.msk.f32.vlgmr.msra.gmra.mrb[116].mxu0 %vm762_vm5, %v9415_v36 }
 0xe6b   :  { %6910 = vmatprep.mubr.msk.f32.mxu0 %vm762_vm5, %v9422_v27  ;;  %7518 = vmatpush3.bf16.msra.mxu0 %v8330_v62 }
 0xe6c   :  { %7520 = vmatprep.subr.bf16.mxu0 %v8400_v30 }
 0xe6e   :  { %6911 = vmatmul.mubr.msk.f32.gmra.mrb[118].mxu0 %vm762_vm5, %v9431_v45 }
 0xe6f   :  { %6913 = vmatprep.mubr.msk.f32.mxu0 %vm762_vm5, %v9438_v25  ;;  %7522 = vmatpush3.bf16.msra.mxu0 %v8400_v30 }
 0xe70   :  { %7524 = vmatprep.subr.bf16.mxu0 %v8416_v53 }
 0xe72   :  { %6914 = vmatmul.mubr.msk.f32.gmra.mrb[120].mxu0 %vm762_vm5, %v9447_v51 }
 0xe73   :  { %6916 = vmatprep.mubr.msk.f32.mxu0 %vm762_vm5, %v9454_v12  ;;  %7526 = vmatpush3.bf16.msra.mxu0 %v8416_v53 }
 0xe74   :  { %7528 = vmatprep.subr.bf16.mxu0 %v8433_v1 }
 0xe76   :  { %6917 = vmatmul.mubr.msk.f32.gmra.mrb[122].mxu0 %vm762_vm5, %v9463_v48 }
 0xe77   :  { %6919 = vmatprep.mubr.msk.f32.mxu0 %vm762_vm5, %v9470_v60  ;;  %7530 = vmatpush3.bf16.msra.mxu0 %v8433_v1 }
 0xe7a   :  { %6920 = vmatmul.mubr.msk.f32.gmra.mrb[124].mxu0 %vm762_vm5, %v9478_v61  ;;  %v4825_v61 = vld [vmem:[%s9842_s11 + $0x18] sm:$0xff] }
 0xe7b   :  { %6922 = vmatprep.mubr.msk.f32.mxu0 %vm762_vm5, %v9485_v7 }
 0xe7e   :  { %6923 = vmatmul.mubr.msk.f32.gmra.mrb[126].mxu0 %vm762_vm5, %v9492_v44  ;;  %v4826_v44 = vld [vmem:[%s9842_s11 + $0x20] sm:$0xff] }
 0xe7f   :  { %v7567_v37 = vpack.c.bf16 %v4827_v47, %v4826_v44 }
 0xf3d   :  { %v6909_v62 = vpop.f32.mrb[116].mxu0 }
 0xf3e   :  { %v4384_v30 = vpop.f32.mrb[117].mxu0  ;;  %v4390_v16 = vadd.f32 %v6909_v62, %v8376_v15  ;;  %v10006_v62 = vld [vmem:[#allocation21_spill] sm:$0xff] }
 0xf3f   :  { %v4385_v53 = vadd.f32 %v4384_v30, %v8374_v14 }
 0xf41   :  { %v6912_v36 = vpop.f32.mrb[118].mxu0  ;;  %6941 = vmatprep.mubr.msk.f32.mxu1 %vm930_vm6, %v4385_v53 }
 0xf42   :  { %v4394_v27 = vpop.f32.mrb[119].mxu0  ;;  %6942 = vmatmul.mubr.msk.f32.vlgmr.msra.gmra.mrb[76].mxu1 %vm930_vm6, %v4390_v16  ;;  %v4400_v45 = vadd.f32 %v6912_v36, %v8388_v22  ;;  %v4316_v36 = vsel %vm4312_vm8, %v9619_v58, 0.0 }
 0xf43   :  { %v4395_v1 = vadd.f32 %v4394_v27, %v8384_v20  ;;  %7534 = vmatpush3.bf16.msra.mxu1 %v8312_v57 }
 0xf44   :  { %7536 = vmatprep.subr.bf16.mxu1 %v8332_v63 }
 0xf45   :  { %v6915_v25 = vpop.f32.mrb[120].mxu0  ;;  %6944 = vmatprep.mubr.msk.f32.mxu1 %vm930_vm6, %v4395_v1 }
 0xf46   :  { %v4404_v14 = vpop.f32.mrb[121].mxu0  ;;  %6945 = vmatmul.mubr.msk.f32.gmra.mrb[78].mxu1 %vm930_vm6, %v4400_v45  ;;  %v4410_v51 = vadd.f32 %v6915_v25, %v8425_v59 }
 0xf47   :  { %v4405_v15 = vadd.f32 %v4404_v14, %v8397_v28  ;;  %7538 = vmatpush3.bf16.msra.mxu1 %v8332_v63 }
 0xf48   :  { %7540 = vmatprep.subr.bf16.mxu1 %v8343_v2 }
 0xf49   :  { %v6918_v20 = vpop.f32.mrb[122].mxu0  ;;  %6963 = vmatprep.mubr.msk.f32.mxu0 %vm930_vm6, %v4405_v15 }
 0xf4a   :  { %v4414_v57 = vpop.f32.mrb[123].mxu0  ;;  %6964 = vmatmul.mubr.msk.f32.vlgmr.msra.gmra.mrb[128].mxu0 %vm930_vm6, %v4410_v51  ;;  %v4420_v12 = vadd.f32 %v6918_v20, %v8450_v50 }
 0xf4b   :  { %v4415_v22 = vadd.f32 %v4414_v57, %v8437_v23  ;;  %7542 = vmatpush3.bf16.msra.mxu1 %v8343_v2 }
 0xf4c   :  { %7544 = vmatprep.subr.bf16.mxu1 %v8353_v5 }
 0xf4d   :  { %v6921_v28 = vpop.f32.mrb[124].mxu0  ;;  %6966 = vmatprep.mubr.msk.f32.mxu0 %vm930_vm6, %v4415_v22 }
 0xf4e   :  { %v4424_v63 = vpop.f32.mrb[125].mxu0  ;;  %6967 = vmatmul.mubr.msk.f32.gmra.mrb[130].mxu0 %vm930_vm6, %v4420_v12  ;;  %v4430_v48 = vadd.f32 %v6921_v28, %v9956_v0  ;;  %v4823_v0 = vld [vmem:[%s9842_s11 + $0x8] sm:$0xff]  ;;  %v10007_v28 = vld [vmem:[#allocation14_spill] sm:$0xff] }
 0xf4f   :  { %v4425_v59 = vadd.f32 %v4424_v63, %v8402_v43  ;;  %7546 = vmatpush3.bf16.msra.mxu1 %v8353_v5  ;;  %v4818_v5 = vld [vmem:[%s9841_s9] sm:$0xff] }
 0xf50   :  { %6999 = vmatprep.mubr.msk.f32.mxu0 %vm762_vm5, %v4818_v5  ;;  %v4822_v43 = vld [vmem:[%s9842_s11] sm:$0xff] }
 0xf51   :  { %v6924_v60 = vpop.f32.mrb[126].mxu0  ;;  %6985 = vmatprep.mubr.msk.f32.mxu1 %vm930_vm6, %v4425_v59  ;;  %v10008_v59 = vld [vmem:[#allocation15_spill] sm:$0xff] }
 0xf52   :  { %v4434_v2 = vpop.f32.mrb[127].mxu0  ;;  %6986 = vmatmul.mubr.msk.f32.vlgmr.msra.gmra.mrb[80].mxu1 %vm930_vm6, %v4430_v48  ;;  %v4440_v50 = vadd.f32 %v6924_v60, %v9978_v29  ;;  %v7559_v29 = vpack.c.bf16 %v4823_v0, %v4822_v43  ;;  %v10009_v43 = vld [vmem:[#allocation13_spill] sm:$0xff] }
 0xf53   :  { %v4435_v23 = vadd.f32 %v4434_v2, %v9958_v10  ;;  %v4824_v10 = vld [vmem:[%s9842_s11 + $0x10] sm:$0xff] }
 0xf54   :  { %v7563_v7 = vpack.c.bf16 %v4825_v61, %v4824_v10  ;;  %7560 = vmatprep.subr.bf16.mxu1 %v7559_v29 }
 0xf55   :  { %6988 = vmatprep.mubr.msk.f32.mxu1 %vm930_vm6, %v4435_v23  ;;  %7562 = vmatpush3.bf16.msra.mxu1 %v7559_v29 }
 0xf56   :  { %6989 = vmatmul.mubr.msk.f32.gmra.mrb[82].mxu1 %vm930_vm6, %v4440_v50  ;;  %7564 = vmatprep.subr.bf16.mxu1 %v7563_v7 }
 0xf59   :  { %7566 = vmatpush3.bf16.msra.mxu1 %v7563_v7 }
 0xf5a   :  { %7568 = vmatprep.subr.bf16.mxu1 %v7567_v37 }
 0xf5d   :  { %7570 = vmatpush3.bf16.msra.mxu1 %v7567_v37  ;;  %v10010_v37 = vld [vmem:[#allocation16_spill] sm:$0xff] }
0x1015   :  { %v6943_v34 = vpop.f32.mrb[76].mxu1 }
0x1016   :  { %v4527_v6 = vadd.f32 %v9541_v31, %v6943_v34  ;;  %v4521_v55 = vpop.f32.mrb[77].mxu1 }
0x1017   :  { %v4522_v17 = vadd.f32 %v9541_v31, %v4521_v55 }
0x1018   :  { %v4735_v35 = vsub.f32 %v10003_v18, %v4527_v6 }
0x1019   :  { %v4734_v54 = vsub.f32 %v10004_v39, %v4522_v17  ;;  %v6946_v19 = vpop.f32.mrb[78].mxu1 }
0x101a   :  { %v9719_v38 = vadd.f32 %v4735_v35, %v4315_v42  ;;  %v4537_v33 = vadd.f32 %v9541_v31, %v6946_v19  ;;  %v4531_v13 = vpop.f32.mrb[79].mxu1 }
0x101b   :  { %v9725_v56 = vadd.f32 %v4734_v54, %v4314_v21  ;;  %v4532_v4 = vadd.f32 %v9541_v31, %v4531_v13 }
0x101c   :  { %v4737_v26 = vsub.f32 %v10005_v9, %v4537_v33 }
0x101d   :  { %v4736_v30 = vsub.f32 %v10006_v62, %v4532_v4  ;;  %v6965_v53 = vpop.f32.mrb[128].mxu0 }
0x101e   :  { %v9733_v16 = vadd.f32 %v4737_v26, %v4317_v3  ;;  %v4624_v27 = vadd.f32 %v9572_v24, %v6965_v53  ;;  %v4618_v1 = vpop.f32.mrb[129].mxu0 }
0x101f   :  { %v9739_v45 = vadd.f32 %v4736_v30, %v4316_v36  ;;  %v4619_v31 = vadd.f32 %v9572_v24, %v4618_v1 }
0x1020   :  { %v4743_v25 = vadd.f32 %v4624_v27, %v9998_v49 }
0x1021   :  { %v4742_v14 = vadd.f32 %v4619_v31, %v9999_v32  ;;  %v6968_v15 = vpop.f32.mrb[130].mxu0 }
0x1022   :  { %v5701_v51 = vmul.f32 -1.442695, %v4743_v25  ;;  %v4634_v20 = vadd.f32 %v9572_v24, %v6968_v15  ;;  %v4628_v57 = vpop.f32.mrb[131].mxu0 }
0x1023   :  { %v5700_v22 = vmul.f32 -1.442695, %v4742_v14  ;;  %v4629_v12 = vadd.f32 %v9572_v24, %v4628_v57 }
0x1024   :  { %v4745_v63 = vadd.f32 %v4634_v20, %v10007_v28  ;;  %7827 = vpow2.f32 %v5701_v51 }
0x1025   :  { %v4744_v48 = vadd.f32 %v4629_v12, %v10008_v59  ;;  %v6987_v60 = vpop.f32.mrb[80].mxu1  ;;  %7829 = vpow2.f32 %v5700_v22 }
0x1026   :  { %v5703_v2 = vmul.f32 -1.442695, %v4745_v63  ;;  %v4721_v23 = vadd.f32 %v9587_v8, %v6987_v60  ;;  %v4715_v49 = vpop.f32.mrb[81].mxu1 }
0x1027   :  { %v5702_v32 = vmul.f32 -1.442695, %v4744_v48  ;;  %v4716_v50 = vadd.f32 %v9587_v8, %v4715_v49  ;;  %v4834_v48 = vpop.permute.xlu0 %4833 }
0x1028   :  { %v4771_v5 = vadd.f32 %v4721_v23, %v10000_v40  ;;  %7831 = vpow2.f32 %v5703_v2  ;;  %v4839_v2 = vpop.permute.xlu1 %4838 }
0x1029   :  { %v4770_v0 = vadd.f32 %v4716_v50, %v10009_v43  ;;  %v6990_v10 = vpop.f32.mrb[82].mxu1  ;;  %7833 = vpow2.f32 %v5702_v32  ;;  %v5011_v32 = vld [vmem:[%s9843_s13] sm:$0xff] }
0x102a   :  { %v5705_v24 = vmul.f32 -1.442695, %v4771_v5  ;;  %v4731_v29 = vadd.f32 %v9587_v8, %v6990_v10  ;;  %v4725_v61 = vpop.f32.mrb[83].mxu1  ;;  %v5714_v50 = vld [vmem:[%s9844_s12] ss:$0 sm:$0xff] }
0x102b   :  { %v5704_v7 = vmul.f32 -1.442695, %v4770_v0  ;;  %v4726_v44 = vadd.f32 %v9587_v8, %v4725_v61  ;;  %v5016_v61 = vld [vmem:[%s9845_s15 + $0x8] sm:$0xff] }
0x102c   :  { %7835 = vpow2.f32 %v5705_v24  ;;  %v4773_v47 = vadd.f32 %v4731_v29, %v8520_v11  ;;  %v5015_v29 = vld [vmem:[%s9845_s15] sm:$0xff] }
0x102d   :  { %7837 = vpow2.f32 %v5704_v7  ;;  %v4772_v34 = vadd.f32 %v4726_v44, %v10010_v37  ;;  %v5012_v37 = vld [vmem:[%s9843_s13 + $0x8] sm:$0xff] }
0x102e   :  { %v5707_v6 = vmul.f32 -1.442695, %v4773_v47  ;;  %v7828_v55 = vpop.eup %7827  ;;  %v7579_v47 = vpack.c.bf16 %v5016_v61, %v5015_v29 }
0x102f   :  { %v5706_v40 = vmul.f32 -1.442695, %v4772_v34  ;;  %v7830_v17 = vpop.eup %7829  ;;  %v4759_v18 = vadd.f32 1.0, %v7828_v55  ;;  %v5017_v34 = vld [vmem:[%s9845_s15 + $0x10] sm:$0xff] }
0x1030   :  { %7839 = vpow2.f32 %v5707_v6  ;;  %v4758_v42 = vadd.f32 1.0, %v7830_v17  ;;  %v5018_v6 = vld [vmem:[%s9845_s15 + $0x18] sm:$0xff]  ;;  %v5023_v17 = vpop.permute.xlu0 %5022 }
0x1031   :  { %7841 = vpow2.f32 %v5706_v40  ;;  %v7583_v40 = vpack.c.bf16 %v5018_v6, %v5017_v34 }
0x1032   :  { %v7832_v35 = vpop.eup %7831  ;;  %7843 = vrcp.f32 %v4759_v18 }
0x1033   :  { %v7834_v39 = vpop.eup %7833  ;;  %v4761_v8 = vadd.f32 1.0, %v7832_v35  ;;  %7845 = vrcp.f32 %v4758_v42  ;;  %v5028_v35 = vpop.permute.xlu1 %5027 }
0x1034   :  { %v4760_v13 = vadd.f32 1.0, %v7834_v39 }
0x1036   :  { %v7836_v54 = vpop.eup %7835 }
0x1037   :  { %v7838_v19 = vpop.eup %7837  ;;  %v4787_v21 = vadd.f32 1.0, %v7836_v54  ;;  %v7892_v54 = vmov 0.0|0.0  }
0x1038   :  { %v4786_v11 = vadd.f32 1.0, %v7838_v19  ;;  %v10011_v19 = vmov 0.0  }
0x1039   :  { %7847 = vrcp.f32 %v4787_v21  ;;  %v5203_v21 = vld [vmem:[%s9846_s19 + $0x8] sm:$0xff] }
0x103a   :  { %v7840_v33 = vpop.eup %7839  ;;  %7849 = vrcp.f32 %v4786_v11 }
0x103b   :  { %7851 = vrcp.f32 %v4761_v8  ;;  %v4789_v4 = vadd.f32 1.0, %v7840_v33  ;;  %v7842_v9 = vpop.eup %7841  ;;  %v5202_v8 = vld [vmem:[%s9846_s19] sm:$0xff] }
0x103c   :  { %v4788_v26 = vadd.f32 1.0, %v7842_v9  ;;  %v7844_v3 = vpop.eup %7843  ;;  %v7591_v11 = vpack.c.bf16 %v5203_v21, %v5202_v8  ;;  %v5719_v33 = vld [vmem:[%s9847_s16] ss:$0 sm:$0xff] }
0x103d   :  { %7853 = vrcp.f32 %v4789_v4  ;;  %v7846_v62 = vpop.eup %7845  ;;  %v4799_v36 = vmul.f32 %v7844_v3, %v9601_v46 }
0x103e   :  { %7855 = vrcp.f32 %v4760_v13  ;;  %v4798_v31 = vmul.f32 %v7846_v62, %v9603_v52 }
0x103f   :  { %7857 = vrcp.f32 %v4788_v26 }
0x1043   :  { %v7848_v30 = vpop.eup %7847 }
0x1044   :  { %v7850_v53 = vpop.eup %7849  ;;  %v4803_v27 = vmul.f32 %v7848_v30, %v9719_v38 }
0x1045   :  { %v7852_v1 = vpop.eup %7851  ;;  %v4802_v25 = vmul.f32 %v7850_v53, %v9725_v56  ;;  %v5200_v53 = vld [vmem:[%s9848_s17] sm:$0x1] }
0x1046   :  { %v4807_v14 = vadd.f32 %v4803_v27, %v4799_v36  ;;  %v4801_v57 = vmul.f32 %v7852_v1, %v9615_v41  ;;  %v4819_v41 = vld [vmem:[%s9841_s9 + $0x8] sm:$0xff]  ;;  %v5204_v36 = vld [vmem:[%s9846_s19 + $0x10] sm:$0xff]  ;;  %v5205_v27 = vld [vmem:[%s9846_s19 + $0x18] sm:$0xff] }
0x1047   :  { %v7854_v15 = vpop.eup %7853  ;;  %v4806_v51 = vadd.f32 %v4802_v25, %v4798_v31  ;;  %v7594_v1 = vpack.c.bf16 %v5205_v27, %v5204_v36  ;;  %v5212_v31 = vlaneseq }
0x1048   :  { %v7856_v20 = vpop.eup %7855  ;;  %vm4811_vm10 = vcmp.gt.f32.partialorder %v4807_v14, 0.01  ;;  %v4805_v22 = vmul.f32 %v7854_v15, %v9733_v16  ;;  %v4829_v16 = vld [vmem:[%s9842_s11 + $0x38] sm:$0xff]  ;;  %v5210_v15 = vpop.permute.xlu0 %5209 }
0x1049   :  { %vm4810_vm11 = vcmp.gt.f32.partialorder %v4806_v51, 0.01  ;;  %v7547_v12 = vpack.c.bf16 %v4807_v14, %v4806_v51  ;;  %v7858_v28 = vpop.eup %7857  ;;  %v4800_v38 = vmul.f32 %v7856_v20, %v9619_v58  ;;  %v4828_v58 = vld [vmem:[%s9842_s11 + $0x30] sm:$0xff]  ;;  %v5213_v25 = vshrl.u32 %v5212_v31, 7 }
0x104a   :  { %vm7548_vm12 = vmpackc.low %vm4811_vm10, %vm4810_vm11  ;;  %v4809_v46 = vadd.f32 %v4805_v22, %v4801_v57  ;;  %v4804_v52 = vmul.f32 %v7858_v28, %v9739_v45  ;;  %v7571_v45 = vpack.c.bf16 %v4829_v16, %v4828_v58 }
0x104b   :  { %7549 = vmatprep.subr.msk.bf16.mxu0 %vm7548_vm12, %v7547_v12  ;;  %v5214_v14 = vsub.s32 0, %v5213_v25 }
0x104c   :  { %7552 = vmatpush3.bf16.msk.msra.mxu0 %vm7548_vm12, %v7547_v12  ;;  %v4808_v56 = vadd.f32 %v4804_v52, %v4800_v38  ;;  %vm4813_vm13 = vcmp.gt.f32.partialorder %v4809_v46, 0.01  ;;  %7572 = vmatprep.subr.bf16.mxu1 %v7571_v45  ;;  %v5206_v12 = vld [vmem:[%s9849_s20] sm:$0x1] }
0x104d   :  { %7574 = vmatpush3.bf16.msra.mxu1 %v7571_v45  ;;  %v5215_v51 = vrot.slane %v5210_v15, %v5214_v14 }
0x104e   :  { %vm4812_vm14 = vcmp.gt.f32.partialorder %v4808_v56, 0.01  ;;  %v7553_v63 = vpack.c.bf16 %v4809_v46, %v4808_v56  ;;  %7590 = vmatprep.subr.bf16.mxu1 %v7892_v54 }
0x104f   :  { %vm7554_vm15 = vmpackc.low %vm4813_vm13, %vm4812_vm14 }
0x1050   :  { %7555 = vmatprep.subr.msk.bf16.mxu0 %vm7554_vm15, %v7553_v63 }
0x1051   :  { %7558 = vmatpush3.bf16.msk.msra.mxu0 %vm7554_vm15, %v7553_v63 }
0x1054   :  { %7000 = vmatmul.mubr.msk.f32.vlgmr.msra.gmra.mrb[132].mxu0 %vm762_vm5, %v4819_v41 }
0x1055   :  { %7025 = vmatprep.mubr.msk.f32.mxu0 %vm333_vm4, %v5011_v32 }
0x1127   :  { %v7001_v59 = vpop.f32.mrb[132].mxu0 }
0x1128   :  { %v4913_v60 = vpop.f32.mrb[133].mxu0  ;;  %v4919_v49 = vadd.f32 %v7001_v59, %v4839_v2 }
0x1129   :  { %v4914_v23 = vadd.f32 %v4913_v60, %v4834_v48 }
0x112b   :  { %7018 = vmatprep.mubr.msk.f32.mxu1 %vm930_vm6, %v4914_v23 }
0x112c   :  { %7019 = vmatmul.mubr.msk.f32.vlgmr.msra.gmra.mrb[84].mxu1 %vm930_vm6, %v4919_v49  ;;  %vm7893_vm6 = vmmov 0  }
0x112d   :  { %7054 = vmatprep.mubr.msk.f32.mxu1 %vm7893_vm6, %v10011_v19  ;;  %7592 = vmatpush3.bf16.msra.mxu1 %v7591_v11 }
0x112e   :  { %7593 = vmatprep.subr.bf16.mxu1 %v7892_v54 }
0x1131   :  { %7595 = vmatpush3.bf16.msra.mxu1 %v7594_v1 }
0x11ff   :  { %v7020_v5 = vpop.f32.mrb[84].mxu1 }
0x1200   :  { %v5006_v43 = vadd.f32 %v7020_v5, %v5714_v50  ;;  %v5000_v0 = vpop.f32.mrb[85].mxu1 }
0x1201   :  { %v5001_v10 = vadd.f32 %v5714_v50, %v5000_v0 }
0x1202   :  { %v5010_v24 = vmax.f32 %v5006_v43, 0.0 }
0x1203   :  { %v5009_v7 = vmax.f32 %v5001_v10, 0.0 }
0x1205   :  { %v7575_v44 = vpack.c.bf16 %v5010_v24, %v5009_v7 }
0x1207   :  { %7576 = vmatprep.subr.bf16.mxu0 %v7575_v44 }
0x1208   :  { %7578 = vmatpush3.bf16.msra.mxu0 %v7575_v44 }
0x1209   :  { %7580 = vmatprep.subr.bf16.mxu0 %v7579_v47 }
0x120b   :  { %7026 = vmatmul.mubr.msk.f32.vlgmr.msra.gmra.mrb[134].mxu0 %vm333_vm4, %v5012_v37 }
0x120c   :  { %7582 = vmatpush3.bf16.msra.mxu0 %v7579_v47 }
0x120d   :  { %7584 = vmatprep.subr.bf16.mxu0 %v7583_v40 }
0x1210   :  { %7586 = vmatpush3.bf16.msra.mxu0 %v7583_v40 }
0x1211   :  { %7587 = vmatprep.subr.bf16.mxu0 %v7892_v54 }
0x12de   :  { %v7027_v55 = vpop.f32.mrb[134].mxu0 }
0x12df   :  { %v5102_v18 = vpop.f32.mrb[135].mxu0  ;;  %v5108_v39 = vadd.f32 %v7027_v55, %v5028_v35 }
0x12e0   :  { %v5103_v42 = vadd.f32 %v5102_v18, %v5023_v17 }
0x12e2   :  { %7036 = vmatprep.mubr.msk.f32.mxu0 %vm762_vm5, %v5103_v42 }
0x12e3   :  { %7037 = vmatmul.mubr.msk.f32.vlgmr.msra.gmra.mrb[136].mxu0 %vm762_vm5, %v5108_v39 }
0x12e4   :  { %7043 = vmatprep.mubr.msk.f32.mxu0 %vm7893_vm6, %v10011_v19 }
0x13b6   :  { %v7038_v13 = vpop.f32.mrb[136].mxu0 }
0x13b7   :  { %v5195_v4 = vadd.f32 %v7038_v13, %v5719_v33  ;;  %v5189_v9 = vpop.f32.mrb[137].mxu0 }
0x13b8   :  { %v5190_v26 = vadd.f32 %v5719_v33, %v5189_v9 }
0x13b9   :  { %v5199_v3 = vmax.f32 %v5195_v4, 0.0 }
0x13ba   :  { %v5198_v62 = vmax.f32 %v5190_v26, 0.0 }
0x13bc   :  { %v7588_v30 = vpack.c.bf16 %v5199_v3, %v5198_v62 }
0x13be   :  { %7589 = vmatpush3.bf16.msra.mxu0 %v7588_v30 }
0x13c1   :  { %7044 = vmatmul.mubr.msk.f32.vlgmr.msra.gmra.mrb[138].mxu0 %vm333_vm4, %v5200_v53  ;;  %vm5363_vm4 = vcmask 172032  }
0x1494   :  { %v5285_v20 = vpop.f32.mrb[138].mxu0 }
0x1495   :  { %v5286_v57 = vadd.f32 %v5285_v20, %v5215_v51  ;;  %v7045_v22 = vpop.f32.mrb[139].mxu0 }
0x1497   :  { %7055 = vmatmul.mubr.msk.f32.vlgmr.msra.gmra.mrb[86].mxu1 %vm762_vm5, %v5286_v57 }
0x156a   :  { %v5358_v28 = vpop.f32.mrb[86].mxu1 }
0x156b   :  { %v5359_v46 = vadd.f32 %v5358_v28, %v5206_v12  ;;  %v7056_v38 = vpop.f32.mrb[87].mxu1 }
0x156d   :  { %v5362_v52 = vmax.f32 %v5359_v46, 0.0 }
0x156f   :  { %5364 = vst.msk [vmem:[%s9850_s21] sm:$0x1] %vm5363_vm4, %v5362_v52 }

</bundles_post_ra>
